<compile_context>
chip_gen: v6e
topology: v6e:2x2x1
jax: 0.10.0
libtpu: 0.0.40
codegen_flags: <defaults>
</compile_context>

<pallas_src>
import jax
import jax.numpy as jnp
from jax.experimental import pallas as pl
from jax.experimental.pallas import tpu as pltpu


# ----------------------------- small helpers -----------------------------

def _round_up(x, m):
    return (x + m - 1) // m * m


def _lane_repack(m, c):
    """Pick a lane width L (multiple of 128 when possible) so a channel-last (M, C)
    activation can be viewed as (M*C/L, L) with the per-channel pattern repeating."""
    if c % 128 == 0:
        return c, 1
    if 128 % c == 0 and m % (128 // c) == 0:
        return 128, 128 // c
    return c, 1   # fallback: masked stores, still correct


def _pick_row_tile(ho, wo, cp, target_bytes):
    """Largest divisor of Ho whose f32 output tile stays under target_bytes."""
    best = 1
    for d in range(1, ho + 1):
        if ho % d == 0 and d * wo * cp * 4 <= target_bytes:
            best = d
    return best


# ----------------------------- elementwise Pallas kernels -----------------------------

def _bn_stats_kernel(x_ref, o_ref):
    # x_ref: (TR, L) bf16/f32 -> per-tile partial (sum, sum_sq) in f32.
    x = x_ref[...].astype(jnp.float32)
    o_ref[0, 0:1, :] = jnp.sum(x, axis=0, keepdims=True)
    o_ref[0, 1:2, :] = jnp.sum(x * x, axis=0, keepdims=True)


def _scale_shift_relu_kernel(x_ref, sc_ref, sh_ref, o_ref):
    # Fused BatchNorm affine + ReLU; math in f32, store in out dtype (bf16).
    x = x_ref[...].astype(jnp.float32)
    y = x * sc_ref[...] + sh_ref[...]
    o_ref[...] = jnp.maximum(y, 0.0).astype(o_ref.dtype)


def bn_batch_stats(x, row_tile=2048):
    """Per-channel (sum, sum_sq) over (N, H, W); lane-dense 128-wide repack."""
    N, H, W, C = x.shape
    M = N * H * W
    L, reps = _lane_repack(M, C)
    R = (M * C) // L
    x2 = x.reshape(R, L)
    tr = min(row_tile, _round_up(R, 8))
    Rp = _round_up(R, tr)
    if Rp != R:
        x2 = jnp.pad(x2, ((0, Rp - R), (0, 0)))       # zero rows add 0 to the sums
    nt = Rp // tr
    part = pl.pallas_call(
        _bn_stats_kernel,
        out_shape=jax.ShapeDtypeStruct((nt, 2, L), jnp.float32),
        grid=(nt,),
        in_specs=[pl.BlockSpec((tr, L), lambda i: (i, 0))],
        out_specs=pl.BlockSpec((1, 2, L), lambda i: (i, 0, 0)),
        compiler_params=pltpu.CompilerParams(dimension_semantics=("parallel",)),
    )(x2)
    tot = part.sum(axis=0)                             # (2, L)
    return tot.reshape(2, reps, C).sum(axis=1)         # (2, C)


def scale_shift_relu(x, scale, shift, out_dtype, row_tile=2048):
    """Fused BatchNorm affine + ReLU over an NHWC activation (lane-dense repack)."""
    N, H, W, C = x.shape
    M = N * H * W
    L, reps = _lane_repack(M, C)
    R = (M * C) // L
    x2 = x.reshape(R, L)
    sc = jnp.tile(scale.astype(jnp.float32), reps).reshape(1, L)
    sh = jnp.tile(shift.astype(jnp.float32), reps).reshape(1, L)
    tr = min(row_tile, _round_up(R, 8))
    Rp = _round_up(R, tr)
    if Rp != R:
        x2 = jnp.pad(x2, ((0, Rp - R), (0, 0)))        # padded rows sliced off below
    out = pl.pallas_call(
        _scale_shift_relu_kernel,
        out_shape=jax.ShapeDtypeStruct((Rp, L), out_dtype),
        grid=(Rp // tr,),
        in_specs=[pl.BlockSpec((tr, L), lambda i: (i, 0)),
                  pl.BlockSpec((1, L), lambda i: (0, 0)),
                  pl.BlockSpec((1, L), lambda i: (0, 0))],
        out_specs=pl.BlockSpec((tr, L), lambda i: (i, 0)),
        compiler_params=pltpu.CompilerParams(dimension_semantics=("parallel",)),
    )(x2, sc, sh)
    return out[:R].reshape(N, H, W, C)


# ----------------------------- direct-conv Pallas kernel -----------------------------

def _make_conv_kernel(K, s, Hq, tho, Wo, Cin, Cp, nt, has_res, want_stats):
    """Direct conv over one (image, output-row-tile) block: in-kernel accumulation
    over the K*K taps; resident weights; optional fused residual add / BN-stats."""

    def kernel(x_ref, w_ref, *rest):
        if has_res:
            r_ref, o_ref = rest
        elif want_stats:
            o_ref, st_ref = rest
        else:
            (o_ref,) = rest

        row0 = 0 if nt == 1 else pl.program_id(1) * tho
        acc = jnp.zeros((tho * Wo, Cp), jnp.float32)
        for kh in range(K):
            for kw in range(K):
                # Stride-phase decomposition: tap (kh,kw) lives in phase
                # p = (kh%s)*s + kw%s at a contiguous, unit-stride window.
                p = (kh % s) * s + (kw % s)
                r0, c0 = kh // s, kw // s
                xs = x_ref[0, pl.ds(p * Hq + row0 + r0, tho), pl.ds(c0, Wo), :]
                acc = acc + jnp.dot(xs.reshape(tho * Wo, Cin), w_ref[kh, kw],
                                    preferred_element_type=jnp.float32)

        if has_res:
            res = r_ref[0].astype(jnp.float32).reshape(tho * Wo, Cp)
            acc = acc + res
        o_ref[0] = acc.reshape(tho, Wo, Cp).astype(o_ref.dtype)
        if want_stats:
            # BN batch sums from the f32 accumulator (before the bf16 store).
            st_ref[0, 0:1, :] = jnp.sum(acc, axis=0, keepdims=True)
            st_ref[0, 1:2, :] = jnp.sum(acc * acc, axis=0, keepdims=True)

    return kernel


def conv2d(x, w_hwio, stride, pad, *, residual=None, want_stats=False,
           out_dtype=jnp.bfloat16, dot_dtype=jnp.bfloat16, out_tile_bytes=2 << 20):
    """Direct Conv2d (no bias) on the MXU.

    x: (N, H, W, Cin) activation (any float dtype; cast to dot_dtype).
    w_hwio: (K, K, Cw, Cout); Cw <= Cin is zero-padded to match (channel-padded acts).
    residual: optional (N, Ho, Wo, Cp) tensor fused into the epilogue add.
    want_stats: also return per-channel (sum, sum_sq) of the conv output (for BN).
    Returns (out, stats): out is (N, Ho, Wo, Cp) with Cp = round_up(Cout, 128);
    stats is (2, Cout) f32 or None.
    """
    assert not (residual is not None and want_stats)
    N, H, W, _ = x.shape
    K = w_hwio.shape[0]
    Cout = w_hwio.shape[-1]
    Cp = _round_up(Cout, 128)
    s = stride
    Ho = (H + 2 * pad - K) // s + 1
    Wo = (W + 2 * pad - K) // s + 1

    x = x.astype(dot_dtype)
    if K == 1 and pad == 0 and s > 1:
        # 1x1 strided conv: subsample once, then it's a stride-1 matmul (no halo).
        x = x[:, ::s, ::s, :]
        s = 1
        H, W = Ho, Wo

    # Pad input channels to a multiple of 8 (sublane tile) and weight to match;
    # pad Cout to a lane-dense multiple of 128.  All padding is zeros.
    Cin = _round_up(x.shape[-1], 8)
    if Cin != x.shape[-1]:
        x = jnp.pad(x, ((0, 0), (0, 0), (0, 0), (0, Cin - x.shape[-1])))
    if w_hwio.shape[2] != Cin:
        w_hwio = jnp.pad(w_hwio, ((0, 0), (0, 0), (0, Cin - w_hwio.shape[2]), (0, 0)))
    w = jnp.pad(w_hwio, ((0, 0), (0, 0), (0, 0), (0, Cp - Cout))).astype(dot_dtype)

    # Stride-phase split of the zero-padded input:
    #   x_ph[n, p*Hq + hq, wq, c] == x_pad[n, hq*s + ph, wq*s + pw, c],  p = ph*s + pw
    # so every tap window is contiguous with unit stride. Total size == |x_pad|.
    P = s * s
    Hp, Wp = H + 2 * pad, W + 2 * pad
    Hq = max(-(-Hp // s), (K - 1) // s + Ho)
    Wq = max(-(-Wp // s), (K - 1) // s + Wo)
    xp = jnp.pad(x, ((0, 0), (pad, Hq * s - H - pad), (pad, Wq * s - W - pad), (0, 0)))
    x_ph = (xp.reshape(N, Hq, s, Wq, s, Cin)
              .transpose(0, 2, 4, 1, 3, 5)
              .reshape(N, P * Hq, Wq, Cin))

    # Output row tiling (divisor of Ho; whole image for small spatial extents).
    tho = _pick_row_tile(Ho, Wo, Cp, out_tile_bytes)
    nt = Ho // tho
    grid = (N, nt)

    x_spec = pl.BlockSpec((1, P * Hq, Wq, Cin), lambda n, t: (n, 0, 0, 0))
    w_spec = pl.BlockSpec((K, K, Cin, Cp), lambda n, t: (0, 0, 0, 0))  # VMEM-resident
    o_spec = pl.BlockSpec((1, tho, Wo, Cp), lambda n, t: (n, t, 0, 0))
    cparams = pltpu.CompilerParams(dimension_semantics=("parallel", "parallel"))

    kernel = _make_conv_kernel(K, s, Hq, tho, Wo, Cin, Cp, nt,
                               residual is not None, want_stats)
    out_sds = jax.ShapeDtypeStruct((N, Ho, Wo, Cp), out_dtype)

    if residual is not None:
        assert residual.shape == (N, Ho, Wo, Cp), residual.shape
        r_spec = pl.BlockSpec((1, tho, Wo, Cp), lambda n, t: (n, t, 0, 0))
        out = pl.pallas_call(
            kernel, out_shape=out_sds, grid=grid,
            in_specs=[x_spec, w_spec, r_spec], out_specs=o_spec,
            compiler_params=cparams,
        )(x_ph, w, residual)
        return out, None

    if want_stats:
        st_sds = jax.ShapeDtypeStruct((N * nt, 2, Cp), jnp.float32)
        st_spec = pl.BlockSpec((1, 2, Cp), lambda n, t: (n * nt + t, 0, 0))
        out, st = pl.pallas_call(
            kernel, out_shape=(out_sds, st_sds), grid=grid,
            in_specs=[x_spec, w_spec], out_specs=(o_spec, st_spec),
            compiler_params=cparams,
        )(x_ph, w)
        return out, st.sum(axis=0)[:, :Cout]

    out = pl.pallas_call(
        kernel, out_shape=out_sds, grid=grid,
        in_specs=[x_spec, w_spec], out_specs=o_spec,
        compiler_params=cparams,
    )(x_ph, w)
    return out, None


def _bn_scale_shift(stats, count, gamma, beta, eps=1e-5):
    """Training-mode BatchNorm (biased batch stats) -> per-channel scale/shift."""
    mean = stats[0] / count
    var = jnp.maximum(stats[1] / count - mean * mean, 0.0)
    scale = gamma.astype(jnp.float32) / jnp.sqrt(var + eps)
    shift = beta.astype(jnp.float32) - mean * scale
    return scale, shift


# ----------------------------- PreActBlock forward -----------------------------

def preact_block(x_nchw, params, stride, dot_dtype=jnp.bfloat16):
    # Activations are stored bf16 in HBM; all BN / ReLU math and MXU accumulation
    # are f32 (standard TPU precision policy).
    x = jnp.transpose(x_nchw, (0, 2, 3, 1)).astype(dot_dtype)     # NCHW -> NHWC bf16
    N, H, W, Ci = x.shape
    Co = params['w1'].shape[-1]
    Ho = (H + 2 - 3) // stride + 1
    Wo = (W + 2 - 3) // stride + 1
    Cp = _round_up(Co, 128)

    # BN1 + ReLU: stats kernel + fused affine/ReLU kernel.
    stats1 = bn_batch_stats(x)
    sc1, sh1 = _bn_scale_shift(stats1, N * H * W,
                               params['bn1_gamma'], params['bn1_beta'])
    z = scale_shift_relu(x, sc1, sh1, out_dtype=dot_dtype)

    # Shortcut branch (residual), kept channel-padded NHWC bf16 for the fused add.
    if 'w_sc' in params:
        res, _ = conv2d(z, params['w_sc'], stride, 0, out_dtype=dot_dtype,
                        dot_dtype=dot_dtype)
    else:                                    # identity: residual is the input x
        res = jnp.pad(x, ((0, 0), (0, 0), (0, 0), (0, Cp - Ci)))

    # conv1 (3x3, stride s) with BN2 batch sum/sum-sq fused into its epilogue.
    h, stats2 = conv2d(z, params['w1'], stride, 1, want_stats=True,
                       out_dtype=dot_dtype, dot_dtype=dot_dtype)
    sc2, sh2 = _bn_scale_shift(stats2, N * Ho * Wo,
                               params['bn2_gamma'], params['bn2_beta'])
    # Zero scale/shift on padded channels so they stay exactly zero through BN+ReLU.
    sc2 = jnp.pad(sc2, (0, Cp - Co))
    sh2 = jnp.pad(sh2, (0, Cp - Co))
    h_act = scale_shift_relu(h, sc2, sh2, out_dtype=dot_dtype)

    # conv2 (3x3, stride 1) with the residual add fused into its epilogue.
    out, _ = conv2d(h_act, params['w2'], 1, 1, residual=res,
                    out_dtype=jnp.float32, dot_dtype=dot_dtype)
    out = out[..., :Co]                                           # single final slice
    return jnp.transpose(out, (0, 3, 1, 2))                       # NHWC -> NCHW


def init_params(key, ci, co, s):
    k1, k2, k3 = jax.random.split(key, 3)

    def conv_w(k, cout, cin, ksz):
        w = jax.random.normal(k, (cout, cin, ksz, ksz), jnp.float32) * 0.1   # OIHW
        return jnp.transpose(w, (2, 3, 1, 0))                                # -> HWIO

    params = {
        'w1': conv_w(k1, co, ci, 3),
        'w2': conv_w(k2, co, co, 3),
        'bn1_gamma': jnp.ones((ci,), jnp.float32),
        'bn1_beta': jnp.zeros((ci,), jnp.float32),
        'bn2_gamma': jnp.ones((co,), jnp.float32),
        'bn2_beta': jnp.zeros((co,), jnp.float32),
    }
    if ci != co or s != 1:
        params['w_sc'] = conv_w(k3, co, ci, 1)
    return params


# ----------------------------- pure-JAX reference -----------------------------
# The reference mirrors the kernel's precision / storage policy: activations stored
# bf16, conv operands bf16 with f32 accumulation, BN statistics and affine math f32.

def _ref_conv(x, w, stride, pad, dot_dtype):
    return jax.lax.conv_general_dilated(
        x.astype(dot_dtype), w.astype(dot_dtype), (stride, stride),
        [(pad, pad), (pad, pad)],
        dimension_numbers=('NHWC', 'HWIO', 'NHWC'),
        preferred_element_type=jnp.float32)


def _ref_block(x_nchw, params, stride, dot_dtype=jnp.bfloat16, eps=1e-5):
    f32 = jnp.float32
    x = jnp.transpose(x_nchw, (0, 2, 3, 1)).astype(dot_dtype)     # bf16 storage
    xf = x.astype(f32)
    m1 = xf.mean((0, 1, 2))
    v1 = ((xf - m1) ** 2).mean((0, 1, 2))
    z = jnp.maximum((xf - m1) / jnp.sqrt(v1 + eps) * params['bn1_gamma']
                    + params['bn1_beta'], 0.0).astype(dot_dtype)
    if 'w_sc' in params:
        res = _ref_conv(z, params['w_sc'], stride, 0, dot_dtype).astype(dot_dtype)
    else:
        res = x
    h = _ref_conv(z, params['w1'], stride, 1, dot_dtype)          # f32 accumulate
    m2 = h.mean((0, 1, 2))                                        # stats from f32 h
    v2 = ((h - m2) ** 2).mean((0, 1, 2))
    hb = h.astype(dot_dtype).astype(f32)                          # bf16 storage of h
    h_act = jnp.maximum((hb - m2) / jnp.sqrt(v2 + eps) * params['bn2_gamma']
                        + params['bn2_beta'], 0.0).astype(dot_dtype)
    out = res.astype(f32) + _ref_conv(h_act, params['w2'], 1, 1, dot_dtype)
    return jnp.transpose(out, (0, 3, 1, 2))


# ----------------------------------- main -----------------------------------

if __name__ == "__main__":
    key = jax.random.PRNGKey(0)
    kx, kp, kx2, kp2 = jax.random.split(key, 4)
    fwd = jax.jit(preact_block, static_argnums=(2,))

    # Case 1: channel expansion + stride 2 (projection shortcut).
    ci, co, s = 4, 8, 2
    x = jax.random.normal(kx, (2, ci, 16, 16), jnp.float32)       # NCHW like PyTorch
    params = init_params(kp, ci, co, s)
    out = jax.block_until_ready(fwd(x, params, s))
    assert out.shape == (2, co, 8, 8), out.shape
    err = float(jnp.max(jnp.abs(out - _ref_block(x, params, s))))
    if err > 2e-2:
        raise AssertionError(f"mismatch (projection shortcut): max abs err = {err}")

    # Case 2: identity shortcut (ci == co, stride 1).
    ci2, co2, s2 = 8, 8, 1
    x2 = jax.random.normal(kx2, (2, ci2, 16, 16), jnp.float32)
    params2 = init_params(kp2, ci2, co2, s2)
    out2 = jax.block_until_ready(fwd(x2, params2, s2))
    assert out2.shape == (2, co2, 16, 16), out2.shape
    err2 = float(jnp.max(jnp.abs(out2 - _ref_block(x2, params2, s2))))
    if err2 > 2e-2:
        raise AssertionError(f"mismatch (identity shortcut): max abs err = {err2}")

    print("KERNEL_OK")
</pallas_src>

<mosaic_0001>
module attributes {stable_mosaic.version = 11 : i64} {
  func.func @_bn_stats_kernel(%arg0: i32, %arg1: memref<16x128xbf16, #tpu.memory_space<vmem>>, %arg2: memref<1x2x128xf32, #tpu.memory_space<vmem>>) attributes {dimension_semantics = [#tpu.dimension_semantics<parallel>], iteration_bounds = array<i64: 1>, scalar_prefetch = 0 : i64, scratch_operands = 0 : i64, tpu.core_type = #tpu.core_type<tc>, window_params = [{transform_indices = @transform_0, window_bounds = array<i64: 16, 128>}, {transform_indices = @transform_1, window_bounds = array<i64: 1, 2, 128>}]} {
    %c0 = arith.constant 0 : index
    %c0_0 = arith.constant 0 : index
    %0 = vector.load %arg1[%c0, %c0_0] : memref<16x128xbf16, #tpu.memory_space<vmem>>, vector<16x128xbf16>
    %1 = arith.extf %0 : vector<16x128xbf16> to vector<16x128xf32>
    %cst = arith.constant dense<0.000000e+00> : vector<128xf32>
    %2 = vector.multi_reduction <add>, %1, %cst [0] : vector<16x128xf32> to vector<128xf32>
    %3 = vector.shape_cast %2 : vector<128xf32> to vector<1x128xf32>
    %c0_1 = arith.constant 0 : index
    %c0_2 = arith.constant 0 : index
    %c0_3 = arith.constant 0 : index
    %4 = vector.load %arg2[%c0_1, %c0_2, %c0_3] : memref<1x2x128xf32, #tpu.memory_space<vmem>>, vector<1x1x128xf32>
    %5 = vector.shape_cast %4 : vector<1x1x128xf32> to vector<1x128xf32>
    %6 = vector.shape_cast %3 : vector<1x128xf32> to vector<1x1x128xf32>
    tpu.vector_store %arg2[%c0_1, %c0_2, %c0_3], %6 {strides = array<i32>} : memref<1x2x128xf32, #tpu.memory_space<vmem>>, vector<1x1x128xf32>,
    %7 = arith.mulf %1, %1 : vector<16x128xf32>
    %cst_4 = arith.constant dense<0.000000e+00> : vector<128xf32>
    %8 = vector.multi_reduction <add>, %7, %cst_4 [0] : vector<16x128xf32> to vector<128xf32>
    %9 = vector.shape_cast %8 : vector<128xf32> to vector<1x128xf32>
    %c0_5 = arith.constant 0 : index
    %c1 = arith.constant 1 : index
    %c0_6 = arith.constant 0 : index
    %10 = vector.load %arg2[%c0_5, %c1, %c0_6] : memref<1x2x128xf32, #tpu.memory_space<vmem>>, vector<1x1x128xf32>
    %11 = vector.shape_cast %10 : vector<1x1x128xf32> to vector<1x128xf32>
    %12 = vector.shape_cast %9 : vector<1x128xf32> to vector<1x1x128xf32>
    tpu.vector_store %arg2[%c0_5, %c1, %c0_6], %12 {strides = array<i32>} : memref<1x2x128xf32, #tpu.memory_space<vmem>>, vector<1x1x128xf32>,
    return
  }
  func.func @transform_0(%arg0: i32) -> (i32, i32) {
    %c0_i32 = arith.constant 0 : i32
    %c0_i32_0 = arith.constant 0 : i32
    return %arg0, %c0_i32 : i32, i32
  }
  func.func @transform_1(%arg0: i32) -> (i32, i32, i32) {
    %c0_i32 = arith.constant 0 : i32
    %c0_i32_0 = arith.constant 0 : i32
    %c0_i32_1 = arith.constant 0 : i32
    return %arg0, %c0_i32, %c0_i32_0 : i32, i32, i32
  }
}

module attributes {stable_mosaic.version = 11 : i64} {
  func.func @_scale_shift_relu_kernel(%arg0: i32, %arg1: memref<16x128xbf16, #tpu.memory_space<vmem>>, %arg2: memref<1x128xf32, #tpu.memory_space<vmem>>, %arg3: memref<1x128xf32, #tpu.memory_space<vmem>>, %arg4: memref<16x128xbf16, #tpu.memory_space<vmem>>) attributes {dimension_semantics = [#tpu.dimension_semantics<parallel>], iteration_bounds = array<i64: 1>, scalar_prefetch = 0 : i64, scratch_operands = 0 : i64, tpu.core_type = #tpu.core_type<tc>, window_params = [{transform_indices = @transform_0, window_bounds = array<i64: 16, 128>}, {pipeline_mode = #tpu.pipeline_mode<synchronous>, transform_indices = @transform_1, window_bounds = array<i64: 1, 128>}, {pipeline_mode = #tpu.pipeline_mode<synchronous>, transform_indices = @transform_2, window_bounds = array<i64: 1, 128>}, {transform_indices = @transform_3, window_bounds = array<i64: 16, 128>}]} {
    %c0 = arith.constant 0 : index
    %c0_0 = arith.constant 0 : index
    %0 = vector.load %arg1[%c0, %c0_0] : memref<16x128xbf16, #tpu.memory_space<vmem>>, vector<16x128xbf16>
    %1 = arith.extf %0 : vector<16x128xbf16> to vector<16x128xf32>
    %c0_1 = arith.constant 0 : index
    %c0_2 = arith.constant 0 : index
    %2 = vector.load %arg2[%c0_1, %c0_2] : memref<1x128xf32, #tpu.memory_space<vmem>>, vector<1x128xf32>
    %3 = vector.broadcast %2 : vector<1x128xf32> to vector<16x128xf32>
    %4 = arith.mulf %1, %3 : vector<16x128xf32>
    %c0_3 = arith.constant 0 : index
    %c0_4 = arith.constant 0 : index
    %5 = vector.load %arg3[%c0_3, %c0_4] : memref<1x128xf32, #tpu.memory_space<vmem>>, vector<1x128xf32>
    %6 = vector.broadcast %5 : vector<1x128xf32> to vector<16x128xf32>
    %7 = arith.addf %4, %6 : vector<16x128xf32>
    %cst = arith.constant 0.000000e+00 : f32
    %8 = vector.broadcast %cst : f32 to vector<16x128xf32>
    %9 = arith.maximumf %7, %8 : vector<16x128xf32>
    %10 = arith.truncf %9 : vector<16x128xf32> to vector<16x128xbf16>
    %c0_5 = arith.constant 0 : index
    %c0_6 = arith.constant 0 : index
    %11 = vector.load %arg4[%c0_5, %c0_6] : memref<16x128xbf16, #tpu.memory_space<vmem>>, vector<16x128xbf16>
    tpu.vector_store %arg4[%c0_5, %c0_6], %10 {strides = array<i32>} : memref<16x128xbf16, #tpu.memory_space<vmem>>, vector<16x128xbf16>,
    return
  }
  func.func @transform_0(%arg0: i32) -> (i32, i32) {
    %c0_i32 = arith.constant 0 : i32
    %c0_i32_0 = arith.constant 0 : i32
    return %arg0, %c0_i32 : i32, i32
  }
  func.func @transform_1(%arg0: i32) -> (i32, i32) {
    %c0_i32 = arith.constant 0 : i32
    %c0_i32_0 = arith.constant 0 : i32
    %c0_i32_1 = arith.constant 0 : i32
    return %c0_i32, %c0_i32_0 : i32, i32
  }
  func.func @transform_2(%arg0: i32) -> (i32, i32) {
    %c0_i32 = arith.constant 0 : i32
    %c0_i32_0 = arith.constant 0 : i32
    %c0_i32_1 = arith.constant 0 : i32
    return %c0_i32, %c0_i32_0 : i32, i32
  }
  func.func @transform_3(%arg0: i32) -> (i32, i32) {
    %c0_i32 = arith.constant 0 : i32
    %c0_i32_0 = arith.constant 0 : i32
    return %arg0, %c0_i32 : i32, i32
  }
}

module attributes {stable_mosaic.version = 11 : i64} {
  func.func @kernel(%arg0: i32, %arg1: i32, %arg2: memref<1x8x8x8xbf16, #tpu.memory_space<vmem>>, %arg3: memref<1x1x8x128xbf16, #tpu.memory_space<vmem>>, %arg4: memref<1x8x8x128xbf16, #tpu.memory_space<vmem>>) attributes {dimension_semantics = [#tpu.dimension_semantics<parallel>, #tpu.dimension_semantics<parallel>], iteration_bounds = array<i64: 2, 1>, scalar_prefetch = 0 : i64, scratch_operands = 0 : i64, tpu.core_type = #tpu.core_type<tc>, window_params = [{transform_indices = @transform_0, window_bounds = array<i64: 1, 8, 8, 8>}, {pipeline_mode = #tpu.pipeline_mode<synchronous>, transform_indices = @transform_1, window_bounds = array<i64: 1, 1, 8, 128>}, {transform_indices = @transform_2, window_bounds = array<i64: 1, 8, 8, 128>}]} {
    %cst = arith.constant 0.000000e+00 : f32
    %0 = vector.broadcast %cst : f32 to vector<64x128xf32>
    %c0 = arith.constant 0 : index
    %c0_0 = arith.constant 0 : index
    %c0_1 = arith.constant 0 : index
    %c0_2 = arith.constant 0 : index
    %1 = vector.load %arg2[%c0, %c0_0, %c0_1, %c0_2] : memref<1x8x8x8xbf16, #tpu.memory_space<vmem>>, vector<1x8x8x8xbf16>
    %2 = vector.shape_cast %1 : vector<1x8x8x8xbf16> to vector<8x8x8xbf16>
    %3 = vector.shape_cast %2 : vector<8x8x8xbf16> to vector<64x8xbf16>
    %c0_3 = arith.constant 0 : index
    %c0_4 = arith.constant 0 : index
    %c0_5 = arith.constant 0 : index
    %c0_6 = arith.constant 0 : index
    %4 = vector.load %arg3[%c0_3, %c0_4, %c0_5, %c0_6] : memref<1x1x8x128xbf16, #tpu.memory_space<vmem>>, vector<1x1x8x128xbf16>
    %5 = vector.shape_cast %4 : vector<1x1x8x128xbf16> to vector<8x128xbf16>
    %cst_7 = arith.constant dense<0.000000e+00> : vector<64x128xf32>
    %6 = tpu.matmul %3, %5, %cst_7 {dimension_numbers = #tpu.dot_dimension_numbers<[1], [0], [0], [1], [0, 0, 1, 1], [], []>} : vector<64x8xbf16>, vector<8x128xbf16>, vector<64x128xf32> -> vector<64x128xf32>
    %7 = arith.addf %0, %6 : vector<64x128xf32>
    %8 = vector.shape_cast %7 : vector<64x128xf32> to vector<8x8x128xf32>
    %9 = arith.truncf %8 : vector<8x8x128xf32> to vector<8x8x128xbf16>
    %c0_8 = arith.constant 0 : index
    %c0_9 = arith.constant 0 : index
    %c0_10 = arith.constant 0 : index
    %c0_11 = arith.constant 0 : index
    %10 = vector.load %arg4[%c0_8, %c0_9, %c0_10, %c0_11] : memref<1x8x8x128xbf16, #tpu.memory_space<vmem>>, vector<1x8x8x128xbf16>
    %11 = vector.shape_cast %10 : vector<1x8x8x128xbf16> to vector<8x8x128xbf16>
    %12 = vector.shape_cast %9 : vector<8x8x128xbf16> to vector<1x8x8x128xbf16>
    tpu.vector_store %arg4[%c0_8, %c0_9, %c0_10, %c0_11], %12 {strides = array<i32>} : memref<1x8x8x128xbf16, #tpu.memory_space<vmem>>, vector<1x8x8x128xbf16>,
    return
  }
  func.func @transform_0(%arg0: i32, %arg1: i32) -> (i32, i32, i32, i32) {
    %c0_i32 = arith.constant 0 : i32
    %c0_i32_0 = arith.constant 0 : i32
    %c0_i32_1 = arith.constant 0 : i32
    %c0_i32_2 = arith.constant 0 : i32
    return %arg0, %c0_i32, %c0_i32_0, %c0_i32_1 : i32, i32, i32, i32
  }
  func.func @transform_1(%arg0: i32, %arg1: i32) -> (i32, i32, i32, i32) {
    %c0_i32 = arith.constant 0 : i32
    %c0_i32_0 = arith.constant 0 : i32
    %c0_i32_1 = arith.constant 0 : i32
    %c0_i32_2 = arith.constant 0 : i32
    %c0_i32_3 = arith.constant 0 : i32
    return %c0_i32, %c0_i32_0, %c0_i32_1, %c0_i32_2 : i32, i32, i32, i32
  }
  func.func @transform_2(%arg0: i32, %arg1: i32) -> (i32, i32, i32, i32) {
    %c0_i32 = arith.constant 0 : i32
    %c0_i32_0 = arith.constant 0 : i32
    %c0_i32_1 = arith.constant 0 : i32
    return %arg0, %arg1, %c0_i32, %c0_i32_0 : i32, i32, i32, i32
  }
}

module attributes {stable_mosaic.version = 11 : i64} {
  func.func @kernel(%arg0: i32, %arg1: i32, %arg2: memref<1x36x9x8xbf16, #tpu.memory_space<vmem>>, %arg3: memref<3x3x8x128xbf16, #tpu.memory_space<vmem>>, %arg4: memref<1x8x8x128xbf16, #tpu.memory_space<vmem>>, %arg5: memref<1x2x128xf32, #tpu.memory_space<vmem>>) attributes {dimension_semantics = [#tpu.dimension_semantics<parallel>, #tpu.dimension_semantics<parallel>], iteration_bounds = array<i64: 2, 1>, scalar_prefetch = 0 : i64, scratch_operands = 0 : i64, tpu.core_type = #tpu.core_type<tc>, window_params = [{transform_indices = @transform_0, window_bounds = array<i64: 1, 36, 9, 8>}, {pipeline_mode = #tpu.pipeline_mode<synchronous>, transform_indices = @transform_1, window_bounds = array<i64: 3, 3, 8, 128>}, {transform_indices = @transform_2, window_bounds = array<i64: 1, 8, 8, 128>}, {transform_indices = @transform_3, window_bounds = array<i64: 1, 2, 128>}]} {
    %cst = arith.constant 0.000000e+00 : f32
    %0 = vector.broadcast %cst : f32 to vector<64x128xf32>
    %c0 = arith.constant 0 : index
    %c0_0 = arith.constant 0 : index
    %c0_1 = arith.constant 0 : index
    %c0_2 = arith.constant 0 : index
    %1 = vector.load %arg2[%c0, %c0_0, %c0_1, %c0_2] : memref<1x36x9x8xbf16, #tpu.memory_space<vmem>>, vector<1x8x8x8xbf16>
    %2 = vector.shape_cast %1 : vector<1x8x8x8xbf16> to vector<8x8x8xbf16>
    %3 = vector.shape_cast %2 : vector<8x8x8xbf16> to vector<64x8xbf16>
    %c0_3 = arith.constant 0 : index
    %c0_4 = arith.constant 0 : index
    %c0_5 = arith.constant 0 : index
    %c0_6 = arith.constant 0 : index
    %4 = vector.load %arg3[%c0_3, %c0_4, %c0_5, %c0_6] : memref<3x3x8x128xbf16, #tpu.memory_space<vmem>>, vector<1x1x8x128xbf16>
    %5 = vector.shape_cast %4 : vector<1x1x8x128xbf16> to vector<8x128xbf16>
    %cst_7 = arith.constant dense<0.000000e+00> : vector<64x128xf32>
    %6 = tpu.matmul %3, %5, %cst_7 {dimension_numbers = #tpu.dot_dimension_numbers<[1], [0], [0], [1], [0, 0, 1, 1], [], []>} : vector<64x8xbf16>, vector<8x128xbf16>, vector<64x128xf32> -> vector<64x128xf32>
    %7 = arith.addf %0, %6 : vector<64x128xf32>
    %c0_8 = arith.constant 0 : index
    %c9 = arith.constant 9 : index
    %c0_9 = arith.constant 0 : index
    %c0_10 = arith.constant 0 : index
    %8 = vector.load %arg2[%c0_8, %c9, %c0_9, %c0_10] : memref<1x36x9x8xbf16, #tpu.memory_space<vmem>>, vector<1x8x8x8xbf16>
    %9 = vector.shape_cast %8 : vector<1x8x8x8xbf16> to vector<8x8x8xbf16>
    %10 = vector.shape_cast %9 : vector<8x8x8xbf16> to vector<64x8xbf16>
    %c0_11 = arith.constant 0 : index
    %c1 = arith.constant 1 : index
    %c0_12 = arith.constant 0 : index
    %c0_13 = arith.constant 0 : index
    %11 = vector.load %arg3[%c0_11, %c1, %c0_12, %c0_13] : memref<3x3x8x128xbf16, #tpu.memory_space<vmem>>, vector<1x1x8x128xbf16>
    %12 = vector.shape_cast %11 : vector<1x1x8x128xbf16> to vector<8x128xbf16>
    %cst_14 = arith.constant dense<0.000000e+00> : vector<64x128xf32>
    %13 = tpu.matmul %10, %12, %cst_14 {dimension_numbers = #tpu.dot_dimension_numbers<[1], [0], [0], [1], [0, 0, 1, 1], [], []>} : vector<64x8xbf16>, vector<8x128xbf16>, vector<64x128xf32> -> vector<64x128xf32>
    %14 = arith.addf %7, %13 : vector<64x128xf32>
    %c0_15 = arith.constant 0 : index
    %c0_16 = arith.constant 0 : index
    %c1_17 = arith.constant 1 : index
    %c0_18 = arith.constant 0 : index
    %15 = vector.load %arg2[%c0_15, %c0_16, %c1_17, %c0_18] : memref<1x36x9x8xbf16, #tpu.memory_space<vmem>>, vector<1x8x8x8xbf16>
    %16 = vector.shape_cast %15 : vector<1x8x8x8xbf16> to vector<8x8x8xbf16>
    %17 = vector.shape_cast %16 : vector<8x8x8xbf16> to vector<64x8xbf16>
    %c0_19 = arith.constant 0 : index
    %c2 = arith.constant 2 : index
    %c0_20 = arith.constant 0 : index
    %c0_21 = arith.constant 0 : index
    %18 = vector.load %arg3[%c0_19, %c2, %c0_20, %c0_21] : memref<3x3x8x128xbf16, #tpu.memory_space<vmem>>, vector<1x1x8x128xbf16>
    %19 = vector.shape_cast %18 : vector<1x1x8x128xbf16> to vector<8x128xbf16>
    %cst_22 = arith.constant dense<0.000000e+00> : vector<64x128xf32>
    %20 = tpu.matmul %17, %19, %cst_22 {dimension_numbers = #tpu.dot_dimension_numbers<[1], [0], [0], [1], [0, 0, 1, 1], [], []>} : vector<64x8xbf16>, vector<8x128xbf16>, vector<64x128xf32> -> vector<64x128xf32>
    %21 = arith.addf %14, %20 : vector<64x128xf32>
    %c0_23 = arith.constant 0 : index
    %c18 = arith.constant 18 : index
    %c0_24 = arith.constant 0 : index
    %c0_25 = arith.constant 0 : index
    %22 = vector.load %arg2[%c0_23, %c18, %c0_24, %c0_25] : memref<1x36x9x8xbf16, #tpu.memory_space<vmem>>, vector<1x8x8x8xbf16>
    %23 = vector.shape_cast %22 : vector<1x8x8x8xbf16> to vector<8x8x8xbf16>
    %24 = vector.shape_cast %23 : vector<8x8x8xbf16> to vector<64x8xbf16>
    %c1_26 = arith.constant 1 : index
    %c0_27 = arith.constant 0 : index
    %c0_28 = arith.constant 0 : index
    %c0_29 = arith.constant 0 : index
    %25 = vector.load %arg3[%c1_26, %c0_27, %c0_28, %c0_29] : memref<3x3x8x128xbf16, #tpu.memory_space<vmem>>, vector<1x1x8x128xbf16>
    %26 = vector.shape_cast %25 : vector<1x1x8x128xbf16> to vector<8x128xbf16>
    %cst_30 = arith.constant dense<0.000000e+00> : vector<64x128xf32>
    %27 = tpu.matmul %24, %26, %cst_30 {dimension_numbers = #tpu.dot_dimension_numbers<[1], [0], [0], [1], [0, 0, 1, 1], [], []>} : vector<64x8xbf16>, vector<8x128xbf16>, vector<64x128xf32> -> vector<64x128xf32>
    %28 = arith.addf %21, %27 : vector<64x128xf32>
    %c0_31 = arith.constant 0 : index
    %c27 = arith.constant 27 : index
    %c0_32 = arith.constant 0 : index
    %c0_33 = arith.constant 0 : index
    %29 = vector.load %arg2[%c0_31, %c27, %c0_32, %c0_33] : memref<1x36x9x8xbf16, #tpu.memory_space<vmem>>, vector<1x8x8x8xbf16>
    %30 = vector.shape_cast %29 : vector<1x8x8x8xbf16> to vector<8x8x8xbf16>
    %31 = vector.shape_cast %30 : vector<8x8x8xbf16> to vector<64x8xbf16>
    %c1_34 = arith.constant 1 : index
    %c1_35 = arith.constant 1 : index
    %c0_36 = arith.constant 0 : index
    %c0_37 = arith.constant 0 : index
    %32 = vector.load %arg3[%c1_34, %c1_35, %c0_36, %c0_37] : memref<3x3x8x128xbf16, #tpu.memory_space<vmem>>, vector<1x1x8x128xbf16>
    %33 = vector.shape_cast %32 : vector<1x1x8x128xbf16> to vector<8x128xbf16>
    %cst_38 = arith.constant dense<0.000000e+00> : vector<64x128xf32>
    %34 = tpu.matmul %31, %33, %cst_38 {dimension_numbers = #tpu.dot_dimension_numbers<[1], [0], [0], [1], [0, 0, 1, 1], [], []>} : vector<64x8xbf16>, vector<8x128xbf16>, vector<64x128xf32> -> vector<64x128xf32>
    %35 = arith.addf %28, %34 : vector<64x128xf32>
    %c0_39 = arith.constant 0 : index
    %c18_40 = arith.constant 18 : index
    %c1_41 = arith.constant 1 : index
    %c0_42 = arith.constant 0 : index
    %36 = vector.load %arg2[%c0_39, %c18_40, %c1_41, %c0_42] : memref<1x36x9x8xbf16, #tpu.memory_space<vmem>>, vector<1x8x8x8xbf16>
    %37 = vector.shape_cast %36 : vector<1x8x8x8xbf16> to vector<8x8x8xbf16>
    %38 = vector.shape_cast %37 : vector<8x8x8xbf16> to vector<64x8xbf16>
    %c1_43 = arith.constant 1 : index
    %c2_44 = arith.constant 2 : index
    %c0_45 = arith.constant 0 : index
    %c0_46 = arith.constant 0 : index
    %39 = vector.load %arg3[%c1_43, %c2_44, %c0_45, %c0_46] : memref<3x3x8x128xbf16, #tpu.memory_space<vmem>>, vector<1x1x8x128xbf16>
    %40 = vector.shape_cast %39 : vector<1x1x8x128xbf16> to vector<8x128xbf16>
    %cst_47 = arith.constant dense<0.000000e+00> : vector<64x128xf32>
    %41 = tpu.matmul %38, %40, %cst_47 {dimension_numbers = #tpu.dot_dimension_numbers<[1], [0], [0], [1], [0, 0, 1, 1], [], []>} : vector<64x8xbf16>, vector<8x128xbf16>, vector<64x128xf32> -> vector<64x128xf32>
    %42 = arith.addf %35, %41 : vector<64x128xf32>
    %c0_48 = arith.constant 0 : index
    %c1_49 = arith.constant 1 : index
    %c0_50 = arith.constant 0 : index
    %c0_51 = arith.constant 0 : index
    %43 = vector.load %arg2[%c0_48, %c1_49, %c0_50, %c0_51] : memref<1x36x9x8xbf16, #tpu.memory_space<vmem>>, vector<1x8x8x8xbf16>
    %44 = vector.shape_cast %43 : vector<1x8x8x8xbf16> to vector<8x8x8xbf16>
    %45 = vector.shape_cast %44 : vector<8x8x8xbf16> to vector<64x8xbf16>
    %c2_52 = arith.constant 2 : index
    %c0_53 = arith.constant 0 : index
    %c0_54 = arith.constant 0 : index
    %c0_55 = arith.constant 0 : index
    %46 = vector.load %arg3[%c2_52, %c0_53, %c0_54, %c0_55] : memref<3x3x8x128xbf16, #tpu.memory_space<vmem>>, vector<1x1x8x128xbf16>
    %47 = vector.shape_cast %46 : vector<1x1x8x128xbf16> to vector<8x128xbf16>
    %cst_56 = arith.constant dense<0.000000e+00> : vector<64x128xf32>
    %48 = tpu.matmul %45, %47, %cst_56 {dimension_numbers = #tpu.dot_dimension_numbers<[1], [0], [0], [1], [0, 0, 1, 1], [], []>} : vector<64x8xbf16>, vector<8x128xbf16>, vector<64x128xf32> -> vector<64x128xf32>
    %49 = arith.addf %42, %48 : vector<64x128xf32>
    %c0_57 = arith.constant 0 : index
    %c10 = arith.constant 10 : index
    %c0_58 = arith.constant 0 : index
    %c0_59 = arith.constant 0 : index
    %50 = vector.load %arg2[%c0_57, %c10, %c0_58, %c0_59] : memref<1x36x9x8xbf16, #tpu.memory_space<vmem>>, vector<1x8x8x8xbf16>
    %51 = vector.shape_cast %50 : vector<1x8x8x8xbf16> to vector<8x8x8xbf16>
    %52 = vector.shape_cast %51 : vector<8x8x8xbf16> to vector<64x8xbf16>
    %c2_60 = arith.constant 2 : index
    %c1_61 = arith.constant 1 : index
    %c0_62 = arith.constant 0 : index
    %c0_63 = arith.constant 0 : index
    %53 = vector.load %arg3[%c2_60, %c1_61, %c0_62, %c0_63] : memref<3x3x8x128xbf16, #tpu.memory_space<vmem>>, vector<1x1x8x128xbf16>
    %54 = vector.shape_cast %53 : vector<1x1x8x128xbf16> to vector<8x128xbf16>
    %cst_64 = arith.constant dense<0.000000e+00> : vector<64x128xf32>
    %55 = tpu.matmul %52, %54, %cst_64 {dimension_numbers = #tpu.dot_dimension_numbers<[1], [0], [0], [1], [0, 0, 1, 1], [], []>} : vector<64x8xbf16>, vector<8x128xbf16>, vector<64x128xf32> -> vector<64x128xf32>
    %56 = arith.addf %49, %55 : vector<64x128xf32>
    %c0_65 = arith.constant 0 : index
    %c1_66 = arith.constant 1 : index
    %c1_67 = arith.constant 1 : index
    %c0_68 = arith.constant 0 : index
    %57 = vector.load %arg2[%c0_65, %c1_66, %c1_67, %c0_68] : memref<1x36x9x8xbf16, #tpu.memory_space<vmem>>, vector<1x8x8x8xbf16>
    %58 = vector.shape_cast %57 : vector<1x8x8x8xbf16> to vector<8x8x8xbf16>
    %59 = vector.shape_cast %58 : vector<8x8x8xbf16> to vector<64x8xbf16>
    %c2_69 = arith.constant 2 : index
    %c2_70 = arith.constant 2 : index
    %c0_71 = arith.constant 0 : index
    %c0_72 = arith.constant 0 : index
    %60 = vector.load %arg3[%c2_69, %c2_70, %c0_71, %c0_72] : memref<3x3x8x128xbf16, #tpu.memory_space<vmem>>, vector<1x1x8x128xbf16>
    %61 = vector.shape_cast %60 : vector<1x1x8x128xbf16> to vector<8x128xbf16>
    %cst_73 = arith.constant dense<0.000000e+00> : vector<64x128xf32>
    %62 = tpu.matmul %59, %61, %cst_73 {dimension_numbers = #tpu.dot_dimension_numbers<[1], [0], [0], [1], [0, 0, 1, 1], [], []>} : vector<64x8xbf16>, vector<8x128xbf16>, vector<64x128xf32> -> vector<64x128xf32>
    %63 = arith.addf %56, %62 : vector<64x128xf32>
    %64 = vector.shape_cast %63 : vector<64x128xf32> to vector<8x8x128xf32>
    %65 = arith.truncf %64 : vector<8x8x128xf32> to vector<8x8x128xbf16>
    %c0_74 = arith.constant 0 : index
    %c0_75 = arith.constant 0 : index
    %c0_76 = arith.constant 0 : index
    %c0_77 = arith.constant 0 : index
    %66 = vector.load %arg4[%c0_74, %c0_75, %c0_76, %c0_77] : memref<1x8x8x128xbf16, #tpu.memory_space<vmem>>, vector<1x8x8x128xbf16>
    %67 = vector.shape_cast %66 : vector<1x8x8x128xbf16> to vector<8x8x128xbf16>
    %68 = vector.shape_cast %65 : vector<8x8x128xbf16> to vector<1x8x8x128xbf16>
    tpu.vector_store %arg4[%c0_74, %c0_75, %c0_76, %c0_77], %68 {strides = array<i32>} : memref<1x8x8x128xbf16, #tpu.memory_space<vmem>>, vector<1x8x8x128xbf16>,
    %cst_78 = arith.constant dense<0.000000e+00> : vector<128xf32>
    %69 = vector.multi_reduction <add>, %63, %cst_78 [0] : vector<64x128xf32> to vector<128xf32>
    %70 = vector.shape_cast %69 : vector<128xf32> to vector<1x128xf32>
    %c0_79 = arith.constant 0 : index
    %c0_80 = arith.constant 0 : index
    %c0_81 = arith.constant 0 : index
    %71 = vector.load %arg5[%c0_79, %c0_80, %c0_81] : memref<1x2x128xf32, #tpu.memory_space<vmem>>, vector<1x1x128xf32>
    %72 = vector.shape_cast %71 : vector<1x1x128xf32> to vector<1x128xf32>
    %73 = vector.shape_cast %70 : vector<1x128xf32> to vector<1x1x128xf32>
    tpu.vector_store %arg5[%c0_79, %c0_80, %c0_81], %73 {strides = array<i32>} : memref<1x2x128xf32, #tpu.memory_space<vmem>>, vector<1x1x128xf32>,
    %74 = arith.mulf %63, %63 : vector<64x128xf32>
    %cst_82 = arith.constant dense<0.000000e+00> : vector<128xf32>
    %75 = vector.multi_reduction <add>, %74, %cst_82 [0] : vector<64x128xf32> to vector<128xf32>
    %76 = vector.shape_cast %75 : vector<128xf32> to vector<1x128xf32>
    %c0_83 = arith.constant 0 : index
    %c1_84 = arith.constant 1 : index
    %c0_85 = arith.constant 0 : index
    %77 = vector.load %arg5[%c0_83, %c1_84, %c0_85] : memref<1x2x128xf32, #tpu.memory_space<vmem>>, vector<1x1x128xf32>
    %78 = vector.shape_cast %77 : vector<1x1x128xf32> to vector<1x128xf32>
    %79 = vector.shape_cast %76 : vector<1x128xf32> to vector<1x1x128xf32>
    tpu.vector_store %arg5[%c0_83, %c1_84, %c0_85], %79 {strides = array<i32>} : memref<1x2x128xf32, #tpu.memory_space<vmem>>, vector<1x1x128xf32>,
    return
  }
  func.func @transform_0(%arg0: i32, %arg1: i32) -> (i32, i32, i32, i32) {
    %c0_i32 = arith.constant 0 : i32
    %c0_i32_0 = arith.constant 0 : i32
    %c0_i32_1 = arith.constant 0 : i32
    %c0_i32_2 = arith.constant 0 : i32
    return %arg0, %c0_i32, %c0_i32_0, %c0_i32_1 : i32, i32, i32, i32
  }
  func.func @transform_1(%arg0: i32, %arg1: i32) -> (i32, i32, i32, i32) {
    %c0_i32 = arith.constant 0 : i32
    %c0_i32_0 = arith.constant 0 : i32
    %c0_i32_1 = arith.constant 0 : i32
    %c0_i32_2 = arith.constant 0 : i32
    %c0_i32_3 = arith.constant 0 : i32
    return %c0_i32, %c0_i32_0, %c0_i32_1, %c0_i32_2 : i32, i32, i32, i32
  }
  func.func @transform_2(%arg0: i32, %arg1: i32) -> (i32, i32, i32, i32) {
    %c0_i32 = arith.constant 0 : i32
    %c0_i32_0 = arith.constant 0 : i32
    %c0_i32_1 = arith.constant 0 : i32
    return %arg0, %arg1, %c0_i32, %c0_i32_0 : i32, i32, i32, i32
  }
  func.func @transform_3(%arg0: i32, %arg1: i32) -> (i32, i32, i32) {
    %c1_i32 = arith.constant 1 : i32
    %0 = arith.muli %arg0, %c1_i32 : i32
    %1 = arith.addi %0, %arg1 : i32
    %c0_i32 = arith.constant 0 : i32
    %c0_i32_0 = arith.constant 0 : i32
    %c0_i32_1 = arith.constant 0 : i32
    return %1, %c0_i32, %c0_i32_0 : i32, i32, i32
  }
}

module attributes {stable_mosaic.version = 11 : i64} {
  func.func @_scale_shift_relu_kernel(%arg0: i32, %arg1: memref<128x128xbf16, #tpu.memory_space<vmem>>, %arg2: memref<1x128xf32, #tpu.memory_space<vmem>>, %arg3: memref<1x128xf32, #tpu.memory_space<vmem>>, %arg4: memref<128x128xbf16, #tpu.memory_space<vmem>>) attributes {dimension_semantics = [#tpu.dimension_semantics<parallel>], iteration_bounds = array<i64: 1>, scalar_prefetch = 0 : i64, scratch_operands = 0 : i64, tpu.core_type = #tpu.core_type<tc>, window_params = [{transform_indices = @transform_0, window_bounds = array<i64: 128, 128>}, {pipeline_mode = #tpu.pipeline_mode<synchronous>, transform_indices = @transform_1, window_bounds = array<i64: 1, 128>}, {pipeline_mode = #tpu.pipeline_mode<synchronous>, transform_indices = @transform_2, window_bounds = array<i64: 1, 128>}, {transform_indices = @transform_3, window_bounds = array<i64: 128, 128>}]} {
    %c0 = arith.constant 0 : index
    %c0_0 = arith.constant 0 : index
    %0 = vector.load %arg1[%c0, %c0_0] : memref<128x128xbf16, #tpu.memory_space<vmem>>, vector<128x128xbf16>
    %1 = arith.extf %0 : vector<128x128xbf16> to vector<128x128xf32>
    %c0_1 = arith.constant 0 : index
    %c0_2 = arith.constant 0 : index
    %2 = vector.load %arg2[%c0_1, %c0_2] : memref<1x128xf32, #tpu.memory_space<vmem>>, vector<1x128xf32>
    %3 = vector.broadcast %2 : vector<1x128xf32> to vector<128x128xf32>
    %4 = arith.mulf %1, %3 : vector<128x128xf32>
    %c0_3 = arith.constant 0 : index
    %c0_4 = arith.constant 0 : index
    %5 = vector.load %arg3[%c0_3, %c0_4] : memref<1x128xf32, #tpu.memory_space<vmem>>, vector<1x128xf32>
    %6 = vector.broadcast %5 : vector<1x128xf32> to vector<128x128xf32>
    %7 = arith.addf %4, %6 : vector<128x128xf32>
    %cst = arith.constant 0.000000e+00 : f32
    %8 = vector.broadcast %cst : f32 to vector<128x128xf32>
    %9 = arith.maximumf %7, %8 : vector<128x128xf32>
    %10 = arith.truncf %9 : vector<128x128xf32> to vector<128x128xbf16>
    %c0_5 = arith.constant 0 : index
    %c0_6 = arith.constant 0 : index
    %11 = vector.load %arg4[%c0_5, %c0_6] : memref<128x128xbf16, #tpu.memory_space<vmem>>, vector<128x128xbf16>
    tpu.vector_store %arg4[%c0_5, %c0_6], %10 {strides = array<i32>} : memref<128x128xbf16, #tpu.memory_space<vmem>>, vector<128x128xbf16>,
    return
  }
  func.func @transform_0(%arg0: i32) -> (i32, i32) {
    %c0_i32 = arith.constant 0 : i32
    %c0_i32_0 = arith.constant 0 : i32
    return %arg0, %c0_i32 : i32, i32
  }
  func.func @transform_1(%arg0: i32) -> (i32, i32) {
    %c0_i32 = arith.constant 0 : i32
    %c0_i32_0 = arith.constant 0 : i32
    %c0_i32_1 = arith.constant 0 : i32
    return %c0_i32, %c0_i32_0 : i32, i32
  }
  func.func @transform_2(%arg0: i32) -> (i32, i32) {
    %c0_i32 = arith.constant 0 : i32
    %c0_i32_0 = arith.constant 0 : i32
    %c0_i32_1 = arith.constant 0 : i32
    return %c0_i32, %c0_i32_0 : i32, i32
  }
  func.func @transform_3(%arg0: i32) -> (i32, i32) {
    %c0_i32 = arith.constant 0 : i32
    %c0_i32_0 = arith.constant 0 : i32
    return %arg0, %c0_i32 : i32, i32
  }
}

module attributes {stable_mosaic.version = 11 : i64} {
  func.func @kernel(%arg0: i32, %arg1: i32, %arg2: memref<1x10x10x128xbf16, #tpu.memory_space<vmem>>, %arg3: memref<3x3x128x128xbf16, #tpu.memory_space<vmem>>, %arg4: memref<1x8x8x128xbf16, #tpu.memory_space<vmem>>, %arg5: memref<1x8x8x128xf32, #tpu.memory_space<vmem>>) attributes {dimension_semantics = [#tpu.dimension_semantics<parallel>, #tpu.dimension_semantics<parallel>], iteration_bounds = array<i64: 2, 1>, scalar_prefetch = 0 : i64, scratch_operands = 0 : i64, tpu.core_type = #tpu.core_type<tc>, window_params = [{transform_indices = @transform_0, window_bounds = array<i64: 1, 10, 10, 128>}, {pipeline_mode = #tpu.pipeline_mode<synchronous>, transform_indices = @transform_1, window_bounds = array<i64: 3, 3, 128, 128>}, {transform_indices = @transform_2, window_bounds = array<i64: 1, 8, 8, 128>}, {transform_indices = @transform_3, window_bounds = array<i64: 1, 8, 8, 128>}]} {
    %cst = arith.constant 0.000000e+00 : f32
    %0 = vector.broadcast %cst : f32 to vector<64x128xf32>
    %c0 = arith.constant 0 : index
    %c0_0 = arith.constant 0 : index
    %c0_1 = arith.constant 0 : index
    %c0_2 = arith.constant 0 : index
    %1 = vector.load %arg2[%c0, %c0_0, %c0_1, %c0_2] : memref<1x10x10x128xbf16, #tpu.memory_space<vmem>>, vector<1x8x8x128xbf16>
    %2 = vector.shape_cast %1 : vector<1x8x8x128xbf16> to vector<8x8x128xbf16>
    %3 = vector.shape_cast %2 : vector<8x8x128xbf16> to vector<64x128xbf16>
    %c0_3 = arith.constant 0 : index
    %c0_4 = arith.constant 0 : index
    %c0_5 = arith.constant 0 : index
    %c0_6 = arith.constant 0 : index
    %4 = vector.load %arg3[%c0_3, %c0_4, %c0_5, %c0_6] : memref<3x3x128x128xbf16, #tpu.memory_space<vmem>>, vector<1x1x128x128xbf16>
    %5 = vector.shape_cast %4 : vector<1x1x128x128xbf16> to vector<128x128xbf16>
    %cst_7 = arith.constant dense<0.000000e+00> : vector<64x128xf32>
    %6 = tpu.matmul %3, %5, %cst_7 {dimension_numbers = #tpu.dot_dimension_numbers<[1], [0], [0], [1], [0, 0, 1, 1], [], []>} : vector<64x128xbf16>, vector<128x128xbf16>, vector<64x128xf32> -> vector<64x128xf32>
    %7 = arith.addf %0, %6 : vector<64x128xf32>
    %c0_8 = arith.constant 0 : index
    %c0_9 = arith.constant 0 : index
    %c1 = arith.constant 1 : index
    %c0_10 = arith.constant 0 : index
    %8 = vector.load %arg2[%c0_8, %c0_9, %c1, %c0_10] : memref<1x10x10x128xbf16, #tpu.memory_space<vmem>>, vector<1x8x8x128xbf16>
    %9 = vector.shape_cast %8 : vector<1x8x8x128xbf16> to vector<8x8x128xbf16>
    %10 = vector.shape_cast %9 : vector<8x8x128xbf16> to vector<64x128xbf16>
    %c0_11 = arith.constant 0 : index
    %c1_12 = arith.constant 1 : index
    %c0_13 = arith.constant 0 : index
    %c0_14 = arith.constant 0 : index
    %11 = vector.load %arg3[%c0_11, %c1_12, %c0_13, %c0_14] : memref<3x3x128x128xbf16, #tpu.memory_space<vmem>>, vector<1x1x128x128xbf16>
    %12 = vector.shape_cast %11 : vector<1x1x128x128xbf16> to vector<128x128xbf16>
    %cst_15 = arith.constant dense<0.000000e+00> : vector<64x128xf32>
    %13 = tpu.matmul %10, %12, %cst_15 {dimension_numbers = #tpu.dot_dimension_numbers<[1], [0], [0], [1], [0, 0, 1, 1], [], []>} : vector<64x128xbf16>, vector<128x128xbf16>, vector<64x128xf32> -> vector<64x128xf32>
    %14 = arith.addf %7, %13 : vector<64x128xf32>
    %c0_16 = arith.constant 0 : index
    %c0_17 = arith.constant 0 : index
    %c2 = arith.constant 2 : index
    %c0_18 = arith.constant 0 : index
    %15 = vector.load %arg2[%c0_16, %c0_17, %c2, %c0_18] : memref<1x10x10x128xbf16, #tpu.memory_space<vmem>>, vector<1x8x8x128xbf16>
    %16 = vector.shape_cast %15 : vector<1x8x8x128xbf16> to vector<8x8x128xbf16>
    %17 = vector.shape_cast %16 : vector<8x8x128xbf16> to vector<64x128xbf16>
    %c0_19 = arith.constant 0 : index
    %c2_20 = arith.constant 2 : index
    %c0_21 = arith.constant 0 : index
    %c0_22 = arith.constant 0 : index
    %18 = vector.load %arg3[%c0_19, %c2_20, %c0_21, %c0_22] : memref<3x3x128x128xbf16, #tpu.memory_space<vmem>>, vector<1x1x128x128xbf16>
    %19 = vector.shape_cast %18 : vector<1x1x128x128xbf16> to vector<128x128xbf16>
    %cst_23 = arith.constant dense<0.000000e+00> : vector<64x128xf32>
    %20 = tpu.matmul %17, %19, %cst_23 {dimension_numbers = #tpu.dot_dimension_numbers<[1], [0], [0], [1], [0, 0, 1, 1], [], []>} : vector<64x128xbf16>, vector<128x128xbf16>, vector<64x128xf32> -> vector<64x128xf32>
    %21 = arith.addf %14, %20 : vector<64x128xf32>
    %c0_24 = arith.constant 0 : index
    %c1_25 = arith.constant 1 : index
    %c0_26 = arith.constant 0 : index
    %c0_27 = arith.constant 0 : index
    %22 = vector.load %arg2[%c0_24, %c1_25, %c0_26, %c0_27] : memref<1x10x10x128xbf16, #tpu.memory_space<vmem>>, vector<1x8x8x128xbf16>
    %23 = vector.shape_cast %22 : vector<1x8x8x128xbf16> to vector<8x8x128xbf16>
    %24 = vector.shape_cast %23 : vector<8x8x128xbf16> to vector<64x128xbf16>
    %c1_28 = arith.constant 1 : index
    %c0_29 = arith.constant 0 : index
    %c0_30 = arith.constant 0 : index
    %c0_31 = arith.constant 0 : index
    %25 = vector.load %arg3[%c1_28, %c0_29, %c0_30, %c0_31] : memref<3x3x128x128xbf16, #tpu.memory_space<vmem>>, vector<1x1x128x128xbf16>
    %26 = vector.shape_cast %25 : vector<1x1x128x128xbf16> to vector<128x128xbf16>
    %cst_32 = arith.constant dense<0.000000e+00> : vector<64x128xf32>
    %27 = tpu.matmul %24, %26, %cst_32 {dimension_numbers = #tpu.dot_dimension_numbers<[1], [0], [0], [1], [0, 0, 1, 1], [], []>} : vector<64x128xbf16>, vector<128x128xbf16>, vector<64x128xf32> -> vector<64x128xf32>
    %28 = arith.addf %21, %27 : vector<64x128xf32>
    %c0_33 = arith.constant 0 : index
    %c1_34 = arith.constant 1 : index
    %c1_35 = arith.constant 1 : index
    %c0_36 = arith.constant 0 : index
    %29 = vector.load %arg2[%c0_33, %c1_34, %c1_35, %c0_36] : memref<1x10x10x128xbf16, #tpu.memory_space<vmem>>, vector<1x8x8x128xbf16>
    %30 = vector.shape_cast %29 : vector<1x8x8x128xbf16> to vector<8x8x128xbf16>
    %31 = vector.shape_cast %30 : vector<8x8x128xbf16> to vector<64x128xbf16>
    %c1_37 = arith.constant 1 : index
    %c1_38 = arith.constant 1 : index
    %c0_39 = arith.constant 0 : index
    %c0_40 = arith.constant 0 : index
    %32 = vector.load %arg3[%c1_37, %c1_38, %c0_39, %c0_40] : memref<3x3x128x128xbf16, #tpu.memory_space<vmem>>, vector<1x1x128x128xbf16>
    %33 = vector.shape_cast %32 : vector<1x1x128x128xbf16> to vector<128x128xbf16>
    %cst_41 = arith.constant dense<0.000000e+00> : vector<64x128xf32>
    %34 = tpu.matmul %31, %33, %cst_41 {dimension_numbers = #tpu.dot_dimension_numbers<[1], [0], [0], [1], [0, 0, 1, 1], [], []>} : vector<64x128xbf16>, vector<128x128xbf16>, vector<64x128xf32> -> vector<64x128xf32>
    %35 = arith.addf %28, %34 : vector<64x128xf32>
    %c0_42 = arith.constant 0 : index
    %c1_43 = arith.constant 1 : index
    %c2_44 = arith.constant 2 : index
    %c0_45 = arith.constant 0 : index
    %36 = vector.load %arg2[%c0_42, %c1_43, %c2_44, %c0_45] : memref<1x10x10x128xbf16, #tpu.memory_space<vmem>>, vector<1x8x8x128xbf16>
    %37 = vector.shape_cast %36 : vector<1x8x8x128xbf16> to vector<8x8x128xbf16>
    %38 = vector.shape_cast %37 : vector<8x8x128xbf16> to vector<64x128xbf16>
    %c1_46 = arith.constant 1 : index
    %c2_47 = arith.constant 2 : index
    %c0_48 = arith.constant 0 : index
    %c0_49 = arith.constant 0 : index
    %39 = vector.load %arg3[%c1_46, %c2_47, %c0_48, %c0_49] : memref<3x3x128x128xbf16, #tpu.memory_space<vmem>>, vector<1x1x128x128xbf16>
    %40 = vector.shape_cast %39 : vector<1x1x128x128xbf16> to vector<128x128xbf16>
    %cst_50 = arith.constant dense<0.000000e+00> : vector<64x128xf32>
    %41 = tpu.matmul %38, %40, %cst_50 {dimension_numbers = #tpu.dot_dimension_numbers<[1], [0], [0], [1], [0, 0, 1, 1], [], []>} : vector<64x128xbf16>, vector<128x128xbf16>, vector<64x128xf32> -> vector<64x128xf32>
    %42 = arith.addf %35, %41 : vector<64x128xf32>
    %c0_51 = arith.constant 0 : index
    %c2_52 = arith.constant 2 : index
    %c0_53 = arith.constant 0 : index
    %c0_54 = arith.constant 0 : index
    %43 = vector.load %arg2[%c0_51, %c2_52, %c0_53, %c0_54] : memref<1x10x10x128xbf16, #tpu.memory_space<vmem>>, vector<1x8x8x128xbf16>
    %44 = vector.shape_cast %43 : vector<1x8x8x128xbf16> to vector<8x8x128xbf16>
    %45 = vector.shape_cast %44 : vector<8x8x128xbf16> to vector<64x128xbf16>
    %c2_55 = arith.constant 2 : index
    %c0_56 = arith.constant 0 : index
    %c0_57 = arith.constant 0 : index
    %c0_58 = arith.constant 0 : index
    %46 = vector.load %arg3[%c2_55, %c0_56, %c0_57, %c0_58] : memref<3x3x128x128xbf16, #tpu.memory_space<vmem>>, vector<1x1x128x128xbf16>
    %47 = vector.shape_cast %46 : vector<1x1x128x128xbf16> to vector<128x128xbf16>
    %cst_59 = arith.constant dense<0.000000e+00> : vector<64x128xf32>
    %48 = tpu.matmul %45, %47, %cst_59 {dimension_numbers = #tpu.dot_dimension_numbers<[1], [0], [0], [1], [0, 0, 1, 1], [], []>} : vector<64x128xbf16>, vector<128x128xbf16>, vector<64x128xf32> -> vector<64x128xf32>
    %49 = arith.addf %42, %48 : vector<64x128xf32>
    %c0_60 = arith.constant 0 : index
    %c2_61 = arith.constant 2 : index
    %c1_62 = arith.constant 1 : index
    %c0_63 = arith.constant 0 : index
    %50 = vector.load %arg2[%c0_60, %c2_61, %c1_62, %c0_63] : memref<1x10x10x128xbf16, #tpu.memory_space<vmem>>, vector<1x8x8x128xbf16>
    %51 = vector.shape_cast %50 : vector<1x8x8x128xbf16> to vector<8x8x128xbf16>
    %52 = vector.shape_cast %51 : vector<8x8x128xbf16> to vector<64x128xbf16>
    %c2_64 = arith.constant 2 : index
    %c1_65 = arith.constant 1 : index
    %c0_66 = arith.constant 0 : index
    %c0_67 = arith.constant 0 : index
    %53 = vector.load %arg3[%c2_64, %c1_65, %c0_66, %c0_67] : memref<3x3x128x128xbf16, #tpu.memory_space<vmem>>, vector<1x1x128x128xbf16>
    %54 = vector.shape_cast %53 : vector<1x1x128x128xbf16> to vector<128x128xbf16>
    %cst_68 = arith.constant dense<0.000000e+00> : vector<64x128xf32>
    %55 = tpu.matmul %52, %54, %cst_68 {dimension_numbers = #tpu.dot_dimension_numbers<[1], [0], [0], [1], [0, 0, 1, 1], [], []>} : vector<64x128xbf16>, vector<128x128xbf16>, vector<64x128xf32> -> vector<64x128xf32>
    %56 = arith.addf %49, %55 : vector<64x128xf32>
    %c0_69 = arith.constant 0 : index
    %c2_70 = arith.constant 2 : index
    %c2_71 = arith.constant 2 : index
    %c0_72 = arith.constant 0 : index
    %57 = vector.load %arg2[%c0_69, %c2_70, %c2_71, %c0_72] : memref<1x10x10x128xbf16, #tpu.memory_space<vmem>>, vector<1x8x8x128xbf16>
    %58 = vector.shape_cast %57 : vector<1x8x8x128xbf16> to vector<8x8x128xbf16>
    %59 = vector.shape_cast %58 : vector<8x8x128xbf16> to vector<64x128xbf16>
    %c2_73 = arith.constant 2 : index
    %c2_74 = arith.constant 2 : index
    %c0_75 = arith.constant 0 : index
    %c0_76 = arith.constant 0 : index
    %60 = vector.load %arg3[%c2_73, %c2_74, %c0_75, %c0_76] : memref<3x3x128x128xbf16, #tpu.memory_space<vmem>>, vector<1x1x128x128xbf16>
    %61 = vector.shape_cast %60 : vector<1x1x128x128xbf16> to vector<128x128xbf16>
    %cst_77 = arith.constant dense<0.000000e+00> : vector<64x128xf32>
    %62 = tpu.matmul %59, %61, %cst_77 {dimension_numbers = #tpu.dot_dimension_numbers<[1], [0], [0], [1], [0, 0, 1, 1], [], []>} : vector<64x128xbf16>, vector<128x128xbf16>, vector<64x128xf32> -> vector<64x128xf32>
    %63 = arith.addf %56, %62 : vector<64x128xf32>
    %c0_78 = arith.constant 0 : index
    %c0_79 = arith.constant 0 : index
    %c0_80 = arith.constant 0 : index
    %c0_81 = arith.constant 0 : index
    %64 = vector.load %arg4[%c0_78, %c0_79, %c0_80, %c0_81] : memref<1x8x8x128xbf16, #tpu.memory_space<vmem>>, vector<1x8x8x128xbf16>
    %65 = vector.shape_cast %64 : vector<1x8x8x128xbf16> to vector<8x8x128xbf16>
    %66 = arith.extf %65 : vector<8x8x128xbf16> to vector<8x8x128xf32>
    %67 = vector.shape_cast %66 : vector<8x8x128xf32> to vector<64x128xf32>
    %68 = arith.addf %63, %67 : vector<64x128xf32>
    %69 = vector.shape_cast %68 : vector<64x128xf32> to vector<8x8x128xf32>
    %c0_82 = arith.constant 0 : index
    %c0_83 = arith.constant 0 : index
    %c0_84 = arith.constant 0 : index
    %c0_85 = arith.constant 0 : index
    %70 = vector.load %arg5[%c0_82, %c0_83, %c0_84, %c0_85] : memref<1x8x8x128xf32, #tpu.memory_space<vmem>>, vector<1x8x8x128xf32>
    %71 = vector.shape_cast %70 : vector<1x8x8x128xf32> to vector<8x8x128xf32>
    %72 = vector.shape_cast %69 : vector<8x8x128xf32> to vector<1x8x8x128xf32>
    tpu.vector_store %arg5[%c0_82, %c0_83, %c0_84, %c0_85], %72 {strides = array<i32>} : memref<1x8x8x128xf32, #tpu.memory_space<vmem>>, vector<1x8x8x128xf32>,
    return
  }
  func.func @transform_0(%arg0: i32, %arg1: i32) -> (i32, i32, i32, i32) {
    %c0_i32 = arith.constant 0 : i32
    %c0_i32_0 = arith.constant 0 : i32
    %c0_i32_1 = arith.constant 0 : i32
    %c0_i32_2 = arith.constant 0 : i32
    return %arg0, %c0_i32, %c0_i32_0, %c0_i32_1 : i32, i32, i32, i32
  }
  func.func @transform_1(%arg0: i32, %arg1: i32) -> (i32, i32, i32, i32) {
    %c0_i32 = arith.constant 0 : i32
    %c0_i32_0 = arith.constant 0 : i32
    %c0_i32_1 = arith.constant 0 : i32
    %c0_i32_2 = arith.constant 0 : i32
    %c0_i32_3 = arith.constant 0 : i32
    return %c0_i32, %c0_i32_0, %c0_i32_1, %c0_i32_2 : i32, i32, i32, i32
  }
  func.func @transform_2(%arg0: i32, %arg1: i32) -> (i32, i32, i32, i32) {
    %c0_i32 = arith.constant 0 : i32
    %c0_i32_0 = arith.constant 0 : i32
    %c0_i32_1 = arith.constant 0 : i32
    return %arg0, %arg1, %c0_i32, %c0_i32_0 : i32, i32, i32, i32
  }
  func.func @transform_3(%arg0: i32, %arg1: i32) -> (i32, i32, i32, i32) {
    %c0_i32 = arith.constant 0 : i32
    %c0_i32_0 = arith.constant 0 : i32
    %c0_i32_1 = arith.constant 0 : i32
    return %arg0, %arg1, %c0_i32, %c0_i32_0 : i32, i32, i32, i32
  }
}

</mosaic_0001>

<bundles_post_ra>
// kernel: tile.20
= control target key start
LH: loop header
LB: loop body
LE: loop exit
PB: predicated region body
PF: predicated region fallthrough
CT: control target
= control target key end

     0   :  { %s40_s0 = inlined_call_operand.vmem [shape: f32[4], index: 0, kind: input, shape index: {}]   ;;  %s41_s1 = inlined_call_operand.vmem [shape: f32[32,4], index: 1, kind: output, shape index: {}]  }
   0x1   :  { %v4_v0 = vld [vmem:[%s40_s0] ss:$0 sm:$0xff] }
   0x2   :  { %5 = vst [vmem:[%s41_s1] sm:$0xff] %v4_v0  ;;  %12 = vst [vmem:[%s41_s1 + $0x8] sm:$0xff] %v4_v0 }
   0x3   :  { %13 = vst [vmem:[%s41_s1 + $0x10] sm:$0xff] %v4_v0  ;;  %14 = vst [vmem:[%s41_s1 + $0x18] sm:$0xff] %v4_v0 }

// kernel: tile.21
= control target key start
LH: loop header
LB: loop body
LE: loop exit
PB: predicated region body
PF: predicated region fallthrough
CT: control target
= control target key end

     0   :  { %s261_s10 = smov 124   ;;  %s262_s11 = smov 116   ;;  %vm3_vm0 = vcmask 31744   ;;  %vm9_vm1 = vcmask 1048544   ;;  %vm15_vm2 = vcmask 1015744   ;;  %vm21_vm3 = vcmask 982944   ;;  %s401_s0 = inlined_call_operand.vmem [shape: f32[32,4], index: 0, kind: input, shape index: {}]   ;;  %s402_s1 = inlined_call_operand.vmem [shape: f32[1,128], index: 1, kind: output, shape index: {}]  }
   0x1   :  { %v199_v0 = vld [vmem:[%s401_s0 + $0x1f] sm:$0x1]   ;;  %v201_v1 = vld [vmem:[%s401_s0 + $0x1d] sm:$0x1]   ;;  %v200_v2 = vld [vmem:[%s401_s0 + $0x1e] sm:$0x1]  }
   0x2   :  { %7 = vrot.lane.b32.xlu0 %v199_v0, %s261_s10  ;;  %19 = vrot.lane.b32.xlu1 %v201_v1, %s262_s11  ;;  %v202_v3 = vld [vmem:[%s401_s0 + $0x1c] sm:$0x1]   ;;  %s263_s16 = smov 120   ;;  %s264_s17 = smov 112   ;;  %v203_v4 = vld [vmem:[%s401_s0 + $0x1b] sm:$0x1]  }
   0x3   :  { %v204_v5 = vld [vmem:[%s401_s0 + $0x1a] sm:$0x1]   ;;  %s265_s22 = smov 108   ;;  %s266_s23 = smov 104   ;;  %v205_v6 = vld [vmem:[%s401_s0 + $0x19] sm:$0x1]  }
   0x4   :  { %v206_v7 = vld [vmem:[%s401_s0 + $0x18] sm:$0x1]   ;;  %s267_s28 = smov 100   ;;  %s268_s29 = smov 96   ;;  %v207_v8 = vld [vmem:[%s401_s0 + $0x17] sm:$0x1]  }
   0x5   :  { %v208_v9 = vld [vmem:[%s401_s0 + $0x16] sm:$0x1]   ;;  %v2_v10 = vld [vmem:[%s401_s0] sm:$0x1]   ;;  %s269_s7 = smov 92   ;;  %s270_s8 = smov 88  }
   0x6   :  { %13 = vrot.lane.b32.xlu0 %v200_v2, %s263_s16  ;;  %25 = vrot.lane.b32.xlu1 %v202_v3, %s264_s17  ;;  %4 = vst.msk [vmem:[#allocation0] sm:$0x1] %vm3_vm0, %v2_v10   ;;  %v209_v11 = vld [vmem:[%s401_s0 + $0x15] sm:$0x1]   ;;  %v210_v12 = vld [vmem:[%s401_s0 + $0x14] sm:$0x1]  }
   0x7   :  { %s271_s13 = smov 84   ;;  %s272_s14 = smov 80   ;;  %v211_v13 = vld [vmem:[%s401_s0 + $0x13] sm:$0x1]   ;;  %v212_v14 = vld [vmem:[%s401_s0 + $0x12] sm:$0x1]  }
   0x8   :  { %s273_s19 = smov 76   ;;  %s274_s20 = smov 72   ;;  %v213_v15 = vld [vmem:[%s401_s0 + $0x11] sm:$0x1]   ;;  %v214_v16 = vld [vmem:[%s401_s0 + $0x10] sm:$0x1]  }
   0x9   :  { %s275_s25 = smov 68   ;;  %s276_s26 = smov 64   ;;  %v215_v17 = vld [vmem:[%s401_s0 + $0xf] sm:$0x1]   ;;  %v216_v18 = vld [vmem:[%s401_s0 + $0xe] sm:$0x1]  }
   0xa   :  { %31 = vrot.lane.b32.xlu0 %v203_v4, %s265_s22  ;;  %37 = vrot.lane.b32.xlu1 %v204_v5, %s266_s23  ;;  %s277_s2 = smov 60   ;;  %s278_s3 = smov 56   ;;  %v217_v19 = vld [vmem:[%s401_s0 + $0xd] sm:$0x1]   ;;  %v218_v20 = vld [vmem:[%s401_s0 + $0xc] sm:$0x1]  }
   0xb   :  { %s280_s9 = smov 48   ;;  %v219_v21 = vld [vmem:[%s401_s0 + $0xb] sm:$0x1]   ;;  %v220_v22 = vld [vmem:[%s401_s0 + $0xa] sm:$0x1]   ;;  %s282_s15 = smov 40  }
   0xc   :  { %v221_v23 = vld [vmem:[%s401_s0 + $0x9] sm:$0x1]   ;;  %v222_v24 = vld [vmem:[%s401_s0 + $0x8] sm:$0x1]   ;;  %s284_s21 = smov 32   ;;  %s286_s27 = smov 24  }
   0xd   :  { %v223_v25 = vld [vmem:[%s401_s0 + $0x7] sm:$0x1]   ;;  %v224_v26 = vld [vmem:[%s401_s0 + $0x6] sm:$0x1]   ;;  %v225_v27 = vld [vmem:[%s401_s0 + $0x5] sm:$0x1]  }
   0xe   :  { %43 = vrot.lane.b32.xlu0 %v205_v6, %s267_s28  ;;  %49 = vrot.lane.b32.xlu1 %v206_v7, %s268_s29  ;;  %v226_v28 = vld [vmem:[%s401_s0 + $0x4] sm:$0x1]   ;;  %s288_s4 = smov 16   ;;  %v227_v29 = vld [vmem:[%s401_s0 + $0x3] sm:$0x1]   ;;  %s290_s10 = smov 8  }
   0xf   :  { %v228_v30 = vld [vmem:[%s401_s0 + $0x2] sm:$0x1]   ;;  %v229_v31 = vld [vmem:[%s401_s0 + $0x1] sm:$0x1]   ;;  %s291_s0 = smov 4   ;;  %vm27_vm4 = vcmask 950144  }
  0x10   :  { %vm33_vm5 = vcmask 917344   ;;  %vm39_vm6 = vcmask 884544   ;;  %vm45_vm7 = vcmask 851744   ;;  %vm51_vm8 = vcmask 818944  }
  0x11   :  { %vm57_vm9 = vcmask 786144   ;;  %vm63_vm10 = vcmask 753344   ;;  %vm69_vm11 = vcmask 720544   ;;  %vm75_vm12 = vcmask 687744  }
  0x12   :  { %55 = vrot.lane.b32.xlu0 %v207_v8, %s269_s7  ;;  %61 = vrot.lane.b32.xlu1 %v208_v9, %s270_s8  ;;  %s279_s8 = smov 52   ;;  %vm81_vm13 = vcmask 654944   ;;  %vm87_vm14 = vcmask 622144   ;;  %vm93_vm15 = vcmask 589344   ;;  %vm99_vm0 = vcmask 556544  }
  0x16   :  { %67 = vrot.lane.b32.xlu0 %v209_v11, %s271_s13  ;;  %73 = vrot.lane.b32.xlu1 %v210_v12, %s272_s14  ;;  %s281_s14 = smov 44  }
  0x1a   :  { %79 = vrot.lane.b32.xlu0 %v211_v13, %s273_s19  ;;  %85 = vrot.lane.b32.xlu1 %v212_v14, %s274_s20  ;;  %s283_s20 = smov 36  }
  0x1e   :  { %91 = vrot.lane.b32.xlu0 %v213_v15, %s275_s25  ;;  %97 = vrot.lane.b32.xlu1 %v214_v16, %s276_s26  ;;  %s285_s26 = smov 28  }
  0x22   :  { %103 = vrot.lane.b32.xlu0 %v215_v17, %s277_s2  ;;  %109 = vrot.lane.b32.xlu1 %v216_v18, %s278_s3  ;;  %s287_s3 = smov 20  }
  0x26   :  { %115 = vrot.lane.b32.xlu0 %v217_v19, %s279_s8  ;;  %121 = vrot.lane.b32.xlu1 %v218_v20, %s280_s9  ;;  %s289_s9 = smov 12  }
  0x2a   :  { %127 = vrot.lane.b32.xlu0 %v219_v21, %s281_s14  ;;  %133 = vrot.lane.b32.xlu1 %v220_v22, %s282_s15 }
  0x2e   :  { %139 = vrot.lane.b32.xlu0 %v221_v23, %s283_s20  ;;  %145 = vrot.lane.b32.xlu1 %v222_v24, %s284_s21 }
  0x32   :  { %151 = vrot.lane.b32.xlu0 %v223_v25, %s285_s26  ;;  %157 = vrot.lane.b32.xlu1 %v224_v26, %s286_s27 }
  0x36   :  { %163 = vrot.lane.b32.xlu0 %v225_v27, %s287_s3  ;;  %169 = vrot.lane.b32.xlu1 %v226_v28, %s288_s4 }
  0x3a   :  { %175 = vrot.lane.b32.xlu0 %v227_v29, %s289_s9  ;;  %181 = vrot.lane.b32.xlu1 %v228_v30, %s290_s10 }
  0x3e   :  { %187 = vrot.lane.b32.xlu0 %v229_v31, %s291_s0 }
  0x74   :  { %v8_v32 = vpop.permute.xlu0 %7   ;;  %v20_v33 = vpop.permute.xlu1 %19  }
  0x75   :  { %10 = vst.msk [vmem:[#allocation0] sm:$0x1] %vm9_vm1, %v8_v32   ;;  %vm105_vm1 = vcmask 523744  }
  0x78   :  { %v14_v34 = vpop.permute.xlu0 %13   ;;  %v26_v35 = vpop.permute.xlu1 %25  }
  0x79   :  { %16 = vst.msk [vmem:[#allocation0] sm:$0x1] %vm15_vm2, %v14_v34   ;;  %vm111_vm2 = vcmask 490944  }
  0x7a   :  { %22 = vst.msk [vmem:[#allocation0] sm:$0x1] %vm21_vm3, %v20_v33   ;;  %vm117_vm3 = vcmask 458144  }
  0x7b   :  { %28 = vst.msk [vmem:[#allocation0] sm:$0x1] %vm27_vm4, %v26_v35   ;;  %vm123_vm4 = vcmask 425344  }
  0x7c   :  { %v32_v36 = vpop.permute.xlu0 %31   ;;  %v38_v37 = vpop.permute.xlu1 %37  }
  0x7d   :  { %34 = vst.msk [vmem:[#allocation0] sm:$0x1] %vm33_vm5, %v32_v36   ;;  %vm129_vm5 = vcmask 392544  }
  0x7e   :  { %40 = vst.msk [vmem:[#allocation0] sm:$0x1] %vm39_vm6, %v38_v37   ;;  %vm135_vm6 = vcmask 359744  }
  0x80   :  { %v44_v38 = vpop.permute.xlu0 %43   ;;  %v50_v39 = vpop.permute.xlu1 %49  }
  0x81   :  { %46 = vst.msk [vmem:[#allocation0] sm:$0x1] %vm45_vm7, %v44_v38   ;;  %vm141_vm7 = vcmask 326944  }
  0x82   :  { %52 = vst.msk [vmem:[#allocation0] sm:$0x1] %vm51_vm8, %v50_v39   ;;  %vm147_vm8 = vcmask 294144  }
  0x84   :  { %v56_v40 = vpop.permute.xlu0 %55   ;;  %v62_v41 = vpop.permute.xlu1 %61  }
  0x85   :  { %58 = vst.msk [vmem:[#allocation0] sm:$0x1] %vm57_vm9, %v56_v40   ;;  %vm153_vm9 = vcmask 261344  }
  0x86   :  { %64 = vst.msk [vmem:[#allocation0] sm:$0x1] %vm63_vm10, %v62_v41   ;;  %vm159_vm10 = vcmask 228544  }
  0x88   :  { %v68_v42 = vpop.permute.xlu0 %67   ;;  %v74_v43 = vpop.permute.xlu1 %73  }
  0x89   :  { %70 = vst.msk [vmem:[#allocation0] sm:$0x1] %vm69_vm11, %v68_v42   ;;  %vm165_vm11 = vcmask 195744  }
  0x8a   :  { %76 = vst.msk [vmem:[#allocation0] sm:$0x1] %vm75_vm12, %v74_v43   ;;  %vm171_vm12 = vcmask 162944  }
  0x8c   :  { %v80_v44 = vpop.permute.xlu0 %79   ;;  %v86_v45 = vpop.permute.xlu1 %85  }
  0x8d   :  { %82 = vst.msk [vmem:[#allocation0] sm:$0x1] %vm81_vm13, %v80_v44   ;;  %vm177_vm13 = vcmask 130144  }
  0x8e   :  { %88 = vst.msk [vmem:[#allocation0] sm:$0x1] %vm87_vm14, %v86_v45   ;;  %vm183_vm14 = vcmask 97344  }
  0x90   :  { %v92_v46 = vpop.permute.xlu0 %91   ;;  %v98_v47 = vpop.permute.xlu1 %97  }
  0x91   :  { %94 = vst.msk [vmem:[#allocation0] sm:$0x1] %vm93_vm15, %v92_v46   ;;  %vm189_vm15 = vcmask 64544  }
  0x92   :  { %100 = vst.msk [vmem:[#allocation0] sm:$0x1] %vm99_vm0, %v98_v47  }
  0x94   :  { %v104_v48 = vpop.permute.xlu0 %103   ;;  %v110_v49 = vpop.permute.xlu1 %109  }
  0x95   :  { %106 = vst.msk [vmem:[#allocation0] sm:$0x1] %vm105_vm1, %v104_v48  }
  0x96   :  { %112 = vst.msk [vmem:[#allocation0] sm:$0x1] %vm111_vm2, %v110_v49  }
  0x98   :  { %v116_v50 = vpop.permute.xlu0 %115   ;;  %v122_v51 = vpop.permute.xlu1 %121  }
  0x99   :  { %118 = vst.msk [vmem:[#allocation0] sm:$0x1] %vm117_vm3, %v116_v50  }
  0x9a   :  { %124 = vst.msk [vmem:[#allocation0] sm:$0x1] %vm123_vm4, %v122_v51  }
  0x9c   :  { %v128_v52 = vpop.permute.xlu0 %127   ;;  %v134_v53 = vpop.permute.xlu1 %133  }
  0x9d   :  { %130 = vst.msk [vmem:[#allocation0] sm:$0x1] %vm129_vm5, %v128_v52  }
  0x9e   :  { %136 = vst.msk [vmem:[#allocation0] sm:$0x1] %vm135_vm6, %v134_v53  }
  0xa0   :  { %v140_v54 = vpop.permute.xlu0 %139   ;;  %v146_v55 = vpop.permute.xlu1 %145  }
  0xa1   :  { %142 = vst.msk [vmem:[#allocation0] sm:$0x1] %vm141_vm7, %v140_v54  }
  0xa2   :  { %148 = vst.msk [vmem:[#allocation0] sm:$0x1] %vm147_vm8, %v146_v55  }
  0xa4   :  { %v152_v56 = vpop.permute.xlu0 %151   ;;  %v158_v57 = vpop.permute.xlu1 %157  }
  0xa5   :  { %154 = vst.msk [vmem:[#allocation0] sm:$0x1] %vm153_vm9, %v152_v56  }
  0xa6   :  { %160 = vst.msk [vmem:[#allocation0] sm:$0x1] %vm159_vm10, %v158_v57  }
  0xa8   :  { %v164_v58 = vpop.permute.xlu0 %163   ;;  %v170_v59 = vpop.permute.xlu1 %169  }
  0xa9   :  { %166 = vst.msk [vmem:[#allocation0] sm:$0x1] %vm165_vm11, %v164_v58  }
  0xaa   :  { %172 = vst.msk [vmem:[#allocation0] sm:$0x1] %vm171_vm12, %v170_v59  }
  0xac   :  { %v176_v60 = vpop.permute.xlu0 %175   ;;  %v182_v61 = vpop.permute.xlu1 %181  }
  0xad   :  { %178 = vst.msk [vmem:[#allocation0] sm:$0x1] %vm177_vm13, %v176_v60  }
  0xae   :  { %184 = vst.msk [vmem:[#allocation0] sm:$0x1] %vm183_vm14, %v182_v61  }
  0xb0   :  { %v188_v62 = vpop.permute.xlu0 %187  }
  0xb1   :  { %190 = vst.msk [vmem:[#allocation0] sm:$0x1] %vm189_vm15, %v188_v62  }
  0xb8   :  { %v195_v63 = vld [vmem:[#allocation0] sm:$0x1] }
  0xb9   :  { %198 = vst [vmem:[%s402_s1] sm:$0x1] %v195_v63 }

// kernel: preact_block.6
= control target key start
LH: loop header
LB: loop body
LE: loop exit
PB: predicated region body
PF: predicated region fallthrough
CT: control target
= control target key end

     0   :  { %s57_s0 = inlined_call_operand.vmem [shape: bf16[16,128], index: 0, kind: input, shape index: {}]   ;;  %s58_s1 = inlined_call_operand.vmem [shape: f32[1,2,128], index: 1, kind: output, shape index: {}]  }
   0x1   :  { %v35_v0 = vld [vmem:[%s57_s0] sm:$0xff]  }
   0x2   :  { %v36_v1 = vunpack.c.l.bf16 %v35_v0  ;;  %v37_v2 = vunpack.c.h.bf16 %v35_v0 }
   0x4   :  { %v12_v3 = vadd.f32 %v37_v2, %v36_v1  ;;  %v20_v4 = vmul.f32 %v36_v1, %v36_v1  ;;  %v21_v5 = vmul.f32 %v37_v2, %v37_v2 }
   0x6   :  { %v13_v6 = vrot.slane %v12_v3, 4  ;;  %v22_v7 = vadd.f32 %v21_v5, %v20_v4 }
   0x8   :  { %v14_v8 = vadd.f32 %v13_v6, %v12_v3  ;;  %v23_v9 = vrot.slane %v22_v7, 4 }
   0xa   :  { %v15_v10 = vrot.slane %v14_v8, 2  ;;  %v24_v11 = vadd.f32 %v23_v9, %v22_v7 }
   0xc   :  { %v16_v12 = vadd.f32 %v15_v10, %v14_v8  ;;  %v25_v13 = vrot.slane %v24_v11, 2 }
   0xe   :  { %v17_v14 = vrot.slane %v16_v12, 1  ;;  %v26_v15 = vadd.f32 %v25_v13, %v24_v11 }
  0x10   :  { %v18_v16 = vadd.f32 %v17_v14, %v16_v12  ;;  %v27_v17 = vrot.slane %v26_v15, 1 }
  0x12   :  { %19 = vst [vmem:[%s58_s1] sm:$0x1] %v18_v16  ;;  %v28_v18 = vadd.f32 %v27_v17, %v26_v15 }
  0x14   :  { %29 = vst [vmem:[%s58_s1 + $0x1] sm:$0x1] %v28_v18 }

// kernel: preact_block.7
= control target key start
LH: loop header
LB: loop body
LE: loop exit
PB: predicated region body
PF: predicated region fallthrough
CT: control target
= control target key end

     0   :  { %s99_s0 = inlined_call_operand.vmem [shape: bf16[16,128], index: 0, kind: input, shape index: {}]   ;;  %s100_s1 = inlined_call_operand.vmem [shape: f32[1,128], index: 1, kind: input, shape index: {}]   ;;  %s101_s2 = inlined_call_operand.vmem [shape: f32[1,128], index: 2, kind: input, shape index: {}]   ;;  %s102_s3 = inlined_call_operand.vmem [shape: bf16[16,128], index: 3, kind: output, shape index: {}]  }
   0x1   :  { %v59_v0 = vld [vmem:[%s99_s0] sm:$0xff]  }
   0x2   :  { %v52_v1 = vld [vmem:[%s100_s1] ss:$0 sm:$0xff]  ;;  %v60_v2 = vunpack.c.l.bf16 %v59_v0  ;;  %v61_v3 = vunpack.c.h.bf16 %v59_v0 }
   0x3   :  { %v53_v4 = vld [vmem:[%s101_s2] ss:$0 sm:$0xff] }
   0x4   :  { %v25_v5 = vmul.f32 %v60_v2, %v52_v1  ;;  %v26_v6 = vmul.f32 %v61_v3, %v52_v1 }
   0x6   :  { %v34_v7 = vadd.f32 %v53_v4, %v25_v5  ;;  %v35_v8 = vadd.f32 %v53_v4, %v26_v6 }
   0x8   :  { %v36_v9 = vmax.f32 %v34_v7, 0.0  ;;  %v37_v10 = vmax.f32 %v35_v8, 0.0 }
   0xa   :  { %v65_v11 = vpack.c.bf16 %v37_v10, %v36_v9 }
   0xc   :  { %66 = vst [vmem:[%s102_s3] sm:$0xff] %v65_v11  }

// kernel: preact_block.8
= control target key start
LH: loop header
LB: loop body
LE: loop exit
PB: predicated region body
PF: predicated region fallthrough
CT: control target
= control target key end

     0   :  { %s506_s9 = smov 0   ;;  %s508_s10 = smov 0   ;;  %s542_s0 = inlined_call_operand.vmem [shape: bf16[2,8,8,8], index: 0, kind: input, shape index: {}]   ;;  %s543_s1 = inlined_call_operand.vmem [shape: bf16[1,1,8,128], index: 1, kind: input, shape index: {}]   ;;  %s544_s2 = inlined_call_operand.vmem [shape: bf16[2,8,8,128], index: 2, kind: output, shape index: {}]  }
   0x1   :  { %s510_s11 = smov 0  }
   0x2 LB: > { %s24_s12 = sadd.s32 1, %s485_s10  ;;  %p380_p0 = scmp.ge.s32.totalorder %s489_s11, 1  ;;  %s489_s11 = sphi %s510_s11, %s12_s11   ;;  %s485_s10 = sphi %s508_s10, %s546_s10   ;;  %s481_s9 = sphi %s506_s9, %s545_s9  }
   0x3   : > { %p26_p1 = scmp.ge.s32.totalorder %s24_s12, 2  ;;  %p126_p2 = scmp.lt.s32.totalorder %s489_s11, 3 }
   0x5   : > { %s548_s12 = smov (%p26_p1, %s24_s12), 0  ;;  %p127_p3 = pnand %p380_p0, %p126_p2 }
   0x6   : > { %p152_p4 = scmp.lt.s32.totalorder (!%p127_p3), %s481_s9, 1 }
   0x7   : > { %130 = sbr.rel (%p127_p3) target bundleno = 219 (0xdb), region = 28 }
   0xc   : > { %v176_v0 = vld [vmem:[%s543_s1] sm:$0xf]  ;;  %vm210_vm0 = vcmask 1043456   ;;  %s550_s9 = smov (!%p152_p4, %s481_s9), 1  ;;  %vm197_vm1 = vcmask 64512  }
   0xd   : > { %437 = vmatprep.subr.msk.bf16.mxu0 %vm210_vm0, %v176_v0  ;;  %438 = vmatprep.subr.msk.bf16.mxu1 %vm210_vm0, %v176_v0  ;;  %v212_v1 = vsel %vm210_vm0, %v176_v0, 0  ;;  %s395_s15 = sshll.u32 %s550_s9, 5 }
   0xe   : > { %426 = vmatpush3.bf16.msra.mxu0 %v212_v1  ;;  %436 = vmatpush3.bf16.msra.mxu1 %v212_v1  ;;  %s156_s18 = scalar_lea.vmem %s542_s0, %s395_s15  ;;  %s165_s21 = scalar_lea.vmem %s544_s2, %s395_s15 }
   0xf   : > { %v463_v2 = vld [vmem:[%s156_s18] sm:$0xff]   ;;  %v464_v3 = vld [vmem:[%s156_s18 + $0x10] sm:$0xff]   ;;  %v465_v4 = vld [vmem:[%s156_s18 + $0x8] sm:$0xff]  }
  0x10   : > { %427 = vmatprep.mubr.msk.bf16.mxu0 %vm197_vm1, %v463_v2  ;;  %431 = vmatprep.mubr.msk.bf16.mxu1 %vm197_vm1, %v464_v3  ;;  %v466_v5 = vld [vmem:[%s156_s18 + $0x18] sm:$0xff]  }
  0x11   : > { %428 = vmatmul.mubr.msk.bf16.vlgmr.msra.gmra.mxu0 %vm197_vm1, %v465_v4  ;;  %432 = vmatmul.mubr.msk.bf16.vlgmr.msra.gmra.mxu1 %vm197_vm1, %v466_v5 }
  0xd1   : > { %v429_v6 = vpop.f32.mrf.mxu0  ;;  %v433_v7 = vpop.f32.mrf.mxu1 }
  0xd3   : > { %v248_v8 = vpop.f32.mrf.mxu0  ;;  %v264_v9 = vpop.f32.mrf.mxu1 }
  0xd5   : > { %v430_v10 = vpop.f32.mrf.mxu0  ;;  %v434_v12 = vpop.f32.mrf.mxu1 }
  0xd6   : > { %v405_v11 = vpack.c.bf16 %v430_v10, %v429_v6  ;;  %v415_v13 = vpack.c.bf16 %v434_v12, %v433_v7 }
  0xd7   : > { %v251_v14 = vpop.f32.mrf.mxu0  ;;  %v267_v16 = vpop.f32.mrf.mxu1 }
  0xd8   : > { %417 = vst [vmem:[%s165_s21 + $0x8] sm:$0xff] %v405_v11   ;;  %v400_v15 = vpack.c.bf16 %v251_v14, %v248_v8  ;;  %419 = vst [vmem:[%s165_s21 + $0x18] sm:$0xff] %v415_v13   ;;  %v410_v17 = vpack.c.bf16 %v267_v16, %v264_v9 }
  0xda   : > { %401 = vst [vmem:[%s165_s21] sm:$0xff] %v400_v15   ;;  %418 = vst [vmem:[%s165_s21 + $0x10] sm:$0xff] %v410_v17  }
  0xdb PF: > { %s12_s11 = sadd.s32 1, %s489_s11   ;;  %s545_s9 = smov %s485_s10 }
  0xdc   : > { %p9_p5 = scmp.ge.s32.totalorder %s12_s11, 4   ;;  %s546_s10 = smov %s548_s12 }
  0xde   :  { %11 = sbr.rel (!%p9_p5) target bundleno = 2 (0x2), region = 58 }

// kernel: preact_block.10
= control target key start
LH: loop header
LB: loop body
LE: loop exit
PB: predicated region body
PF: predicated region fallthrough
CT: control target
= control target key end

     0   :  { %s422_s0 = inlined_call_operand.vmem [shape: bf16[128,128], index: 0, kind: input, shape index: {}]   ;;  %s423_s1 = inlined_call_operand.vmem [shape: f32[1,128], index: 1, kind: input, shape index: {}]   ;;  %s424_s2 = inlined_call_operand.vmem [shape: f32[1,128], index: 2, kind: input, shape index: {}]   ;;  %s425_s3 = inlined_call_operand.vmem [shape: bf16[128,128], index: 3, kind: output, shape index: {}]  }
   0x1   :  { %v227_v0 = vld [vmem:[%s422_s0] sm:$0xff]   ;;  %v298_v4 = vld [vmem:[%s422_s0 + $0x8] sm:$0xff]   ;;  %v299_v5 = vld [vmem:[%s422_s0 + $0x10] sm:$0xff]  }
   0x2   :  { %v338_v1 = vld [vmem:[%s423_s1] ss:$0 sm:$0xff]  ;;  %v228_v2 = vunpack.c.l.bf16 %v227_v0  ;;  %v229_v3 = vunpack.c.h.bf16 %v227_v0  ;;  %v300_v6 = vld [vmem:[%s422_s0 + $0x18] sm:$0xff]   ;;  %v232_v8 = vunpack.c.l.bf16 %v298_v4  ;;  %v233_v9 = vunpack.c.h.bf16 %v298_v4  ;;  %v302_v33 = vld [vmem:[%s422_s0 + $0x28] sm:$0xff]  }
   0x3   :  { %v352_v7 = vld [vmem:[%s424_s2] ss:$0 sm:$0xff]  ;;  %v236_v10 = vunpack.c.l.bf16 %v299_v5  ;;  %v237_v11 = vunpack.c.h.bf16 %v299_v5  ;;  %v240_v14 = vunpack.c.l.bf16 %v300_v6  ;;  %v241_v15 = vunpack.c.h.bf16 %v300_v6  ;;  %v303_v38 = vld [vmem:[%s422_s0 + $0x30] sm:$0xff]   ;;  %v304_v43 = vld [vmem:[%s422_s0 + $0x38] sm:$0xff]  }
   0x4   :  { %v53_v12 = vmul.f32 %v228_v2, %v338_v1  ;;  %v54_v13 = vmul.f32 %v229_v3, %v338_v1  ;;  %v55_v16 = vmul.f32 %v232_v8, %v338_v1  ;;  %v56_v17 = vmul.f32 %v233_v9, %v338_v1  ;;  %v301_v28 = vld [vmem:[%s422_s0 + $0x20] sm:$0xff]  }
   0x5   :  { %v57_v18 = vmul.f32 %v236_v10, %v338_v1  ;;  %v58_v19 = vmul.f32 %v237_v11, %v338_v1  ;;  %v59_v22 = vmul.f32 %v240_v14, %v338_v1  ;;  %v60_v23 = vmul.f32 %v241_v15, %v338_v1 }
   0x6   :  { %v76_v20 = vadd.f32 %v352_v7, %v53_v12  ;;  %v77_v21 = vadd.f32 %v352_v7, %v54_v13  ;;  %v78_v24 = vadd.f32 %v352_v7, %v55_v16  ;;  %v79_v25 = vadd.f32 %v352_v7, %v56_v17 }
   0x7   :  { %v80_v26 = vadd.f32 %v352_v7, %v57_v18  ;;  %v81_v27 = vadd.f32 %v352_v7, %v58_v19  ;;  %v82_v31 = vadd.f32 %v352_v7, %v59_v22  ;;  %v83_v32 = vadd.f32 %v352_v7, %v60_v23 }
   0x8   :  { %v92_v29 = vmax.f32 %v76_v20, 0.0  ;;  %v93_v30 = vmax.f32 %v77_v21, 0.0  ;;  %v94_v34 = vmax.f32 %v78_v24, 0.0  ;;  %v95_v35 = vmax.f32 %v79_v25, 0.0 }
   0x9   :  { %v96_v36 = vmax.f32 %v80_v26, 0.0  ;;  %v97_v37 = vmax.f32 %v81_v27, 0.0  ;;  %v98_v40 = vmax.f32 %v82_v31, 0.0  ;;  %v99_v41 = vmax.f32 %v83_v32, 0.0 }
   0xa   :  { %v261_v39 = vpack.c.bf16 %v93_v30, %v92_v29  ;;  %v244_v42 = vunpack.c.l.bf16 %v301_v28  ;;  %v266_v44 = vpack.c.bf16 %v95_v35, %v94_v34  ;;  %v245_v46 = vunpack.c.h.bf16 %v301_v28 }
   0xb   :  { %v271_v45 = vpack.c.bf16 %v97_v37, %v96_v36  ;;  %v248_v47 = vunpack.c.l.bf16 %v302_v33  ;;  %v276_v48 = vpack.c.bf16 %v99_v41, %v98_v40  ;;  %v249_v50 = vunpack.c.h.bf16 %v302_v33 }
   0xc   :  { %262 = vst [vmem:[%s425_s3] sm:$0xff] %v261_v39   ;;  %v61_v49 = vmul.f32 %v244_v42, %v338_v1  ;;  %v252_v51 = vunpack.c.l.bf16 %v303_v38  ;;  %305 = vst [vmem:[%s425_s3 + $0x8] sm:$0xff] %v266_v44   ;;  %v62_v52 = vmul.f32 %v245_v46, %v338_v1  ;;  %v253_v54 = vunpack.c.h.bf16 %v303_v38 }
   0xd   :  { %306 = vst [vmem:[%s425_s3 + $0x10] sm:$0xff] %v271_v45   ;;  %v63_v53 = vmul.f32 %v248_v47, %v338_v1  ;;  %v256_v55 = vunpack.c.l.bf16 %v304_v43  ;;  %307 = vst [vmem:[%s425_s3 + $0x18] sm:$0xff] %v276_v48   ;;  %v64_v57 = vmul.f32 %v249_v50, %v338_v1  ;;  %v257_v59 = vunpack.c.h.bf16 %v304_v43 }
   0xe   :  { %v84_v56 = vadd.f32 %v352_v7, %v61_v49  ;;  %v65_v58 = vmul.f32 %v252_v51, %v338_v1  ;;  %v85_v60 = vadd.f32 %v352_v7, %v62_v52  ;;  %v66_v62 = vmul.f32 %v253_v54, %v338_v1 }
   0xf   :  { %v86_v61 = vadd.f32 %v352_v7, %v63_v53  ;;  %v67_v63 = vmul.f32 %v256_v55, %v338_v1  ;;  %v87_v2 = vadd.f32 %v352_v7, %v64_v57  ;;  %v68_v4 = vmul.f32 %v257_v59, %v338_v1 }
  0x10   :  { %v100_v0 = vmax.f32 %v84_v56, 0.0  ;;  %v88_v3 = vadd.f32 %v352_v7, %v65_v58  ;;  %v101_v5 = vmax.f32 %v85_v60, 0.0  ;;  %v89_v8 = vadd.f32 %v352_v7, %v66_v62 }
  0x11   :  { %v102_v6 = vmax.f32 %v86_v61, 0.0  ;;  %v90_v9 = vadd.f32 %v352_v7, %v67_v63  ;;  %v103_v10 = vmax.f32 %v87_v2, 0.0  ;;  %v91_v12 = vadd.f32 %v352_v7, %v68_v4 }
  0x12   :  { %v104_v11 = vmax.f32 %v88_v3, 0.0  ;;  %v281_v13 = vpack.c.bf16 %v101_v5, %v100_v0  ;;  %v105_v14 = vmax.f32 %v89_v8, 0.0 }
  0x13   :  { %v106_v15 = vmax.f32 %v90_v9, 0.0  ;;  %v286_v16 = vpack.c.bf16 %v103_v10, %v102_v6  ;;  %v107_v17 = vmax.f32 %v91_v12, 0.0 }
  0x14   :  { %308 = vst [vmem:[%s425_s3 + $0x20] sm:$0xff] %v281_v13   ;;  %v291_v1 = vpack.c.bf16 %v105_v14, %v104_v11 }
  0x15   :  { %309 = vst [vmem:[%s425_s3 + $0x28] sm:$0xff] %v286_v16   ;;  %v296_v18 = vpack.c.bf16 %v107_v17, %v106_v15 }
  0x16   :  { %310 = vst [vmem:[%s425_s3 + $0x30] sm:$0xff] %v291_v1  }
  0x17   :  { %311 = vst [vmem:[%s425_s3 + $0x38] sm:$0xff] %v296_v18  }

// kernel: preact_block.9
= control target key start
LH: loop header
LB: loop body
LE: loop exit
PB: predicated region body
PF: predicated region fallthrough
CT: control target
= control target key end

     0   :  { %s2196_s12 = smov 0   ;;  %s2198_s13 = smov 0   ;;  %s2476_s0 = inlined_call_operand.vmem [shape: bf16[2,36,9,8], index: 0, kind: input, shape index: {}]   ;;  %s2477_s1 = inlined_call_operand.vmem [shape: bf16[3,3,8,128], index: 1, kind: input, shape index: {}]   ;;  %s2478_s2 = inlined_call_operand.vmem [shape: bf16[2,8,8,128], index: 2, kind: output, shape index: {0}]   ;;  %s2479_s3 = inlined_call_operand.vmem [shape: f32[2,2,128], index: 3, kind: output, shape index: {1}]  }
   0x1   :  { %s2200_s14 = smov 0  }
   0x2 LB: > { %s26_s15 = sadd.s32 1, %s2170_s13  ;;  %p1773_p0 = scmp.ge.s32.totalorder %s2174_s14, 1  ;;  %s2174_s14 = sphi %s2200_s14, %s14_s14   ;;  %s2170_s13 = sphi %s2198_s13, %s2483_s13   ;;  %s2166_s12 = sphi %s2196_s12, %s2482_s12  }
   0x3   : > { %p28_p1 = scmp.ge.s32.totalorder %s26_s15, 2  ;;  %p156_p2 = scmp.lt.s32.totalorder %s2174_s14, 3 }
   0x5   : > { %s2485_s15 = smov (%p28_p1, %s26_s15), 0  ;;  %p157_p3 = pnand %p1773_p0, %p156_p2 }
   0x6   : > { %p189_p4 = scmp.lt.s32.totalorder (!%p157_p3), %s2166_s12, 1 }
   0x7   : > { %160 = sbr.rel (%p157_p3) target bundleno = 315 (0x13b), region = 28 }
   0xc   : > { %v1786_v0 = vld [vmem:[%s2477_s1 + $0x4] sm:$0xf]  ;;  %vm264_vm0 = vcmask 1043456   ;;  %v219_v2 = vld [vmem:[%s2477_s1] sm:$0xf]  ;;  %s2487_s12 = smov (!%p189_p4, %s2166_s12), 1 }
   0xd   : > { %2094 = vmatprep.subr.msk.bf16.mxu1 %vm264_vm0, %v1786_v0  ;;  %2093 = vmatprep.subr.msk.bf16.mxu0 %vm264_vm0, %v1786_v0  ;;  %v266_v1 = vsel %vm264_vm0, %v1786_v0, 0  ;;  %v1803_v3 = vld [vmem:[%s2477_s1 + $0x8] sm:$0xf]  ;;  %s2103_s22 = smul.u32 288, %s2487_s12  ;;  %vm251_vm1 = vcmask 64512   ;;  %v366_v4 = vsel %vm264_vm0, %v219_v2, 0 }
   0xe   : > { %2092 = vmatpush3.bf16.msra.mxu1 %v266_v1  ;;  %2002 = vmatpush3.bf16.msra.mxu0 %v266_v1  ;;  %v591_v5 = vsel %vm264_vm0, %v1803_v3, 0  ;;  %v1820_v7 = vld [vmem:[%s2477_s1 + $0xc] sm:$0xf]  ;;  %v1837_v8 = vld [vmem:[%s2477_s1 + $0x10] sm:$0xf]  ;;  %s1932_s11 = sshll.u32 %s2487_s12, 5 }
   0xf   : > { %2095 = vmatprep.subr.msk.bf16.mxu1 %vm264_vm0, %v219_v2  ;;  %2096 = vmatprep.subr.msk.bf16.mxu0 %vm264_vm0, %v1803_v3  ;;  %s2234_s25 = scalar_lea.vmem %s2476_s0, %s2103_s22  ;;  %vm449_vm2 = vsmask.f32 3328  ;;  %vm450_vm3 = vsmask.f32 7440  ;;  %v710_v13 = vsel %vm264_vm0, %v1820_v7, 0  ;;  %v2255_v14 = vsel %vm264_vm0, %v1837_v8, 0  ;;  %s2457_s18 = scalar_lea.vmem %s2478_s2, %s1932_s11 }
  0x10   : > { %v2128_v6 = vld [vmem:[%s2234_s25 + $0x48] ss:$8 sps:$4 sm:$0xff]   ;;  %v2130_v10 = vld [vmem:[%s2234_s25 + $0x58] ss:$8 sps:$4 sm:$0xff]   ;;  %v434_v16 = vld [vmem:[%s2234_s25 + $0x4] sm:$0x1] }
  0x11   : > { %v2129_v9 = vld [vmem:[%s2234_s25 + $0x68] ss:$8 sps:$4 sm:$0xff]   ;;  %2003 = vmatprep.mubr.msk.bf16.mxu0 %vm251_vm1, %v2128_v6  ;;  %v2131_v11 = vld [vmem:[%s2234_s25 + $0x78] ss:$8 sps:$4 sm:$0xff]   ;;  %v436_v19 = vld [vmem:[%s2234_s25 + $0xc] sm:$0x1] }
  0x12   : > { %2007 = vmatprep.mubr.msk.bf16.mxu1 %vm251_vm1, %v2129_v9  ;;  %2004 = vmatmul.mubr.msk.bf16.vlgmr.msra.gmra.mxu0 %vm251_vm1, %v2130_v10  ;;  %v2132_v12 = vld [vmem:[%s2234_s25] ss:$8 sps:$4 sm:$0xff]   ;;  %v2133_v18 = vld [vmem:[%s2234_s25 + $0x10] ss:$8 sps:$4 sm:$0xff]   ;;  %v462_v22 = vshll.u32 %v434_v16, 16  ;;  %v476_v25 = vshll.u32 %v436_v19, 16  ;;  %vm2276_vm4 = vmor %vm449_vm2, %vm450_vm3 }
  0x13   : > { %2008 = vmatmul.mubr.msk.bf16.vlgmr.msra.gmra.mxu1 %vm251_vm1, %v2131_v11  ;;  %2022 = vmatpush3.bf16.msra.mxu0 %v591_v5  ;;  %v433_v15 = vld [vmem:[%s2234_s25] sm:$0xf]  ;;  %v435_v17 = vld [vmem:[%s2234_s25 + $0x8] sm:$0xf]  ;;  %v437_v26 = vld [vmem:[%s2234_s25 + $0x10] sm:$0xf] }
  0x14   : > { %2012 = vmatpush3.bf16.msra.mxu1 %v366_v4  ;;  %2013 = vmatprep.mubr.msk.bf16.mxu1 %vm251_vm1, %v2132_v12  ;;  %v453_v20 = vshrl.u32 %v433_v15, 16  ;;  %v456_v21 = vshll.u32 %v433_v15, 16  ;;  %v467_v23 = vshrl.u32 %v435_v17, 16  ;;  %v470_v24 = vshll.u32 %v435_v17, 16  ;;  %v438_v27 = vld [vmem:[%s2234_s25 + $0x14] sm:$0x1] }
  0x15   : > { %2097 = vmatprep.subr.msk.bf16.mxu1 %vm264_vm0, %v1820_v7  ;;  %2098 = vmatprep.subr.msk.bf16.mxu0 %vm264_vm0, %v1837_v8  ;;  %v464_v30 = vrot.slane %v462_v22, 5  ;;  %v439_v32 = vld [vmem:[%s2234_s25 + $0x18] sm:$0xf]  ;;  %v478_v34 = vrot.slane %v476_v25, 5  ;;  %v440_v35 = vld [vmem:[%s2234_s25 + $0x1c] sm:$0x1] }
  0x16   : > { %v455_v28 = vrot.slane %v453_v20, 4  ;;  %v458_v29 = vrot.slane %v456_v21, 5  ;;  %v469_v31 = vrot.slane %v467_v23, 4  ;;  %v472_v33 = vrot.slane %v470_v24, 5  ;;  %v2272_v38 = vld [vmem:[%s2477_s1 + $0x14] sm:$0xf] }
  0x17   : > { %v481_v36 = vshrl.u32 %v437_v26, 16  ;;  %v484_v37 = vshll.u32 %v437_v26, 16  ;;  %v490_v40 = vshll.u32 %v438_v27, 16  ;;  %v495_v41 = vshrl.u32 %v439_v32, 16  ;;  %v2134_v52 = vld [vmem:[%s2234_s25 + $0x20] ss:$8 sps:$4 sm:$0xff]  }
  0x18   : > { %v459_v39 = vor.u32 %v458_v29, %v455_v28  ;;  %v498_v42 = vshll.u32 %v439_v32, 16  ;;  %v473_v44 = vor.u32 %v472_v33, %v469_v31  ;;  %v504_v47 = vshll.u32 %v440_v35, 16  ;;  %v2135_v58 = vld [vmem:[%s2234_s25 + $0x30] ss:$8 sps:$4 sm:$0xff]   ;;  %v441_v59 = vld [vmem:[%s2234_s25 + $0x20] sm:$0xf] }
  0x19   : > { %v483_v45 = vrot.slane %v481_v36, 4  ;;  %v486_v46 = vrot.slane %v484_v37, 5  ;;  %v492_v49 = vrot.slane %v490_v40, 5  ;;  %v497_v50 = vrot.slane %v495_v41, 4  ;;  %v442_v60 = vld [vmem:[%s2234_s25 + $0x24] sm:$0x1] }
  0x1a   : > { %v460_v48 = vrot.slane %v459_v39, 4  ;;  %v500_v51 = vrot.slane %v498_v42, 5  ;;  %v474_v53 = vrot.slane %v473_v44, 4  ;;  %v506_v55 = vrot.slane %v504_v47, 5  ;;  %v443_v63 = vld [vmem:[%s2234_s25 + $0x28] sm:$0xf] }
  0x1b   : > { %2014 = vmatmul.mubr.msk.bf16.vlgmr.msra.gmra.mxu1 %vm251_vm1, %v2133_v18  ;;  %v487_v54 = vor.u32 %v486_v46, %v483_v45  ;;  %v444_v0 = vld [vmem:[%s2234_s25 + $0x2c] sm:$0x1]  ;;  %v509_v1 = vshrl.u32 %v441_v59, 16  ;;  %v512_v4 = vshll.u32 %v441_v59, 16  ;;  %v518_v5 = vshll.u32 %v442_v60, 16  ;;  %s1777_s19 = sshll.u32 %s2487_s12, 1 }
  0x1c   : > { %2032 = vmatpush3.bf16.msra.mxu1 %v710_v13  ;;  %v465_v56 = vsel %vm2276_vm4, %v460_v48, %v464_v30  ;;  %v501_v57 = vor.u32 %v500_v51, %v497_v50  ;;  %2017 = vmatprep.mubr.msk.bf16.mxu1 %vm251_vm1, %v2134_v52  ;;  %v479_v61 = vsel %vm2276_vm4, %v474_v53, %v478_v34  ;;  %v445_v6 = vld [vmem:[%s2234_s25 + $0x30] sm:$0xf]  ;;  %v523_v9 = vshrl.u32 %v443_v63, 16  ;;  %v446_v11 = vld [vmem:[%s2234_s25 + $0x34] sm:$0x1]  ;;  %s208_s22 = scalar_lea.vmem %s2479_s3, %s1777_s19 }
  0x1d   : > { %2099 = vmatprep.subr.msk.bf16.mxu1 %vm264_vm0, %v2272_v38  ;;  %v488_v62 = vrot.slane %v487_v54, 4  ;;  %v1804_v2 = vcombine.low %v465_v56, %v479_v61  ;;  %v511_v8 = vrot.slane %v509_v1, 4  ;;  %v526_v10 = vshll.u32 %v443_v63, 16  ;;  %v447_v17 = vld [vmem:[%s2234_s25 + $0x38] sm:$0xf] }
  0x1e   : > { %v502_v3 = vrot.slane %v501_v57, 4  ;;  %v514_v13 = vrot.slane %v512_v4, 5  ;;  %v520_v15 = vrot.slane %v518_v5, 5  ;;  %v532_v16 = vshll.u32 %v444_v0, 16  ;;  %v1879_v18 = vld [vmem:[%s2477_s1 + $0x18] sm:$0xf] }
  0x1f   : > { %v493_v7 = vsel %vm2276_vm4, %v488_v62, %v492_v49  ;;  %2023 = vmatprep.mubr.msk.bf16.mxu0 %vm251_vm1, %v1804_v2  ;;  %v525_v20 = vrot.slane %v523_v9, 4  ;;  %v528_v21 = vrot.slane %v526_v10, 5  ;;  %v448_v22 = vld [vmem:[%s2234_s25 + $0x3c] sm:$0x1]  ;;  %v537_v23 = vshrl.u32 %v445_v6, 16 }
  0x20   : > { %v507_v12 = vsel %vm2276_vm4, %v502_v3, %v506_v55  ;;  %v515_v24 = vor.u32 %v514_v13, %v511_v8  ;;  %v534_v25 = vrot.slane %v532_v16, 5  ;;  %v540_v26 = vshll.u32 %v445_v6, 16  ;;  %v2136_v35 = vld [vmem:[%s2234_s25 + $0x90] ss:$8 sps:$4 sm:$0xff]   ;;  %v2137_v44 = vld [vmem:[%s2234_s25 + $0xa0] ss:$8 sps:$4 sm:$0xff]  }
  0x21   : > { %v1805_v19 = vcombine.low %v493_v7, %v507_v12  ;;  %v546_v27 = vshll.u32 %v446_v11, 16  ;;  %v529_v28 = vor.u32 %v528_v21, %v525_v20  ;;  %v539_v29 = vrot.slane %v537_v23, 4  ;;  %v1896_v51 = vld [vmem:[%s2477_s1 + $0x1c] sm:$0xf]  ;;  %v2140_v53 = vld [vmem:[%s2234_s25 + $0xb0] ss:$8 sps:$4 sm:$0xff]  }
  0x22   : > { %v551_v30 = vshrl.u32 %v447_v17, 16  ;;  %v554_v31 = vshll.u32 %v447_v17, 16  ;;  %v516_v32 = vrot.slane %v515_v24, 4  ;;  %v542_v33 = vrot.slane %v540_v26, 5  ;;  %v2141_v57 = vld [vmem:[%s2234_s25 + $0xc0] ss:$8 sps:$4 sm:$0xff]  }
  0x23   : > { %2018 = vmatmul.mubr.msk.bf16.gmra.mxu1 %vm251_vm1, %v2135_v58  ;;  %2024 = vmatmul.mubr.msk.bf16.vlgmr.msra.gmra.mxu0 %vm251_vm1, %v1805_v19  ;;  %v560_v34 = vshll.u32 %v448_v22, 16  ;;  %v530_v36 = vrot.slane %v529_v28, 4  ;;  %v548_v42 = vrot.slane %v546_v27, 5  ;;  %v1059_v49 = vsel %vm264_vm0, %v2272_v38, 0  ;;  %v2138_v38 = vld [vmem:[%s2234_s25 + $0xd8] ss:$8 sps:$4 sm:$0xff]  }
  0x24   : > { %2042 = vmatpush3.bf16.msra.mxu0 %v2255_v14  ;;  %v553_v37 = vrot.slane %v551_v30, 4  ;;  %v556_v39 = vrot.slane %v554_v31, 5  ;;  %v521_v40 = vsel %vm2276_vm4, %v516_v32, %v520_v15  ;;  %v543_v41 = vor.u32 %v542_v33, %v539_v29  ;;  %2033 = vmatprep.mubr.msk.bf16.mxu1 %vm251_vm1, %v2136_v35  ;;  %v1846_v58 = vld [vmem:[%s2234_s25 + $0x90] sm:$0xf]  ;;  %v1847_v59 = vld [vmem:[%s2234_s25 + $0x94] sm:$0x1] }
  0x25   : > { %2100 = vmatprep.subr.msk.bf16.mxu0 %vm264_vm0, %v1879_v18  ;;  %v535_v14 = vsel %vm2276_vm4, %v530_v36, %v534_v25  ;;  %v562_v46 = vrot.slane %v560_v34, 5  ;;  %v1178_v56 = vsel %vm264_vm0, %v1879_v18, 0  ;;  %v1848_v60 = vld [vmem:[%s2234_s25 + $0x98] sm:$0xf]  ;;  %v1849_v61 = vld [vmem:[%s2234_s25 + $0x9c] sm:$0x1] }
  0x26   : > { %v557_v45 = vor.u32 %v556_v39, %v553_v37  ;;  %v1806_v47 = vcombine.low %v521_v40, %v535_v14  ;;  %v544_v48 = vrot.slane %v543_v41, 4  ;;  %v921_v62 = vshrl.u32 %v1846_v58, 16  ;;  %v1850_v2 = vld [vmem:[%s2234_s25 + $0xa0] sm:$0xf]  ;;  %v2139_v3 = vld [vmem:[%s2234_s25 + $0xe8] ss:$8 sps:$4 sm:$0xff]  }
  0x27   : > { %v924_v63 = vshll.u32 %v1846_v58, 16  ;;  %v930_v0 = vshll.u32 %v1847_v59, 16  ;;  %v935_v1 = vshrl.u32 %v1848_v60, 16  ;;  %v938_v4 = vshll.u32 %v1848_v60, 16  ;;  %v1851_v6 = vld [vmem:[%s2234_s25 + $0xa4] sm:$0x1] }
  0x28   : > { %v558_v50 = vrot.slane %v557_v45, 4  ;;  %2027 = vmatprep.mubr.msk.bf16.mxu0 %vm251_vm1, %v1806_v47  ;;  %v549_v52 = vsel %vm2276_vm4, %v544_v48, %v548_v42  ;;  %v944_v5 = vshll.u32 %v1849_v61, 16  ;;  %v1852_v7 = vld [vmem:[%s2234_s25 + $0xa8] sm:$0xf]  ;;  %v2142_v8 = vld [vmem:[%s2234_s25 + $0xf8] ss:$8 sps:$4 sm:$0xff]  }
  0x29   : > { %v923_v9 = vrot.slane %v921_v62, 4  ;;  %v926_v10 = vrot.slane %v924_v63, 5  ;;  %v932_v11 = vrot.slane %v930_v0, 5  ;;  %v937_v12 = vrot.slane %v935_v1, 4  ;;  %v1853_v13 = vld [vmem:[%s2234_s25 + $0xac] sm:$0x1] }
  0x2a   : > { %v563_v54 = vsel %vm2276_vm4, %v558_v50, %v562_v46  ;;  %v940_v15 = vrot.slane %v938_v4, 5  ;;  %v946_v16 = vrot.slane %v944_v5, 5  ;;  %v949_v17 = vshrl.u32 %v1850_v2, 16  ;;  %v2350_v27 = vld [vmem:[%s2477_s1 + $0x20] sm:$0xf] }
  0x2b   : > { %2034 = vmatmul.mubr.msk.bf16.vlgmr.msra.gmra.mxu1 %vm251_vm1, %v2137_v44  ;;  %v1807_v55 = vcombine.low %v549_v52, %v563_v54  ;;  %v952_v18 = vshll.u32 %v1850_v2, 16  ;;  %v927_v19 = vor.u32 %v926_v10, %v923_v9  ;;  %v958_v20 = vshll.u32 %v1851_v6, 16  ;;  %v1854_v39 = vld [vmem:[%s2234_s25 + $0xb0] sm:$0xf]  ;;  %v1855_v40 = vld [vmem:[%s2234_s25 + $0xb4] sm:$0x1] }
  0x2c   : > { %2052 = vmatpush3.bf16.msra.mxu1 %v1059_v49  ;;  %2037 = vmatprep.mubr.msk.bf16.mxu1 %vm251_vm1, %v2140_v53  ;;  %v963_v21 = vshrl.u32 %v1852_v7, 16  ;;  %v966_v22 = vshll.u32 %v1852_v7, 16  ;;  %v941_v23 = vor.u32 %v940_v15, %v937_v12  ;;  %v951_v24 = vrot.slane %v949_v17, 4  ;;  %v1856_v41 = vld [vmem:[%s2234_s25 + $0xb8] sm:$0xf] }
  0x2d   : > { %2101 = vmatprep.subr.msk.bf16.mxu1 %vm264_vm0, %v1896_v51  ;;  %2028 = vmatmul.mubr.msk.bf16.gmra.mxu0 %vm251_vm1, %v1807_v55  ;;  %v954_v25 = vrot.slane %v952_v18, 5  ;;  %v972_v26 = vshll.u32 %v1853_v13, 16  ;;  %v928_v28 = vrot.slane %v927_v19, 4  ;;  %v1297_v31 = vsel %vm264_vm0, %v1896_v51, 0  ;;  %v2143_v42 = vld [vmem:[%s2234_s25 + $0x108] ss:$8 sps:$4 sm:$0xff]  }
  0x2e   : > { %2043 = vmatprep.mubr.msk.bf16.mxu0 %vm251_vm1, %v2138_v38  ;;  %v965_v29 = vrot.slane %v963_v21, 4  ;;  %v968_v30 = vrot.slane %v966_v22, 5  ;;  %v942_v32 = vrot.slane %v941_v23, 4  ;;  %v960_v34 = vrot.slane %v958_v20, 5  ;;  %v1857_v45 = vld [vmem:[%s2234_s25 + $0xbc] sm:$0x1] }
  0x2f   : > { %v955_v33 = vor.u32 %v954_v25, %v951_v24  ;;  %v974_v35 = vrot.slane %v972_v26, 5  ;;  %v933_v36 = vsel %vm2276_vm4, %v928_v28, %v932_v11  ;;  %v977_v46 = vshrl.u32 %v1854_v39, 16  ;;  %v2144_v50 = vld [vmem:[%s2234_s25 + $0x8] ss:$8 sps:$4 sm:$0xff]   ;;  %v1858_v53 = vld [vmem:[%s2234_s25 + $0xc0] sm:$0xf] }
  0x30   : > { %v969_v37 = vor.u32 %v968_v30, %v965_v29  ;;  %v947_v44 = vsel %vm2276_vm4, %v942_v32, %v946_v16  ;;  %v980_v47 = vshll.u32 %v1854_v39, 16  ;;  %v986_v51 = vshll.u32 %v1855_v40, 16  ;;  %v1860_v62 = vld [vmem:[%s2234_s25 + $0xc8] sm:$0xf]  ;;  %v1861_v2 = vld [vmem:[%s2234_s25 + $0xcc] sm:$0x1] }
  0x31   : > { %v956_v14 = vrot.slane %v955_v33, 4  ;;  %v1863_v48 = vcombine.low %v933_v36, %v947_v44  ;;  %v991_v52 = vshrl.u32 %v1856_v41, 16  ;;  %v979_v38 = vrot.slane %v977_v46, 4  ;;  %v2145_v16 = vld [vmem:[%s2234_s25 + $0x18] ss:$8 sps:$4 sm:$0xff]  }
  0x32   : > { %v970_v49 = vrot.slane %v969_v37, 4  ;;  %v982_v55 = vrot.slane %v980_v47, 5  ;;  %v988_v59 = vrot.slane %v986_v51, 5  ;;  %v1000_v61 = vshll.u32 %v1857_v45, 16  ;;  %v2146_v29 = vld [vmem:[%s2234_s25 + $0x28] ss:$8 sps:$4 sm:$0xff]  }
  0x33   : > { %2038 = vmatmul.mubr.msk.bf16.gmra.mxu1 %vm251_vm1, %v2141_v57  ;;  %v961_v54 = vsel %vm2276_vm4, %v956_v14, %v960_v34  ;;  %v1859_v57 = vld [vmem:[%s2234_s25 + $0xc4] sm:$0x1]  ;;  %v993_v60 = vrot.slane %v991_v52, 4  ;;  %v1008_v5 = vshll.u32 %v1858_v53, 16  ;;  %v1019_v7 = vshrl.u32 %v1860_v62, 16 }
  0x34   : > { %2053 = vmatprep.mubr.msk.bf16.mxu1 %vm251_vm1, %v1863_v48  ;;  %v975_v58 = vsel %vm2276_vm4, %v970_v49, %v974_v35  ;;  %v983_v0 = vor.u32 %v982_v55, %v979_v38  ;;  %v1002_v4 = vrot.slane %v1000_v61, 5  ;;  %v1014_v6 = vshll.u32 %v1859_v57, 16  ;;  %v1905_v30 = vld [vmem:[%s2234_s25 + $0x8] sm:$0xf]  ;;  %v2148_v32 = vld [vmem:[%s2234_s25 + $0x50] ss:$8 sps:$4 sm:$0xff]  }
  0x35   : > { %2044 = vmatmul.mubr.msk.bf16.vlgmr.msra.gmra.mxu0 %vm251_vm1, %v2139_v3  ;;  %v1864_v63 = vcombine.low %v961_v54, %v975_v58  ;;  %v1005_v3 = vshrl.u32 %v1858_v53, 16  ;;  %v1022_v11 = vshll.u32 %v1860_v62, 16  ;;  %v1010_v12 = vrot.slane %v1008_v5, 5  ;;  %v1906_v33 = vld [vmem:[%s2234_s25 + $0xc] sm:$0x1] }
  0x36   : > { %2062 = vmatpush3.bf16.msra.mxu0 %v1178_v56  ;;  %2047 = vmatprep.mubr.msk.bf16.mxu0 %vm251_vm1, %v2142_v8  ;;  %v994_v56 = vshll.u32 %v1856_v41, 16  ;;  %v984_v8 = vrot.slane %v983_v0, 4  ;;  %v1021_v13 = vrot.slane %v1019_v7, 4  ;;  %v1028_v15 = vshll.u32 %v1861_v2, 16  ;;  %v1907_v34 = vld [vmem:[%s2234_s25 + $0x10] sm:$0xf] }
  0x37   : > { %2102 = vmatprep.subr.msk.bf16.mxu0 %vm264_vm0, %v2350_v27  ;;  %v1007_v10 = vrot.slane %v1005_v3, 4  ;;  %v1024_v19 = vrot.slane %v1022_v11, 5  ;;  %v1016_v21 = vrot.slane %v1014_v6, 5  ;;  %v1527_v25 = vsel %vm264_vm0, %v2350_v27, 0  ;;  %v1908_v37 = vld [vmem:[%s2234_s25 + $0x14] sm:$0x1] }
  0x38   : > { %v996_v1 = vrot.slane %v994_v56, 5  ;;  %v989_v17 = vsel %vm2276_vm4, %v984_v8, %v988_v59  ;;  %v1030_v24 = vrot.slane %v1028_v15, 5  ;;  %v1389_v35 = vshrl.u32 %v1905_v30, 16  ;;  %v1909_v45 = vld [vmem:[%s2234_s25 + $0x18] sm:$0xf] }
  0x39   : > { %v1011_v20 = vor.u32 %v1010_v12, %v1007_v10  ;;  %v1025_v23 = vor.u32 %v1024_v19, %v1021_v13  ;;  %v1392_v39 = vshll.u32 %v1905_v30, 16  ;;  %v1398_v27 = vshll.u32 %v1906_v33, 16  ;;  %v2147_v51 = vld [vmem:[%s2234_s25 + $0x38] ss:$8 sps:$4 sm:$0xff]   ;;  %v1912_v38 = vld [vmem:[%s2234_s25 + $0x24] sm:$0x1] }
  0x3a   : > { %v997_v9 = vor.u32 %v996_v1, %v993_v60  ;;  %v1403_v40 = vshrl.u32 %v1907_v34, 16  ;;  %v1406_v44 = vshll.u32 %v1907_v34, 16  ;;  %v1412_v14 = vshll.u32 %v1908_v37, 16  ;;  %v1911_v54 = vld [vmem:[%s2234_s25 + $0x20] sm:$0xf] }
  0x3b   : > { %2054 = vmatmul.mubr.msk.bf16.vlgmr.msra.gmra.mxu1 %vm251_vm1, %v1864_v63  ;;  %v1012_v28 = vrot.slane %v1011_v20, 4  ;;  %v1394_v47 = vrot.slane %v1392_v39, 5  ;;  %v1400_v48 = vrot.slane %v1398_v27, 5  ;;  %v1417_v56 = vshrl.u32 %v1909_v45, 16  ;;  %v2149_v63 = vld [vmem:[%s2234_s25 + $0x60] ss:$8 sps:$4 sm:$0xff]  }
  0x3c   : > { %2072 = vmatpush3.bf16.msra.mxu1 %v1297_v31  ;;  %v998_v18 = vrot.slane %v997_v9, 4  ;;  %v1026_v31 = vrot.slane %v1025_v23, 4  ;;  %v1405_v49 = vrot.slane %v1403_v40, 4  ;;  %v1408_v52 = vrot.slane %v1406_v44, 5  ;;  %v2150_v6 = vld [vmem:[%s2234_s25 + $0x70] ss:$8 sps:$4 sm:$0xff]  }
  0x3d   : > { %2048 = vmatmul.mubr.msk.bf16.gmra.mxu0 %vm251_vm1, %v2143_v42  ;;  %v1017_v36 = vsel %vm2276_vm4, %v1012_v28, %v1016_v21  ;;  %v1391_v42 = vrot.slane %v1389_v35, 4  ;;  %v1414_v53 = vrot.slane %v1412_v14, 5  ;;  %v1420_v57 = vshll.u32 %v1909_v45, 16  ;;  %v1913_v11 = vld [vmem:[%s2234_s25 + $0x28] sm:$0xf] }
  0x3e   : > { %2063 = vmatprep.mubr.msk.bf16.mxu0 %vm251_vm1, %v2144_v50  ;;  %v1003_v22 = vsel %vm2276_vm4, %v998_v18, %v1002_v4  ;;  %v1031_v41 = vsel %vm2276_vm4, %v1026_v31, %v1030_v24  ;;  %v1910_v50 = vld [vmem:[%s2234_s25 + $0x1c] sm:$0x1]  ;;  %v1409_v59 = vor.u32 %v1408_v52, %v1405_v49  ;;  %v1431_v60 = vshrl.u32 %v1911_v54, 16  ;;  %v1914_v15 = vld [vmem:[%s2234_s25 + $0x2c] sm:$0x1] }
  0x3f   : > { %v1865_v26 = vcombine.low %v989_v17, %v1003_v22  ;;  %v1866_v46 = vcombine.low %v1017_v36, %v1031_v41  ;;  %v1395_v55 = vor.u32 %v1394_v47, %v1391_v42  ;;  %v1426_v58 = vshll.u32 %v1910_v50, 16  ;;  %v1916_v17 = vld [vmem:[%s2234_s25 + $0x34] sm:$0x1]  ;;  %v1917_v22 = vld [vmem:[%s2234_s25 + $0x38] sm:$0xf] }
  0x40   : > { %v1434_v61 = vshll.u32 %v1911_v54, 16  ;;  %v1440_v62 = vshll.u32 %v1912_v38, 16  ;;  %v1419_v1 = vrot.slane %v1417_v56, 4  ;;  %v1422_v2 = vrot.slane %v1420_v57, 5  ;;  %v1918_v28 = vld [vmem:[%s2234_s25 + $0x3c] sm:$0x1] }
  0x41   : > { %2057 = vmatprep.mubr.msk.bf16.mxu1 %vm251_vm1, %v1865_v26  ;;  %v1396_v0 = vrot.slane %v1395_v55, 4  ;;  %v1410_v3 = vrot.slane %v1409_v59, 4  ;;  %v1433_v4 = vrot.slane %v1431_v60, 4  ;;  %v1428_v9 = vrot.slane %v1426_v58, 5  ;;  %v1919_v33 = vld [vmem:[%s2234_s25 + $0x40] sm:$0xf] }
  0x42   : > { %v1436_v5 = vrot.slane %v1434_v61, 5  ;;  %v1423_v8 = vor.u32 %v1422_v2, %v1419_v1  ;;  %v1442_v10 = vrot.slane %v1440_v62, 5  ;;  %v1445_v20 = vshrl.u32 %v1913_v11, 16  ;;  %v1920_v39 = vld [vmem:[%s2234_s25 + $0x44] sm:$0x1] }
  0x43   : > { %2058 = vmatmul.mubr.msk.bf16.gmra.mxu1 %vm251_vm1, %v1866_v46  ;;  %v1401_v7 = vsel %vm2276_vm4, %v1396_v0, %v1400_v48  ;;  %v1415_v12 = vsel %vm2276_vm4, %v1410_v3, %v1414_v53  ;;  %v1448_v21 = vshll.u32 %v1913_v11, 16  ;;  %v1454_v24 = vshll.u32 %v1914_v15, 16  ;;  %v2151_v47 = vld [vmem:[%s2234_s25 + $0x80] ss:$8 sps:$4 sm:$0xff]  }
  0x44   : > { %2073 = vmatprep.mubr.msk.bf16.mxu1 %vm251_vm1, %v2148_v32  ;;  %v1437_v13 = vor.u32 %v1436_v5, %v1433_v4  ;;  %v1922_v18 = vcombine.low %v1401_v7, %v1415_v12  ;;  %v1424_v19 = vrot.slane %v1423_v8, 4  ;;  %v1447_v30 = vrot.slane %v1445_v20, 4 }
  0x45   : > { %2064 = vmatmul.mubr.msk.bf16.vlgmr.msra.gmra.mxu0 %vm251_vm1, %v2145_v16  ;;  %v1915_v16 = vld [vmem:[%s2234_s25 + $0x30] sm:$0xf]  ;;  %v1450_v31 = vrot.slane %v1448_v21, 5  ;;  %v1468_v32 = vshll.u32 %v1916_v17, 16  ;;  %v1456_v35 = vrot.slane %v1454_v24, 5  ;;  %v1473_v42 = vshrl.u32 %v1917_v22, 16 }
  0x46   : > { %2082 = vmatpush3.bf16.msra.mxu0 %v1527_v25  ;;  %2067 = vmatprep.mubr.msk.bf16.mxu0 %vm251_vm1, %v2146_v29  ;;  %v1438_v23 = vrot.slane %v1437_v13, 4  ;;  %v1459_v25 = vshrl.u32 %v1915_v16, 16  ;;  %v1462_v26 = vshll.u32 %v1915_v16, 16  ;;  %v1429_v29 = vsel %vm2276_vm4, %v1424_v19, %v1428_v9 }
  0x47   : > { %v1451_v40 = vor.u32 %v1450_v31, %v1447_v30  ;;  %v1470_v41 = vrot.slane %v1468_v32, 5  ;;  %v1476_v14 = vshll.u32 %v1917_v22, 16  ;;  %v1482_v45 = vshll.u32 %v1918_v28, 16 }
  0x48   : > { %v1443_v34 = vsel %vm2276_vm4, %v1438_v23, %v1442_v10  ;;  %v1461_v36 = vrot.slane %v1459_v25, 4  ;;  %v1464_v37 = vrot.slane %v1462_v26, 5  ;;  %v1487_v46 = vshrl.u32 %v1919_v33, 16 }
  0x49   : > { %v1923_v27 = vcombine.low %v1429_v29, %v1443_v34  ;;  %v1452_v48 = vrot.slane %v1451_v40, 4  ;;  %v1475_v49 = vrot.slane %v1473_v42, 4  ;;  %v1490_v50 = vshll.u32 %v1919_v33, 16 }
  0x4a   : > { %v1465_v44 = vor.u32 %v1464_v37, %v1461_v36  ;;  %v1478_v53 = vrot.slane %v1476_v14, 5  ;;  %v1489_v54 = vrot.slane %v1487_v46, 4  ;;  %v1484_v58 = vrot.slane %v1482_v45, 5 }
  0x4b   : > { %2074 = vmatmul.mubr.msk.bf16.vlgmr.msra.gmra.mxu1 %vm251_vm1, %v2149_v63  ;;  %v1457_v38 = vsel %vm2276_vm4, %v1452_v48, %v1456_v35  ;;  %v1492_v55 = vrot.slane %v1490_v50, 5 }
  0x4c   : > { %2077 = vmatprep.mubr.msk.bf16.mxu1 %vm251_vm1, %v2150_v6  ;;  %v1466_v52 = vrot.slane %v1465_v44, 4  ;;  %v1479_v57 = vor.u32 %v1478_v53, %v1475_v49 }
  0x4d   : > { %2068 = vmatmul.mubr.msk.bf16.gmra.mxu0 %vm251_vm1, %v2147_v51  ;;  %v1496_v51 = vshll.u32 %v1920_v39, 16  ;;  %v1493_v60 = vor.u32 %v1492_v55, %v1489_v54 }
  0x4e   : > { %2083 = vmatprep.mubr.msk.bf16.mxu0 %vm251_vm1, %v1922_v18  ;;  %v1471_v56 = vsel %vm2276_vm4, %v1466_v52, %v1470_v41  ;;  %v1480_v62 = vrot.slane %v1479_v57, 4 }
  0x4f   : > { %v1924_v59 = vcombine.low %v1457_v38, %v1471_v56  ;;  %v1498_v61 = vrot.slane %v1496_v51, 5  ;;  %v1494_v63 = vrot.slane %v1493_v60, 4 }
  0x50   : > { %v1485_v0 = vsel %vm2276_vm4, %v1480_v62, %v1484_v58 }
  0x51   : > { %v1499_v1 = vsel %vm2276_vm4, %v1494_v63, %v1498_v61 }
  0x52   : > { %v1925_v2 = vcombine.low %v1485_v0, %v1499_v1 }
  0x53   : > { %2078 = vmatmul.mubr.msk.bf16.gmra.mxu1 %vm251_vm1, %v2151_v47 }
  0x55   : > { %2084 = vmatmul.mubr.msk.bf16.vlgmr.msra.gmra.mxu0 %vm251_vm1, %v1923_v27 }
  0x56   : > { %2087 = vmatprep.mubr.msk.bf16.mxu0 %vm251_vm1, %v1924_v59 }
  0x5d   : > { %2088 = vmatmul.mubr.msk.bf16.gmra.mxu0 %vm251_vm1, %v1925_v2 }
  0xd2   : > { %v2005_v5 = vpop.f32.mrf.mxu0 }
  0xd3   : > { %v2441_v3 = vpop.f32.mrf.mxu1 }
  0xd4   : > { %v302_v8 = vpop.f32.mrf.mxu0 }
  0xd5   : > { %v318_v4 = vpop.f32.mrf.mxu1 }
  0xd6   : > { %v2006_v11 = vpop.f32.mrf.mxu0 }
  0xd7   : > { %v2010_v6 = vpop.f32.mrf.mxu1 }
  0xd8   : > { %v305_v15 = vpop.f32.mrf.mxu0 }
  0xd9   : > { %v2443_v7 = vpop.f32.mrf.mxu1 }
  0xdb   : > { %v2015_v9 = vpop.f32.mrf.mxu1 }
  0xdc   : > { %v411_v48 = vadd.f32 %v2015_v9, %v2005_v5 }
  0xdd   : > { %v402_v10 = vpop.f32.mrf.mxu1 }
  0xde   : > { %v403_v46 = vadd.f32 %v402_v10, %v302_v8 }
  0xdf   : > { %v2016_v12 = vpop.f32.mrf.mxu1 }
  0xe0   : > { %v414_v49 = vadd.f32 %v2016_v12, %v2006_v11 }
  0xe1   : > { %v405_v13 = vpop.f32.mrf.mxu1 }
  0xe2   : > { %v406_v52 = vadd.f32 %v405_v13, %v305_v15 }
  0xe3   : > { %v2019_v16 = vpop.f32.mrf.mxu1  ;;  %v2025_v43 = vpop.f32.mrf.mxu0 }
  0xe4   : > { %v660_v38 = vadd.f32 %v2025_v43, %v411_v48  ;;  %v427_v5 = vadd.f32 %v2019_v16, %v2441_v3 }
  0xe5   : > { %v418_v17 = vpop.f32.mrf.mxu1  ;;  %v627_v18 = vpop.f32.mrf.mxu0 }
  0xe6   : > { %v658_v53 = vadd.f32 %v627_v18, %v403_v46  ;;  %v419_v0 = vadd.f32 %v418_v17, %v318_v4 }
  0xe7   : > { %v2020_v19 = vpop.f32.mrf.mxu1  ;;  %v2026_v20 = vpop.f32.mrf.mxu0 }
  0xe8   : > { %v661_v55 = vadd.f32 %v2026_v20, %v414_v49  ;;  %v430_v8 = vadd.f32 %v2020_v19, %v2010_v6 }
  0xe9   : > { %v421_v21 = vpop.f32.mrf.mxu1  ;;  %v630_v22 = vpop.f32.mrf.mxu0 }
  0xea   : > { %v659_v59 = vadd.f32 %v630_v22, %v406_v52  ;;  %v422_v15 = vadd.f32 %v421_v21, %v2443_v7 }
  0xeb   : > { %v2035_v23 = vpop.f32.mrf.mxu1 }
  0xec   : > { %v779_v60 = vadd.f32 %v2035_v23, %v660_v38 }
  0xed   : > { %v746_v24 = vpop.f32.mrf.mxu1  ;;  %v2029_v25 = vpop.f32.mrf.mxu0 }
  0xee   : > { %v777_v57 = vadd.f32 %v746_v24, %v658_v53  ;;  %v664_v4 = vadd.f32 %v2029_v25, %v427_v5 }
  0xef   : > { %v2036_v26 = vpop.f32.mrf.mxu1  ;;  %v643_v28 = vpop.f32.mrf.mxu0 }
  0xf0   : > { %v780_v61 = vadd.f32 %v2036_v26, %v661_v55  ;;  %v662_v20 = vadd.f32 %v643_v28, %v419_v0 }
  0xf1   : > { %v749_v29 = vpop.f32.mrf.mxu1  ;;  %v2030_v30 = vpop.f32.mrf.mxu0 }
  0xf2   : > { %v778_v1 = vadd.f32 %v749_v29, %v659_v59  ;;  %v665_v17 = vadd.f32 %v2030_v30, %v430_v8 }
  0xf3   : > { %v2039_v31 = vpop.f32.mrf.mxu1  ;;  %v646_v32 = vpop.f32.mrf.mxu0 }
  0xf4   : > { %v663_v16 = vadd.f32 %v646_v32, %v422_v15  ;;  %v783_v19 = vadd.f32 %v2039_v31, %v664_v4 }
  0xf5   : > { %v762_v33 = vpop.f32.mrf.mxu1  ;;  %v2045_v34 = vpop.f32.mrf.mxu0 }
  0xf6   : > { %v898_v11 = vadd.f32 %v2045_v34, %v779_v60  ;;  %v781_v46 = vadd.f32 %v762_v33, %v662_v20 }
  0xf7   : > { %v2040_v35 = vpop.f32.mrf.mxu1  ;;  %v865_v36 = vpop.f32.mrf.mxu0 }
  0xf8   : > { %v896_v9 = vadd.f32 %v865_v36, %v777_v57  ;;  %v784_v34 = vadd.f32 %v2040_v35, %v665_v17 }
  0xf9   : > { %v2046_v37 = vpop.f32.mrf.mxu0  ;;  %v765_v39 = vpop.f32.mrf.mxu1 }
  0xfa   : > { %v899_v12 = vadd.f32 %v2046_v37, %v780_v61  ;;  %v782_v28 = vadd.f32 %v765_v39, %v663_v16 }
  0xfb   : > { %v868_v27 = vpop.f32.mrf.mxu0  ;;  %v2055_v41 = vpop.f32.mrf.mxu1 }
  0xfc   : > { %v897_v22 = vadd.f32 %v868_v27, %v778_v1  ;;  %v1128_v23 = vadd.f32 %v2055_v41, %v898_v11 }
  0xfd   : > { %v2445_v40 = vpop.f32.mrf.mxu0  ;;  %v1095_v44 = vpop.f32.mrf.mxu1 }
  0xfe   : > { %v1126_v43 = vadd.f32 %v1095_v44, %v896_v9  ;;  %v902_v33 = vadd.f32 %v2445_v40, %v783_v19 }
  0xff   : > { %v881_v42 = vpop.f32.mrf.mxu0  ;;  %v2056_v45 = vpop.f32.mrf.mxu1 }
 0x100   : > { %v1129_v24 = vadd.f32 %v2056_v45, %v899_v12  ;;  %v900_v45 = vadd.f32 %v881_v42, %v781_v46 }
 0x101   : > { %v2050_v14 = vpop.f32.mrf.mxu0  ;;  %v1098_v50 = vpop.f32.mrf.mxu1 }
 0x102   : > { %v1127_v3 = vadd.f32 %v1098_v50, %v897_v22  ;;  %v903_v50 = vadd.f32 %v2050_v14, %v784_v34 }
 0x103   : > { %v2447_v47 = vpop.f32.mrf.mxu0  ;;  %v2059_v56 = vpop.f32.mrf.mxu1 }
 0x104   : > { %v1132_v53 = vadd.f32 %v2059_v56, %v902_v33 }
 0x105   : > { %v2065_v51 = vpop.f32.mrf.mxu0  ;;  %v1111_v62 = vpop.f32.mrf.mxu1 }
 0x106   : > { %v1247_v7 = vadd.f32 %v2065_v51, %v1128_v23  ;;  %v1130_v31 = vadd.f32 %v1111_v62, %v900_v45  ;;  %v901_v51 = vadd.f32 %v2447_v47, %v782_v28 }
 0x107   : > { %v1214_v54 = vpop.f32.mrf.mxu0  ;;  %v2060_v2 = vpop.f32.mrf.mxu1 }
 0x108   : > { %v1245_v36 = vadd.f32 %v1214_v54, %v1126_v43  ;;  %v1133_v54 = vadd.f32 %v2060_v2, %v903_v50 }
 0x109   : > { %v2066_v58 = vpop.f32.mrf.mxu0  ;;  %v1114_v13 = vpop.f32.mrf.mxu1 }
 0x10a   : > { %v1248_v21 = vadd.f32 %v2066_v58, %v1129_v24  ;;  %v1131_v58 = vadd.f32 %v1114_v13, %v901_v51 }
 0x10b   : > { %v1217_v63 = vpop.f32.mrf.mxu0  ;;  %v2075_v26 = vpop.f32.mrf.mxu1 }
 0x10c   : > { %v1246_v48 = vadd.f32 %v1217_v63, %v1127_v3  ;;  %v1366_v25 = vadd.f32 %v2075_v26, %v1247_v7 }
 0x10d   : > { %v2069_v10 = vpop.f32.mrf.mxu0  ;;  %v1333_v6 = vpop.f32.mrf.mxu1 }
 0x10e   : > { %v1364_v41 = vadd.f32 %v1333_v6, %v1245_v36  ;;  %v1251_v56 = vadd.f32 %v2069_v10, %v1132_v53 }
 0x10f   : > { %v1230_v18 = vpop.f32.mrf.mxu0  ;;  %v2076_v44 = vpop.f32.mrf.mxu1 }
 0x110   : > { %v1367_v30 = vadd.f32 %v2076_v44, %v1248_v21  ;;  %v1249_v14 = vadd.f32 %v1230_v18, %v1130_v31 }
 0x111   : > { %v2070_v29 = vpop.f32.mrf.mxu0  ;;  %v1336_v49 = vpop.f32.mrf.mxu1 }
 0x112   : > { %v1365_v35 = vadd.f32 %v1336_v49, %v1246_v48  ;;  %v1252_v61 = vadd.f32 %v2070_v29, %v1133_v54 }
 0x113   : > { %v1233_v37 = vpop.f32.mrf.mxu0  ;;  %v2079_v52 = vpop.f32.mrf.mxu1 }
 0x114   : > { %v1250_v5 = vadd.f32 %v1233_v37, %v1131_v58  ;;  %v1370_v8 = vadd.f32 %v2079_v52, %v1251_v56 }
 0x115   : > { %v2085_v27 = vpop.f32.mrf.mxu0  ;;  %v1349_v57 = vpop.f32.mrf.mxu1 }
 0x116   : > { %v1596_v55 = vadd.f32 %v2085_v27, %v1366_v25  ;;  %v1368_v2 = vadd.f32 %v1349_v57, %v1249_v14 }
 0x117   : > { %v1563_v32 = vpop.f32.mrf.mxu0  ;;  %v2080_v47 = vpop.f32.mrf.mxu1 }
 0x118   : > { %v1594_v39 = vadd.f32 %v1563_v32, %v1364_v41  ;;  %v1634_v12 = vmul.f32 %v1596_v55, %v1596_v55  ;;  %v1371_v43 = vadd.f32 %v2080_v47, %v1252_v61 }
 0x119   : > { %v2086_v38 = vpop.f32.mrf.mxu0  ;;  %v1352_v11 = vpop.f32.mrf.mxu1 }
 0x11a   : > { %v1597_v42 = vadd.f32 %v2086_v38, %v1367_v30  ;;  %v1632_v62 = vmul.f32 %v1594_v39, %v1594_v39  ;;  %v1369_v24 = vadd.f32 %v1352_v11, %v1250_v5 }
 0x11b   : > { %v1566_v40 = vpop.f32.mrf.mxu0 }
 0x11c   : > { %v1941_v59 = vpack.c.bf16 %v1597_v42, %v1596_v55  ;;  %v1595_v60 = vadd.f32 %v1566_v40, %v1365_v35  ;;  %v1635_v18 = vmul.f32 %v1597_v42, %v1597_v42 }
 0x11d   : > { %v2089_v9 = vpop.f32.mrf.mxu0 }
 0x11e   : > { %1953 = vst [vmem:[%s2457_s18 + $0x8] sm:$0xff] %v1941_v59   ;;  %v1936_v63 = vpack.c.bf16 %v1595_v60, %v1594_v39  ;;  %v1618_v0 = vadd.f32 %v1595_v60, %v1594_v39  ;;  %v1633_v1 = vmul.f32 %v1595_v60, %v1595_v60  ;;  %v1600_v26 = vadd.f32 %v2089_v9, %v1370_v8 }
 0x11f   : > { %v1579_v20 = vpop.f32.mrf.mxu0 }
 0x120   : > { %1937 = vst [vmem:[%s2457_s18] sm:$0xff] %v1936_v63   ;;  %v1619_v13 = vadd.f32 %v1618_v0, %v1596_v55  ;;  %v1640_v15 = vadd.f32 %v1633_v1, %v1632_v62  ;;  %v1598_v22 = vadd.f32 %v1579_v20, %v1368_v2  ;;  %v1638_v21 = vmul.f32 %v1600_v26, %v1600_v26 }
 0x121   : > { %v2090_v4 = vpop.f32.mrf.mxu0 }
 0x122   : > { %v1641_v10 = vadd.f32 %v1640_v15, %v1634_v12  ;;  %v1620_v23 = vadd.f32 %v1619_v13, %v1597_v42  ;;  %v1636_v29 = vmul.f32 %v1598_v22, %v1598_v22  ;;  %v1601_v3 = vadd.f32 %v2090_v4, %v1371_v43 }
 0x123   : > { %v1582_v6 = vpop.f32.mrf.mxu0 }
 0x124   : > { %v1621_v17 = vadd.f32 %v1620_v23, %v1598_v22  ;;  %v1642_v46 = vadd.f32 %v1641_v10, %v1635_v18  ;;  %v1951_v19 = vpack.c.bf16 %v1601_v3, %v1600_v26  ;;  %v1599_v34 = vadd.f32 %v1582_v6, %v1369_v24 }
 0x125   : > { %v1639_v27 = vmul.f32 %v1601_v3, %v1601_v3 }
 0x126   : > { %v1643_v16 = vadd.f32 %v1642_v46, %v1636_v29  ;;  %1955 = vst [vmem:[%s2457_s18 + $0x18] sm:$0xff] %v1951_v19   ;;  %v1946_v36 = vpack.c.bf16 %v1599_v34, %v1598_v22  ;;  %v1622_v37 = vadd.f32 %v1621_v17, %v1599_v34  ;;  %v1637_v7 = vmul.f32 %v1599_v34, %v1599_v34 }
 0x128   : > { %1954 = vst [vmem:[%s2457_s18 + $0x10] sm:$0xff] %v1946_v36   ;;  %v1623_v44 = vadd.f32 %v1622_v37, %v1600_v26  ;;  %v1644_v28 = vadd.f32 %v1643_v16, %v1637_v7 }
 0x12a   : > { %v1624_v41 = vadd.f32 %v1623_v44, %v1601_v3  ;;  %v1645_v45 = vadd.f32 %v1644_v28, %v1638_v21 }
 0x12c   : > { %v1625_v48 = vrot.slane %v1624_v41, 4  ;;  %v1646_v25 = vadd.f32 %v1645_v45, %v1639_v27 }
 0x12e   : > { %v1626_v30 = vadd.f32 %v1625_v48, %v1624_v41  ;;  %v1647_v49 = vrot.slane %v1646_v25, 4 }
 0x130   : > { %v1627_v33 = vrot.slane %v1626_v30, 2  ;;  %v1648_v50 = vadd.f32 %v1647_v49, %v1646_v25 }
 0x132   : > { %v1628_v32 = vadd.f32 %v1627_v33, %v1626_v30  ;;  %v1649_v31 = vrot.slane %v1648_v50, 2 }
 0x134   : > { %v1629_v35 = vrot.slane %v1628_v32, 1  ;;  %v1650_v52 = vadd.f32 %v1649_v31, %v1648_v50 }
 0x136   : > { %v1630_v51 = vadd.f32 %v1629_v35, %v1628_v32  ;;  %v1651_v53 = vrot.slane %v1650_v52, 1 }
 0x138   : > { %1631 = vst [vmem:[%s208_s22] sm:$0x1] %v1630_v51  ;;  %v1652_v54 = vadd.f32 %v1651_v53, %v1650_v52 }
 0x13a   : > { %1653 = vst [vmem:[%s208_s22 + $0x1] sm:$0x1] %v1652_v54 }
 0x13b PF: > { %s14_s14 = sadd.s32 1, %s2174_s14   ;;  %s2482_s12 = smov %s2170_s13 }
 0x13c   : > { %p11_p5 = scmp.ge.s32.totalorder %s14_s14, 4   ;;  %s2483_s13 = smov %s2485_s15 }
 0x13e   :  { %13 = sbr.rel (!%p11_p5) target bundleno = 2 (0x2), region = 83 }

// kernel: preact_block.11
= control target key start
LH: loop header
LB: loop body
LE: loop exit
PB: predicated region body
PF: predicated region fallthrough
CT: control target
= control target key end

     0   :  { %s3181_s12 = smov 0   ;;  %s3183_s13 = smov 0   ;;  %s3769_s0 = inlined_call_operand.vmem [shape: bf16[2,10,10,128], index: 0, kind: input, shape index: {}]   ;;  %s3770_s1 = inlined_call_operand.vmem [shape: bf16[3,3,128,128], index: 1, kind: input, shape index: {}]   ;;  %s3771_s2 = inlined_call_operand.vmem [shape: bf16[2,8,8,128], index: 2, kind: input, shape index: {}]   ;;  %s3772_s3 = inlined_call_operand.vmem [shape: f32[2,8,8,128], index: 3, kind: output, shape index: {}]  }
   0x1   :  { %s3185_s14 = smov 0  }
   0x2 LB: > { %s25_s15 = sadd.s32 1, %s3155_s13  ;;  %p2335_p0 = scmp.ge.s32.totalorder %s3159_s14, 1  ;;  %s3159_s14 = sphi %s3185_s14, %s13_s14   ;;  %s3155_s13 = sphi %s3183_s13, %s3792_s13   ;;  %s3151_s12 = sphi %s3181_s12, %s3791_s12  }
   0x3   : > { %p27_p1 = scmp.ge.s32.totalorder %s25_s15, 2  ;;  %p168_p2 = scmp.lt.s32.totalorder %s3159_s14, 3 }
   0x5   : > { %s3794_s15 = smov (%p27_p1, %s25_s15), 0  ;;  %p169_p3 = pnand %p2335_p0, %p168_p2 }
   0x7   : > { %172 = sbr.rel (%p169_p3) target bundleno = 378 (0x17a), region = 32 }
   0xc   : > { %v3053_v0 = vld [vmem:[%s3770_s1 + $0x78] sm:$0xff]   ;;  %p205_p4 = scmp.lt.s32.totalorder %s3151_s12, 1  ;;  %v3055_v2 = vld [vmem:[%s3770_s1 + $0x70] sm:$0xff]   ;;  %v3057_v4 = vld [vmem:[%s3770_s1 + $0x68] sm:$0xff]   ;;  %vm263_vm0 = vsmask.f32 3328 }
   0xd   : > { %v3054_v1 = vld [vmem:[%s3770_s1 + $0x38] sm:$0xff]   ;;  %2796 = vmatprep.subr.bf16.mxu0 %v3053_v0  ;;  %v3056_v3 = vld [vmem:[%s3770_s1 + $0x30] sm:$0xff]   ;;  %v3058_v5 = vld [vmem:[%s3770_s1 + $0x28] sm:$0xff]   ;;  %vm264_vm1 = vsmask.f32 7440  ;;  %vm685_vm3 = vcmask 1042432  }
   0xe   : > { %2820 = vmatprep.subr.bf16.mxu1 %v3054_v1  ;;  %2797 = vmatpush3.bf16.msra.mxu0 %v3053_v0  ;;  %s3796_s12 = smov (!%p205_p4, %s3151_s12), 1  ;;  %v3059_v6 = vld [vmem:[%s3770_s1 + $0x60] sm:$0xff]   ;;  %v3061_v8 = vld [vmem:[%s3770_s1 + $0x58] sm:$0xff]   ;;  %v3063_v10 = vld [vmem:[%s3770_s1 + $0x50] sm:$0xff]   ;;  %vm686_vm4 = vcmask 1046532  }
   0xf   : > { %2821 = vmatpush3.bf16.msra.mxu1 %v3054_v1  ;;  %2798 = vmatprep.subr.bf16.mxu0 %v3055_v2  ;;  %v3060_v7 = vld [vmem:[%s3770_s1 + $0x20] sm:$0xff]   ;;  %s3028_s5 = smul.u32 80, %s3796_s12  ;;  %v3062_v9 = vld [vmem:[%s3770_s1 + $0x18] sm:$0xff]   ;;  %v3064_v14 = vld [vmem:[%s3770_s1 + $0x10] sm:$0xff]   ;;  %s2668_s7 = sshll.u32 %s3796_s12, 6 }
  0x10   : > { %2822 = vmatprep.subr.bf16.mxu1 %v3056_v3  ;;  %v3065_v17 = vld [vmem:[%s3770_s1 + $0x48] sm:$0xff]   ;;  %vm3278_vm2 = vmor %vm263_vm0, %vm264_vm1  ;;  %v3067_v46 = vld [vmem:[%s3770_s1 + $0x40] sm:$0xff]  }
  0x11   : > { %s3235_s16 = scalar_lea.vmem %s3769_s0, %s3028_s5  ;;  %v3066_v23 = vld [vmem:[%s3770_s1 + $0x8] sm:$0xff]   ;;  %v3068_v50 = vld [vmem:[%s3770_s1] sm:$0xff]   ;;  %v3071_v59 = vld [vmem:[%s3770_s1 + $0xb8] sm:$0xff]  }
  0x12   : > { %2799 = vmatpush3.bf16.msra.mxu0 %v3055_v2  ;;  %v231_v11 = vld [vmem:[%s3235_s16] sm:$0xf]  ;;  %v232_v12 = vld [vmem:[%s3235_s16 + $0x8] sm:$0xf]  ;;  %v3243_v13 = vld [vmem:[%s3235_s16 + $0x4] sm:$0x1] }
  0x13   : > { %2823 = vmatpush3.bf16.msra.mxu1 %v3056_v3  ;;  %2800 = vmatprep.subr.bf16.mxu0 %v3057_v4  ;;  %v3249_v15 = vld [vmem:[%s3235_s16 + $0xc] sm:$0x1]  ;;  %v2369_v16 = vcombine.low %v231_v11, %v232_v12  ;;  %v267_v18 = vshrl.u32 %v231_v11, 16  ;;  %v270_v19 = vshll.u32 %v231_v11, 16  ;;  %v276_v20 = vshll.u32 %v3243_v13, 16  ;;  %v3072_v62 = vld [vmem:[%s3770_s1 + $0xf8] sm:$0xff]   ;;  %vm3361_vm5 = vmor %vm685_vm3, %vm686_vm4 }
  0x14   : > { %2824 = vmatprep.subr.bf16.mxu1 %v3058_v5  ;;  %v281_v21 = vshrl.u32 %v232_v12, 16  ;;  %v3256_v22 = vld [vmem:[%s3235_s16 + $0x10] sm:$0xf]  ;;  %v284_v24 = vshll.u32 %v232_v12, 16  ;;  %v290_v25 = vshll.u32 %v3249_v15, 16  ;;  %v3076_v11 = vld [vmem:[%s3770_s1 + $0xe8] sm:$0xff]  }
  0x15   : > { %2836 = vmatprep.mubr.bf16.mxu1 %v2369_v16  ;;  %v3263_v26 = vld [vmem:[%s3235_s16 + $0x18] sm:$0xf]  ;;  %v269_v27 = vrot.slane %v267_v18, 4  ;;  %v272_v28 = vrot.slane %v270_v19, 5  ;;  %v278_v29 = vrot.slane %v276_v20, 5  ;;  %v295_v35 = vshrl.u32 %v3256_v22, 16 }
  0x16   : > { %2801 = vmatpush3.bf16.msra.mxu0 %v3057_v4  ;;  %v283_v30 = vrot.slane %v281_v21, 4  ;;  %v3266_v31 = vld [vmem:[%s3235_s16 + $0x14] sm:$0x1]  ;;  %v286_v32 = vrot.slane %v284_v24, 5  ;;  %v292_v33 = vrot.slane %v290_v25, 5  ;;  %v298_v36 = vshll.u32 %v3256_v22, 16 }
  0x17   : > { %2825 = vmatpush3.bf16.msra.mxu1 %v3058_v5  ;;  %2802 = vmatprep.subr.bf16.mxu0 %v3059_v6  ;;  %v3269_v34 = vld [vmem:[%s3235_s16 + $0x1c] sm:$0x1]  ;;  %v273_v37 = vor.u32 %v272_v28, %v269_v27  ;;  %v304_v38 = vshll.u32 %v3266_v31, 16  ;;  %v309_v39 = vshrl.u32 %v3263_v26, 16  ;;  %v312_v40 = vshll.u32 %v3263_v26, 16  ;;  %v3073_v3 = vld [vmem:[%s3770_s1 + $0xb0] sm:$0xff]  }
  0x18   : > { %2826 = vmatprep.subr.bf16.mxu1 %v3060_v7  ;;  %v287_v42 = vor.u32 %v286_v32, %v283_v30  ;;  %v297_v43 = vrot.slane %v295_v35, 4  ;;  %v300_v44 = vrot.slane %v298_v36, 5  ;;  %v318_v45 = vshll.u32 %v3269_v34, 16  ;;  %v3074_v5 = vld [vmem:[%s3770_s1 + $0xf0] sm:$0xff]   ;;  %v3334_v28 = vld [vmem:[%s3235_s16 + $0x3c] sm:$0x1] }
  0x19   : > { %v274_v47 = vrot.slane %v273_v37, 4  ;;  %v311_v48 = vrot.slane %v309_v39, 4  ;;  %v314_v49 = vrot.slane %v312_v40, 5  ;;  %v306_v53 = vrot.slane %v304_v38, 5  ;;  %v237_v18 = vld [vmem:[%s3235_s16 + $0x30] sm:$0xf] }
  0x1a   : > { %2803 = vmatpush3.bf16.msra.mxu0 %v3059_v6  ;;  %v288_v51 = vrot.slane %v287_v42, 4  ;;  %v301_v52 = vor.u32 %v300_v44, %v297_v43  ;;  %v320_v56 = vrot.slane %v318_v45, 5  ;;  %v2370_v2 = vcombine.low %v3256_v22, %v3263_v26  ;;  %v235_v6 = vld [vmem:[%s3235_s16 + $0x20] sm:$0xf]  ;;  %v238_v22 = vld [vmem:[%s3235_s16 + $0x38] sm:$0xf] }
  0x1b   : > { %2827 = vmatpush3.bf16.msra.mxu1 %v3060_v7  ;;  %2804 = vmatprep.subr.bf16.mxu0 %v3061_v8  ;;  %v279_v54 = vsel %vm3278_vm2, %v274_v47, %v278_v29  ;;  %v315_v55 = vor.u32 %v314_v49, %v311_v48  ;;  %v690_v4 = vrot.slane %v3243_v13, 5  ;;  %v3075_v7 = vld [vmem:[%s3770_s1 + $0xa8] sm:$0xff]   ;;  %v323_v12 = vshrl.u32 %v235_v6, 16  ;;  %v3077_v39 = vld [vmem:[%s3770_s1 + $0xa0] sm:$0xff]   ;;  %v664_v13 = vld [vmem:[%s3235_s16 + $0x18] sm:$0xe] }
  0x1c   : > { %2828 = vmatprep.subr.bf16.mxu1 %v3062_v9  ;;  %v293_v57 = vsel %vm3278_vm2, %v288_v51, %v292_v33  ;;  %v302_v58 = vrot.slane %v301_v52, 4  ;;  %v351_v32 = vshrl.u32 %v237_v18, 16  ;;  %v354_v33 = vshll.u32 %v237_v18, 16  ;;  %v3078_v45 = vld [vmem:[%s3770_s1 + $0xe0] sm:$0xff]  }
  0x1d   : > { %v2357_v60 = vcombine.low %v279_v54, %v293_v57  ;;  %v316_v61 = vrot.slane %v315_v55, 4  ;;  %v325_v24 = vrot.slane %v323_v12, 4  ;;  %v365_v37 = vshrl.u32 %v238_v22, 16  ;;  %v3079_v57 = vld [vmem:[%s3770_s1 + $0x98] sm:$0xff]  }
  0x1e   : > { %2805 = vmatpush3.bf16.msra.mxu0 %v3061_v8  ;;  %v307_v63 = vsel %vm3278_vm2, %v302_v58, %v306_v53  ;;  %v236_v8 = vld [vmem:[%s3235_s16 + $0x28] sm:$0xf]  ;;  %v368_v38 = vshll.u32 %v238_v22, 16  ;;  %v353_v42 = vrot.slane %v351_v32, 4  ;;  %v356_v43 = vrot.slane %v354_v33, 5 }
  0x1f   : > { %2829 = vmatpush3.bf16.msra.mxu1 %v3062_v9  ;;  %2806 = vmatprep.subr.bf16.mxu0 %v3063_v10  ;;  %v321_v0 = vsel %vm3278_vm2, %v316_v61, %v320_v56  ;;  %v3318_v9 = vld [vmem:[%s3235_s16 + $0x24] sm:$0x1]  ;;  %v340_v19 = vshll.u32 %v236_v8, 16  ;;  %v2371_v21 = vcombine.low %v235_v6, %v236_v8  ;;  %v374_v44 = vshll.u32 %v3334_v28, 16 }
  0x20   : > { %2830 = vmatprep.subr.bf16.mxu1 %v3064_v14  ;;  %2812 = vmatprep.mubr.bf16.mxu0 %v2357_v60  ;;  %v2358_v1 = vcombine.low %v307_v63, %v321_v0  ;;  %v332_v16 = vshll.u32 %v3318_v9, 16  ;;  %v367_v47 = vrot.slane %v365_v37, 4  ;;  %v370_v48 = vrot.slane %v368_v38, 5  ;;  %v661_v63 = vld [vmem:[%s3235_s16] sm:$0xe] }
  0x21   : > { %v342_v29 = vrot.slane %v340_v19, 5  ;;  %v2372_v52 = vcombine.low %v237_v18, %v238_v22  ;;  %v694_v53 = vrot.slane %v3249_v15, 5  ;;  %v376_v56 = vrot.slane %v374_v44, 5  ;;  %v3080_v15 = vld [vmem:[%s3770_s1 + $0xd8] sm:$0xff]   ;;  %v662_v0 = vld [vmem:[%s3235_s16 + $0x8] sm:$0xe] }
  0x22   : > { %2807 = vmatpush3.bf16.msra.mxu0 %v3063_v10  ;;  %v3321_v10 = vld [vmem:[%s3235_s16 + $0x2c] sm:$0x1]  ;;  %v334_v26 = vrot.slane %v332_v16, 5  ;;  %v371_v55 = vor.u32 %v370_v48, %v367_v47  ;;  %v663_v18 = vld [vmem:[%s3235_s16 + $0x10] sm:$0xe]  ;;  %v698_v19 = vrot.slane %v3266_v31, 5 }
  0x23   : > { %2831 = vmatpush3.bf16.msra.mxu1 %v3064_v14  ;;  %2808 = vmatprep.subr.bf16.mxu0 %v3065_v17  ;;  %v326_v14 = vshll.u32 %v235_v6, 16  ;;  %v346_v20 = vshll.u32 %v3321_v10, 16  ;;  %v3085_v16 = vld [vmem:[%s3770_s1 + $0x88] sm:$0xff]   ;;  %v2384_v22 = vrot.slane %v664_v13, 9  ;;  %v3088_v31 = vld [vmem:[%s3770_s1 + $0xc0] sm:$0xff]  }
  0x24   : > { %2832 = vmatprep.subr.bf16.mxu1 %v3066_v23  ;;  %v372_v61 = vrot.slane %v371_v55, 4  ;;  %v3090_v37 = vld [vmem:[%s3235_s16 + $0x18] ss:$8 sps:$4 sm:$0xff]   ;;  %v3097_v48 = vld [vmem:[%s3235_s16 + $0x28] ss:$8 sps:$4 sm:$0xff]  }
  0x25   : > { %v328_v25 = vrot.slane %v326_v14, 5  ;;  %v348_v30 = vrot.slane %v346_v20, 5  ;;  %v702_v20 = vrot.slane %v3269_v34, 5  ;;  %v710_v34 = vrot.slane %v3321_v10, 5  ;;  %v3092_v10 = vld [vmem:[%s3770_s1 + $0x178] sm:$0xff]  }
  0x26   : > { %2809 = vmatpush3.bf16.msra.mxu0 %v3065_v17  ;;  %v337_v17 = vshrl.u32 %v236_v8, 16  ;;  %v3089_v8 = vld [vmem:[%s3235_s16 + $0x8] ss:$8 sps:$4 sm:$0xff]  }
  0x27   : > { %2833 = vmatpush3.bf16.msra.mxu1 %v3066_v23  ;;  %2810 = vmatprep.subr.bf16.mxu0 %v3067_v46  ;;  %v3331_v23 = vld [vmem:[%s3235_s16 + $0x34] sm:$0x1]  ;;  %v329_v35 = vor.u32 %v328_v25, %v325_v24  ;;  %v665_v24 = vld [vmem:[%s3235_s16 + $0x20] sm:$0xe]  ;;  %v666_v25 = vld [vmem:[%s3235_s16 + $0x28] sm:$0xe] }
  0x28   : > { %2834 = vmatprep.subr.bf16.mxu1 %v3068_v50  ;;  %v339_v27 = vrot.slane %v337_v17, 4  ;;  %v360_v36 = vshll.u32 %v3331_v23, 16  ;;  %v2386_v32 = vrot.slane %v666_v25, 9  ;;  %v714_v38 = vrot.slane %v3331_v23, 5  ;;  %v3094_v23 = vld [vmem:[%s3770_s1 + $0x170] sm:$0xff]  }
  0x29   : > { %v2453_v55 = vld [vmem:[%s3235_s16 + $0x8] sm:$0xf]  ;;  %v2460_v25 = vld [vmem:[%s3235_s16 + $0x24] sm:$0x1] }
  0x2a   : > { %2811 = vmatpush3.bf16.msra.mxu0 %v3067_v46  ;;  %v343_v40 = vor.u32 %v342_v29, %v339_v27  ;;  %v330_v46 = vrot.slane %v329_v35, 4  ;;  %v362_v51 = vrot.slane %v360_v36, 5  ;;  %v706_v27 = vrot.slane %v3318_v9, 5  ;;  %v3091_v29 = vld [vmem:[%s3770_s1 + $0x138] sm:$0xff]   ;;  %v667_v35 = vld [vmem:[%s3235_s16 + $0x30] sm:$0xe] }
  0x2b   : > { %2835 = vmatpush3.bf16.msra.mxu1 %v3068_v50  ;;  %2844 = vmatprep.subr.bf16.mxu0 %v3071_v59  ;;  %v357_v50 = vor.u32 %v356_v43, %v353_v42  ;;  %v703_v9 = vsel %vm3361_vm5, %v2384_v22, %v702_v20  ;;  %v668_v36 = vld [vmem:[%s3235_s16 + $0x38] sm:$0xe]  ;;  %v711_v42 = vsel %vm3361_vm5, %v2386_v32, %v710_v34  ;;  %v718_v43 = vrot.slane %v3334_v28, 5  ;;  %v2458_v20 = vld [vmem:[%s3235_s16 + $0x1c] sm:$0x1] }
  0x2c   : > { %2868 = vmatprep.subr.bf16.mxu1 %v3072_v62  ;;  %v344_v49 = vrot.slane %v343_v40, 4  ;;  %v335_v54 = vsel %vm3278_vm2, %v330_v46, %v334_v26  ;;  %v3087_v26 = vld [vmem:[%s3770_s1 + $0x80] sm:$0xff]   ;;  %v2387_v44 = vrot.slane %v667_v35, 9  ;;  %v3093_v46 = vld [vmem:[%s3770_s1 + $0x130] sm:$0xff]   ;;  %v3101_v22 = vld [vmem:[%s3770_s1 + $0x118] sm:$0xff]  }
  0x2d   : > { %2813 = vmatmul.mubr.bf16.vlgmr.msra.gmra.mxu0 %v2358_v1  ;;  %v3102_v34 = vld [vmem:[%s3770_s1 + $0x158] sm:$0xff]   ;;  %v3103_v35 = vld [vmem:[%s3770_s1 + $0x110] sm:$0xff]  }
  0x2e   : > { %2837 = vmatmul.mubr.bf16.vlgmr.msra.gmra.mxu1 %v2370_v2  ;;  %2845 = vmatpush3.bf16.msra.mxu0 %v3071_v59  ;;  %v349_v58 = vsel %vm3278_vm2, %v344_v49, %v348_v30  ;;  %v358_v59 = vrot.slane %v357_v50, 4  ;;  %v377_v2 = vsel %vm3278_vm2, %v372_v61, %v376_v56  ;;  %v2385_v30 = vrot.slane %v665_v24, 9  ;;  %v3095_v50 = vld [vmem:[%s3770_s1 + $0x128] sm:$0xff]  }
  0x2f   : > { %2869 = vmatpush3.bf16.msra.mxu1 %v3072_v62  ;;  %2846 = vmatprep.subr.bf16.mxu0 %v3073_v3  ;;  %v2359_v60 = vcombine.low %v335_v54, %v349_v58  ;;  %v715_v28 = vsel %vm3361_vm5, %v2387_v44, %v714_v38  ;;  %v3099_v54 = vld [vmem:[%s3770_s1 + $0x120] sm:$0xff]   ;;  %v2454_v56 = vld [vmem:[%s3235_s16 + $0xc] sm:$0x1]  ;;  %v2455_v58 = vld [vmem:[%s3235_s16 + $0x10] sm:$0xf] }
  0x30   : > { %2870 = vmatprep.subr.bf16.mxu1 %v3074_v5  ;;  %2840 = vmatprep.mubr.bf16.mxu1 %v2371_v21  ;;  %v363_v62 = vsel %vm3278_vm2, %v358_v59, %v362_v51  ;;  %v2383_v21 = vrot.slane %v663_v18, 9  ;;  %v707_v40 = vsel %vm3361_vm5, %v2385_v30, %v706_v27  ;;  %v3096_v51 = vld [vmem:[%s3770_s1 + $0x168] sm:$0xff]   ;;  %v2456_v59 = vld [vmem:[%s3235_s16 + $0x14] sm:$0x1]  ;;  %v1071_v61 = vshll.u32 %v2454_v56, 16 }
  0x31   : > { %2816 = vmatprep.mubr.bf16.mxu0 %v2359_v60  ;;  %v2360_v6 = vcombine.low %v363_v62, %v377_v2  ;;  %v2407_v47 = vcombine.low %v707_v40, %v711_v42  ;;  %v1065_v60 = vshll.u32 %v2453_v55, 16  ;;  %v1076_v62 = vshrl.u32 %v2455_v58, 16  ;;  %v2497_v2 = vld [vmem:[%s3235_s16 + $0x8] sm:$0xe]  ;;  %v3104_v40 = vld [vmem:[%s3770_s1 + $0x150] sm:$0xff]  }
  0x32   : > { %2847 = vmatpush3.bf16.msra.mxu0 %v3073_v3  ;;  %v2381_v3 = vrot.slane %v661_v63, 9  ;;  %v699_v33 = vsel %vm3361_vm5, %v2383_v21, %v698_v19  ;;  %v1079_v63 = vshll.u32 %v2455_v58, 16  ;;  %v1357_v19 = vrot.slane %v2456_v59, 5  ;;  %v2459_v21 = vld [vmem:[%s3235_s16 + $0x20] sm:$0xf] }
  0x33   : > { %2871 = vmatpush3.bf16.msra.mxu1 %v3074_v5  ;;  %2848 = vmatprep.subr.bf16.mxu0 %v3075_v7  ;;  %v2382_v5 = vrot.slane %v662_v0, 9  ;;  %v1085_v0 = vshll.u32 %v2456_v59, 16  ;;  %v1104_v32 = vshrl.u32 %v2459_v21, 16  ;;  %v2461_v59 = vld [vmem:[%s3235_s16 + $0x28] sm:$0xf] }
  0x34   : > { %2872 = vmatprep.subr.bf16.mxu1 %v3076_v11  ;;  %v691_v12 = vsel %vm3361_vm5, %v2381_v3, %v690_v4  ;;  %v3086_v4 = vld [vmem:[%s3770_s1 + $0xc8] sm:$0xff]  }
  0x35   : > { %v695_v14 = vsel %vm3361_vm5, %v2382_v5, %v694_v53  ;;  %2817 = vmatmul.mubr.bf16.gmra.mxu0 %v2360_v6  ;;  %v1067_v5 = vrot.slane %v1065_v60, 5  ;;  %v2498_v6 = vld [vmem:[%s3235_s16 + $0x10] sm:$0xe]  ;;  %v1106_v44 = vrot.slane %v1104_v32, 4 }
  0x36   : > { %2849 = vmatpush3.bf16.msra.mxu0 %v3075_v7  ;;  %2841 = vmatmul.mubr.bf16.gmra.mxu1 %v2372_v52  ;;  %v3083_v7 = vld [vmem:[%s3770_s1 + $0x90] sm:$0xff]   ;;  %v2405_v17 = vcombine.low %v691_v12, %v695_v14  ;;  %v3098_v52 = vld [vmem:[%s3235_s16 + $0x38] ss:$8 sps:$4 sm:$0xff]   ;;  %v1078_v12 = vrot.slane %v1076_v62, 4  ;;  %v1081_v14 = vrot.slane %v1079_v63, 5 }
  0x37   : > { %2873 = vmatpush3.bf16.msra.mxu1 %v3076_v11  ;;  %2850 = vmatprep.subr.bf16.mxu0 %v3077_v39  ;;  %v3084_v11 = vld [vmem:[%s3770_s1 + $0xd0] sm:$0xff]  }
  0x38   : > { %2874 = vmatprep.subr.bf16.mxu1 %v3078_v45  ;;  %2884 = vmatprep.mubr.bf16.mxu1 %v3089_v8  ;;  %v1353_v8 = vrot.slane %v2454_v56, 5  ;;  %v1082_v24 = vor.u32 %v1081_v14, %v1078_v12  ;;  %v3106_v56 = vld [vmem:[%s3770_s1 + $0x148] sm:$0xff]   ;;  %v2463_v60 = vld [vmem:[%s3235_s16 + $0x30] sm:$0xf]  ;;  %v3505_v63 = vld [vmem:[%s3235_s16 + $0x34] sm:$0x1] }
  0x39   : > { %2860 = vmatprep.mubr.bf16.mxu0 %v2405_v17  ;;  %v2457_v17 = vld [vmem:[%s3235_s16 + $0x18] sm:$0xf]  ;;  %v3516_v12 = vld [vmem:[%s3235_s16 + $0x3c] sm:$0x1] }
  0x3a   : > { %2851 = vmatpush3.bf16.msra.mxu0 %v3077_v39  ;;  %v2406_v39 = vcombine.low %v699_v33, %v703_v9  ;;  %v1093_v27 = vshll.u32 %v2457_v17, 16  ;;  %v1107_v33 = vshll.u32 %v2459_v21, 16  ;;  %v2499_v9 = vld [vmem:[%s3235_s16 + $0x18] sm:$0xe]  ;;  %v3521_v21 = vld [vmem:[%s3235_s16 + $0x44] sm:$0x1] }
  0x3b   : > { %2875 = vmatpush3.bf16.msra.mxu1 %v3078_v45  ;;  %2852 = vmatprep.subr.bf16.mxu0 %v3079_v57  ;;  %v2388_v45 = vrot.slane %v668_v36, 9  ;;  %v1083_v36 = vrot.slane %v1082_v24, 4  ;;  %v3108_v24 = vld [vmem:[%s3770_s1 + $0x140] sm:$0xff]  }
  0x3c   : > { %2876 = vmatprep.subr.bf16.mxu1 %v3080_v15  ;;  %v1095_v38 = vrot.slane %v1093_v27, 5 }
  0x3d   : > { %v719_v49 = vsel %vm3361_vm5, %v2388_v45, %v718_v43  ;;  %v1109_v45 = vrot.slane %v1107_v33, 5 }
  0x3e   : > { %2853 = vmatpush3.bf16.msra.mxu0 %v3079_v57  ;;  %v2408_v53 = vcombine.low %v715_v28, %v719_v49  ;;  %v3100_v57 = vld [vmem:[%s3770_s1 + $0x160] sm:$0xff]  }
  0x3f   : > { %2877 = vmatpush3.bf16.msra.mxu1 %v3080_v15  ;;  %2854 = vmatprep.subr.bf16.mxu0 %v3083_v7  ;;  %v1062_v15 = vshrl.u32 %v2453_v55, 16  ;;  %v1110_v49 = vor.u32 %v1109_v45, %v1106_v44  ;;  %v1365_v55 = vrot.slane %v2460_v25, 5 }
  0x40   : > { %2878 = vmatprep.subr.bf16.mxu1 %v3084_v11 }
  0x41   : > { %v1064_v3 = vrot.slane %v1062_v15, 4  ;;  %v3493_v15 = vld [vmem:[%s3235_s16 + $0x2c] sm:$0x1] }
  0x42   : > { %2855 = vmatpush3.bf16.msra.mxu0 %v3083_v7  ;;  %v2505_v7 = vrot.slane %v2497_v2, 9  ;;  %v1121_v2 = vshll.u32 %v2461_v59, 16 }
  0x43   : > { %2879 = vmatpush3.bf16.msra.mxu1 %v3084_v11  ;;  %2856 = vmatprep.subr.bf16.mxu0 %v3085_v16  ;;  %v1073_v11 = vrot.slane %v1071_v61, 5  ;;  %v1068_v18 = vor.u32 %v1067_v5, %v1064_v3  ;;  %v2465_v3 = vld [vmem:[%s3235_s16 + $0x38] sm:$0xf]  ;;  %v3107_v5 = vld [vmem:[%s3770_s1 + $0x100] sm:$0xff]  }
  0x44   : > { %2880 = vmatprep.subr.bf16.mxu1 %v3086_v4  ;;  %v1354_v13 = vsel %vm3361_vm5, %v2505_v7, %v1353_v8  ;;  %v1127_v7 = vshll.u32 %v3493_v15, 16  ;;  %v1132_v8 = vshrl.u32 %v2463_v60, 16 }
  0x46   : > { %2857 = vmatpush3.bf16.msra.mxu0 %v3085_v16  ;;  %v1087_v16 = vrot.slane %v1085_v0, 5  ;;  %v1118_v0 = vshrl.u32 %v2461_v59, 16 }
  0x47   : > { %2881 = vmatpush3.bf16.msra.mxu1 %v3086_v4  ;;  %2858 = vmatprep.subr.bf16.mxu0 %v3087_v26  ;;  %v2506_v4 = vrot.slane %v2498_v6, 9 }
  0x48   : > { %2882 = vmatprep.subr.bf16.mxu1 %v3088_v31  ;;  %v1120_v14 = vrot.slane %v1118_v0, 4  ;;  %v3113_v0 = vld [vmem:[%s3770_s1 + $0x1a8] sm:$0xff]  }
  0x49   : > { %v1358_v30 = vsel %vm3361_vm5, %v2506_v4, %v1357_v19  ;;  %v1129_v4 = vrot.slane %v1127_v7, 5  ;;  %v1134_v19 = vrot.slane %v1132_v8, 4  ;;  %v3114_v8 = vld [vmem:[%s3770_s1 + $0x1e8] sm:$0xff]  }
  0x4a   : > { %2859 = vmatpush3.bf16.msra.mxu0 %v3087_v26  ;;  %v1090_v26 = vshrl.u32 %v2457_v17, 16  ;;  %v1141_v17 = vshll.u32 %v3505_v63, 16 }
  0x4b   : > { %2883 = vmatpush3.bf16.msra.mxu1 %v3088_v31  ;;  %2892 = vmatprep.subr.bf16.mxu0 %v3091_v29  ;;  %v1099_v31 = vshll.u32 %v2458_v20, 16 }
  0x4c   : > { %2916 = vmatprep.subr.bf16.mxu1 %v3092_v10 }
  0x4d   : > { %2861 = vmatmul.mubr.bf16.vlgmr.msra.gmra.mxu0 %v2406_v39  ;;  %v2500_v39 = vld [vmem:[%s3235_s16 + $0x20] sm:$0xe]  ;;  %v3473_v43 = vrot.slane %v1099_v31, 5  ;;  %v1155_v31 = vshll.u32 %v3516_v12, 16 }
  0x4e   : > { %2885 = vmatmul.mubr.bf16.vlgmr.msra.gmra.mxu1 %v3090_v37  ;;  %2893 = vmatpush3.bf16.msra.mxu0 %v3091_v29  ;;  %v1069_v29 = vrot.slane %v1068_v18, 4  ;;  %v2529_v37 = vcombine.low %v1354_v13, %v1358_v30  ;;  %v2467_v18 = vld [vmem:[%s3235_s16 + $0x40] sm:$0xf]  ;;  %v1146_v13 = vshrl.u32 %v2465_v3, 16 }
  0x4f   : > { %2917 = vmatpush3.bf16.msra.mxu1 %v3092_v10  ;;  %2894 = vmatprep.subr.bf16.mxu0 %v3093_v46  ;;  %v1092_v10 = vrot.slane %v1090_v26, 4  ;;  %v1143_v26 = vrot.slane %v1141_v17, 5  ;;  %v1160_v30 = vshrl.u32 %v2467_v18, 16  ;;  %v1163_v32 = vshll.u32 %v2467_v18, 16  ;;  %v3125_v17 = vld [vmem:[%s3235_s16 + $0x10] ss:$8 sps:$4 sm:$0xff]  }
  0x50   : > { %2918 = vmatprep.subr.bf16.mxu1 %v3094_v23  ;;  %2864 = vmatprep.mubr.bf16.mxu0 %v2407_v47  ;;  %v1074_v42 = vsel %vm3278_vm2, %v1069_v29, %v1073_v11  ;;  %v1113_v47 = vshll.u32 %v2460_v25, 16  ;;  %v1135_v11 = vshll.u32 %v2463_v60, 16  ;;  %v1148_v27 = vrot.slane %v1146_v13, 4  ;;  %v3112_v60 = vld [vmem:[%s3770_s1 + $0x1f0] sm:$0xff]  }
  0x51   : > { %2888 = vmatprep.mubr.bf16.mxu1 %v3097_v48  ;;  %v2507_v48 = vrot.slane %v2499_v9, 9  ;;  %v3109_v9 = vld [vmem:[%s3770_s1 + $0x1b8] sm:$0xff]   ;;  %v1157_v45 = vrot.slane %v1155_v31, 5  ;;  %v2577_v18 = vld [vmem:[%s3235_s16 + $0x10] sm:$0xf] }
  0x52   : > { %2895 = vmatpush3.bf16.msra.mxu0 %v3093_v46  ;;  %v1088_v46 = vsel %vm3278_vm2, %v1083_v36, %v1087_v16  ;;  %v1123_v16 = vrot.slane %v1121_v2, 5  ;;  %v1169_v36 = vshll.u32 %v3521_v21, 16  ;;  %v3581_v13 = vld [vmem:[%s3235_s16 + $0x14] sm:$0x1] }
  0x53   : > { %2919 = vmatpush3.bf16.msra.mxu1 %v3094_v23  ;;  %2896 = vmatprep.subr.bf16.mxu0 %v3095_v50  ;;  %v1096_v23 = vor.u32 %v1095_v38, %v1092_v10  ;;  %v2485_v28 = vcombine.low %v1074_v42, %v1088_v46  ;;  %v3110_v10 = vld [vmem:[%s3770_s1 + $0x1f8] sm:$0xff]   ;;  %v1165_v42 = vrot.slane %v1163_v32, 5  ;;  %v2501_v46 = vld [vmem:[%s3235_s16 + $0x28] sm:$0xe] }
  0x54   : > { %2920 = vmatprep.subr.bf16.mxu1 %v3096_v51  ;;  %v1124_v25 = vor.u32 %v1123_v16, %v1120_v14  ;;  %v3115_v14 = vld [vmem:[%s3770_s1 + $0x1a0] sm:$0xff]  }
  0x55   : > { %2865 = vmatmul.mubr.bf16.gmra.mxu0 %v2408_v53  ;;  %v3480_v53 = vrot.slane %v1096_v23, 4  ;;  %v2502_v23 = vld [vmem:[%s3235_s16 + $0x30] sm:$0xe]  ;;  %v3116_v16 = vld [vmem:[%s3770_s1 + $0x1e0] sm:$0xff]  }
  0x56   : > { %2897 = vmatpush3.bf16.msra.mxu0 %v3095_v50  ;;  %2889 = vmatmul.mubr.bf16.gmra.mxu1 %v3098_v52  ;;  %v1361_v50 = vrot.slane %v2458_v20, 5  ;;  %v3105_v52 = vld [vmem:[%s3770_s1 + $0x108] sm:$0xff]   ;;  %v1137_v20 = vrot.slane %v1135_v11, 5 }
  0x57   : > { %2921 = vmatpush3.bf16.msra.mxu1 %v3096_v51  ;;  %2898 = vmatprep.subr.bf16.mxu0 %v3099_v54  ;;  %v2508_v51 = vrot.slane %v2500_v39, 9  ;;  %v1102_v61 = vsel %vm3278_vm2, %v3480_v53, %v3473_v43  ;;  %v2504_v53 = vld [vmem:[%s3235_s16 + $0x40] sm:$0xe] }
  0x58   : > { %2922 = vmatprep.subr.bf16.mxu1 %v3100_v57  ;;  %2932 = vmatprep.mubr.bf16.mxu1 %v2529_v37  ;;  %v3489_v58 = vsel %vm3361_vm5, %v2507_v48, %v1361_v50  ;;  %v1369_v37 = vrot.slane %v3493_v15, 5  ;;  %v3111_v48 = vld [vmem:[%s3770_s1 + $0x1b0] sm:$0xff]   ;;  %v1171_v50 = vrot.slane %v1169_v36, 5  ;;  %v2512_v15 = vrot.slane %v2504_v53, 9 }
  0x59   : > { %2908 = vmatprep.mubr.bf16.mxu0 %v2485_v28  ;;  %v3502_v62 = vsel %vm3361_vm5, %v2508_v51, %v1365_v55  ;;  %v2509_v51 = vrot.slane %v2501_v46, 9  ;;  %v2510_v55 = vrot.slane %v2502_v23, 9 }
  0x5a   : > { %2899 = vmatpush3.bf16.msra.mxu0 %v3099_v54  ;;  %v3482_v54 = vrot.slane %v1113_v47, 5  ;;  %v2530_v33 = vcombine.low %v3489_v58, %v3502_v62  ;;  %v1373_v47 = vrot.slane %v3505_v63, 5  ;;  %v1381_v63 = vrot.slane %v3521_v21, 5 }
  0x5b   : > { %2923 = vmatpush3.bf16.msra.mxu1 %v3100_v57  ;;  %2900 = vmatprep.subr.bf16.mxu0 %v3101_v22  ;;  %v1111_v57 = vrot.slane %v1110_v49, 4  ;;  %v1370_v59 = vsel %vm3361_vm5, %v2509_v51, %v1369_v37  ;;  %v1728_v21 = vshll.u32 %v2577_v18, 16  ;;  %v3600_v37 = vld [vmem:[%s3235_s16 + $0x24] sm:$0x1] }
  0x5c   : > { %2924 = vmatprep.subr.bf16.mxu1 %v3102_v34  ;;  %v1374_v62 = vsel %vm3361_vm5, %v2510_v55, %v1373_v47  ;;  %v1382_v7 = vsel %vm3361_vm5, %v2512_v15, %v1381_v63  ;;  %v1762_v46 = vshll.u32 %v3600_v37, 16  ;;  %v2585_v63 = vld [vmem:[%s3235_s16 + $0x30] sm:$0xf] }
  0x5d   : > { %v1116_v6 = vsel %vm3278_vm2, %v1111_v57, %v3482_v54  ;;  %v1377_v57 = vrot.slane %v3516_v12, 5  ;;  %v2531_v2 = vcombine.low %v1370_v59, %v1374_v62 }
  0x5e   : > { %2901 = vmatpush3.bf16.msra.mxu0 %v3101_v22  ;;  %v1149_v22 = vshll.u32 %v2465_v3, 16  ;;  %v2486_v43 = vcombine.low %v1102_v61, %v1116_v6  ;;  %v1764_v59 = vrot.slane %v1762_v46, 5  ;;  %v3128_v46 = vld [vmem:[%s3770_s1 + $0x230] sm:$0xff]  }
  0x5f   : > { %2925 = vmatpush3.bf16.msra.mxu1 %v3102_v34  ;;  %2902 = vmatprep.subr.bf16.mxu0 %v3103_v35  ;;  %v1138_v34 = vor.u32 %v1137_v20, %v1134_v19  ;;  %v3585_v19 = vld [vmem:[%s3235_s16 + $0x1c] sm:$0x1]  ;;  %v1725_v20 = vshrl.u32 %v2577_v18, 16 }
  0x60   : > { %2926 = vmatprep.subr.bf16.mxu1 %v3104_v40  ;;  %v1151_v29 = vrot.slane %v1149_v22, 5  ;;  %v1734_v22 = vshll.u32 %v3581_v13, 16 }
  0x61   : > { %v1139_v38 = vrot.slane %v1138_v34, 4  ;;  %v1727_v31 = vrot.slane %v1725_v20, 4  ;;  %v1730_v34 = vrot.slane %v1728_v21, 5 }
  0x62   : > { %2903 = vmatpush3.bf16.msra.mxu0 %v3103_v35  ;;  %v1125_v35 = vrot.slane %v1124_v25, 4  ;;  %v1152_v39 = vor.u32 %v1151_v29, %v1148_v27  ;;  %v3117_v27 = vld [vmem:[%s3770_s1 + $0x198] sm:$0xff]  }
  0x63   : > { %2927 = vmatpush3.bf16.msra.mxu1 %v3104_v40  ;;  %2904 = vmatprep.subr.bf16.mxu0 %v3105_v52  ;;  %v1162_v40 = vrot.slane %v1160_v30, 4  ;;  %v1144_v28 = vsel %vm3278_vm2, %v1139_v38, %v1143_v26  ;;  %v1748_v26 = vshll.u32 %v3585_v19, 16  ;;  %v3118_v29 = vld [vmem:[%s3770_s1 + $0x1d8] sm:$0xff]   ;;  %v1736_v30 = vrot.slane %v1734_v22, 5  ;;  %v3604_v38 = vld [vmem:[%s3235_s16 + $0x2c] sm:$0x1] }
  0x64   : > { %2928 = vmatprep.subr.bf16.mxu1 %v3106_v56  ;;  %v1130_v44 = vsel %vm3278_vm2, %v1125_v35, %v1129_v4  ;;  %v1153_v54 = vrot.slane %v1152_v39, 4  ;;  %v2579_v4 = vld [vmem:[%s3235_s16 + $0x18] sm:$0xf]  ;;  %v3119_v35 = vld [vmem:[%s3770_s1 + $0x190] sm:$0xff]   ;;  %v1731_v36 = vor.u32 %v1730_v34, %v1727_v31  ;;  %v3643_v22 = vld [vmem:[%s3235_s16 + $0x44] sm:$0x1] }
  0x65   : > { %v1166_v49 = vor.u32 %v1165_v42, %v1162_v40  ;;  %v2487_v61 = vcombine.low %v1130_v44, %v1144_v28  ;;  %v1742_v25 = vshll.u32 %v2579_v4, 16  ;;  %v3120_v39 = vld [vmem:[%s3770_s1 + $0x1d0] sm:$0xff]   ;;  %v1750_v42 = vrot.slane %v1748_v26, 5 }
  0x66   : > { %2905 = vmatpush3.bf16.msra.mxu0 %v3105_v52  ;;  %v2503_v52 = vld [vmem:[%s3235_s16 + $0x38] sm:$0xe]  ;;  %v1158_v3 = vsel %vm3278_vm2, %v1153_v54, %v1157_v45  ;;  %v1732_v45 = vrot.slane %v1731_v36, 4  ;;  %v3121_v54 = vld [vmem:[%s3770_s1 + $0x188] sm:$0xff]  }
  0x67   : > { %2929 = vmatpush3.bf16.msra.mxu1 %v3106_v56  ;;  %2906 = vmatprep.subr.bf16.mxu0 %v3107_v5  ;;  %v2511_v56 = vrot.slane %v2503_v52, 9  ;;  %v1167_v58 = vrot.slane %v1166_v49, 4 }
  0x68   : > { %2930 = vmatprep.subr.bf16.mxu1 %v3108_v24  ;;  %v1737_v51 = vsel %vm3278_vm2, %v1732_v45, %v1736_v30  ;;  %v3647_v30 = vld [vmem:[%s3235_s16 + $0x4c] sm:$0x1] }
  0x69   : > { %v1378_v6 = vsel %vm3361_vm5, %v2511_v56, %v1377_v57  ;;  %v3122_v57 = vld [vmem:[%s3770_s1 + $0x1c8] sm:$0xff]  }
  0x6a   : > { %2907 = vmatpush3.bf16.msra.mxu0 %v3107_v5  ;;  %v1172_v5 = vsel %vm3278_vm2, %v1167_v58, %v1171_v50  ;;  %v2532_v12 = vcombine.low %v1378_v6, %v1382_v7  ;;  %v1776_v50 = vshll.u32 %v3604_v38, 16  ;;  %v1784_v6 = vshll.u32 %v2585_v63, 16  ;;  %v3123_v7 = vld [vmem:[%s3770_s1 + $0x180] sm:$0xff]  }
  0x6b   : > { %2931 = vmatpush3.bf16.msra.mxu1 %v3108_v24  ;;  %2940 = vmatprep.subr.bf16.mxu0 %v3109_v9  ;;  %v2488_v11 = vcombine.low %v1158_v3, %v1172_v5  ;;  %v1739_v24 = vshrl.u32 %v2579_v4, 16  ;;  %v3627_v3 = vld [vmem:[%s3235_s16 + $0x3c] sm:$0x1]  ;;  %v1781_v5 = vshrl.u32 %v2585_v63, 16 }
  0x6c   : > { %2964 = vmatprep.subr.bf16.mxu1 %v3110_v10  ;;  %v1786_v20 = vrot.slane %v1784_v6, 5  ;;  %v1804_v21 = vshll.u32 %v3627_v3, 16 }
  0x6d   : > { %2909 = vmatmul.mubr.bf16.vlgmr.msra.gmra.mxu0 %v2486_v43  ;;  %v1741_v32 = vrot.slane %v1739_v24, 4  ;;  %v1783_v4 = vrot.slane %v1781_v5, 4  ;;  %v2626_v5 = vld [vmem:[%s3235_s16 + $0x38] sm:$0xe] }
  0x6e   : > { %2933 = vmatmul.mubr.bf16.vlgmr.msra.gmra.mxu1 %v2530_v33  ;;  %2941 = vmatpush3.bf16.msra.mxu0 %v3109_v9  ;;  %v1744_v33 = vrot.slane %v1742_v25, 5  ;;  %v2581_v9 = vld [vmem:[%s3235_s16 + $0x20] sm:$0xf] }
  0x6f   : > { %2965 = vmatpush3.bf16.msra.mxu1 %v3110_v10  ;;  %2942 = vmatprep.subr.bf16.mxu0 %v3111_v48  ;;  %v2583_v10 = vld [vmem:[%s3235_s16 + $0x28] sm:$0xf]  ;;  %v1753_v43 = vshrl.u32 %v2581_v9, 16  ;;  %v1756_v44 = vshll.u32 %v2581_v9, 16  ;;  %v1787_v34 = vor.u32 %v1786_v20, %v1783_v4  ;;  %v3133_v20 = vld [vmem:[%s3770_s1 + $0x218] sm:$0xff]  }
  0x70   : > { %2966 = vmatprep.subr.bf16.mxu1 %v3112_v60  ;;  %2912 = vmatprep.mubr.bf16.mxu0 %v2487_v61  ;;  %v1745_v40 = vor.u32 %v1744_v33, %v1741_v32  ;;  %v1767_v23 = vshrl.u32 %v2583_v10, 16  ;;  %v1770_v47 = vshll.u32 %v2583_v10, 16  ;;  %v1778_v61 = vrot.slane %v1776_v50, 5  ;;  %v3126_v9 = vld [vmem:[%s3235_s16 + $0x20] ss:$8 sps:$4 sm:$0xff]  }
  0x71   : > { %2936 = vmatprep.mubr.bf16.mxu1 %v2531_v2  ;;  %v1755_v28 = vrot.slane %v1753_v43, 4  ;;  %v1758_v49 = vrot.slane %v1756_v44, 5  ;;  %v2587_v2 = vld [vmem:[%s3235_s16 + $0x38] sm:$0xf]  ;;  %v1818_v33 = vshll.u32 %v3643_v22, 16  ;;  %v1832_v44 = vshll.u32 %v3647_v30, 16 }
  0x72   : > { %2943 = vmatpush3.bf16.msra.mxu0 %v3111_v48  ;;  %v1746_v48 = vrot.slane %v1745_v40, 4  ;;  %v1769_v52 = vrot.slane %v1767_v23, 4  ;;  %v1772_v53 = vrot.slane %v1770_v47, 5 }
  0x73   : > { %2967 = vmatpush3.bf16.msra.mxu1 %v3112_v60  ;;  %2944 = vmatprep.subr.bf16.mxu0 %v3113_v0  ;;  %v1759_v56 = vor.u32 %v1758_v49, %v1755_v28  ;;  %v3129_v28 = vld [vmem:[%s3235_s16 + $0x30] ss:$8 sps:$4 sm:$0xff]  }
  0x74   : > { %2968 = vmatprep.subr.bf16.mxu1 %v3114_v8  ;;  %v1751_v55 = vsel %vm3278_vm2, %v1746_v48, %v1750_v42  ;;  %v1773_v15 = vor.u32 %v1772_v53, %v1769_v52  ;;  %v1788_v42 = vrot.slane %v1787_v34, 4  ;;  %v1834_v52 = vrot.slane %v1832_v44, 5 }
  0x75   : > { %2913 = vmatmul.mubr.bf16.gmra.mxu0 %v2488_v11  ;;  %v2609_v58 = vcombine.low %v1737_v51, %v1751_v55  ;;  %v1760_v60 = vrot.slane %v1759_v56, 4  ;;  %v1820_v51 = vrot.slane %v1818_v33, 5  ;;  %v2016_v56 = vrot.slane %v3581_v13, 5  ;;  %v3131_v13 = vld [vmem:[%s3770_s1 + $0x228] sm:$0xff]  }
  0x76   : > { %2945 = vmatpush3.bf16.msra.mxu0 %v3113_v0  ;;  %2937 = vmatmul.mubr.bf16.gmra.mxu1 %v2532_v12  ;;  %v1774_v62 = vrot.slane %v1773_v15, 4  ;;  %v3623_v0 = vld [vmem:[%s3235_s16 + $0x34] sm:$0x1]  ;;  %v1795_v12 = vshrl.u32 %v2587_v2, 16  ;;  %v2622_v15 = vld [vmem:[%s3235_s16 + $0x18] sm:$0xe] }
  0x77   : > { %2969 = vmatpush3.bf16.msra.mxu1 %v3114_v8  ;;  %2946 = vmatprep.subr.bf16.mxu0 %v3115_v14  ;;  %v1765_v8 = vsel %vm3278_vm2, %v1760_v60, %v1764_v59  ;;  %v1790_v11 = vshll.u32 %v3623_v0, 16  ;;  %v2621_v59 = vld [vmem:[%s3235_s16 + $0x10] sm:$0xe]  ;;  %v2020_v60 = vrot.slane %v3585_v19, 5  ;;  %v2630_v63 = vrot.slane %v2622_v15, 9 }
  0x78   : > { %2970 = vmatprep.subr.bf16.mxu1 %v3116_v16  ;;  %2956 = vmatprep.mubr.bf16.mxu0 %v3125_v17  ;;  %v3124_v17 = vld [vmem:[%s3770_s1 + $0x1c0] sm:$0xff]   ;;  %v1779_v18 = vsel %vm3278_vm2, %v1774_v62, %v1778_v61  ;;  %v1797_v25 = vrot.slane %v1795_v12, 4  ;;  %v2629_v62 = vrot.slane %v2621_v59, 9  ;;  %v2028_v33 = vrot.slane %v3604_v38, 5 }
  0x79   : > { %2980 = vmatprep.mubr.bf16.mxu1 %v2609_v58  ;;  %v1792_v24 = vrot.slane %v1790_v11, 5  ;;  %v2610_v45 = vcombine.low %v1765_v8, %v1779_v18  ;;  %v2634_v8 = vrot.slane %v2626_v5, 9  ;;  %v2036_v11 = vrot.slane %v3627_v3, 5  ;;  %v3130_v12 = vld [vmem:[%s3235_s16 + $0x40] ss:$8 sps:$4 sm:$0xff]  }
  0x7a   : > { %2947 = vmatpush3.bf16.msra.mxu0 %v3115_v14  ;;  %v1798_v14 = vshll.u32 %v2587_v2, 16  ;;  %v2625_v2 = vld [vmem:[%s3235_s16 + $0x30] sm:$0xe]  ;;  %v3132_v3 = vld [vmem:[%s3770_s1 + $0x220] sm:$0xff]  }
  0x7b   : > { %2971 = vmatpush3.bf16.msra.mxu1 %v3116_v16  ;;  %2948 = vmatprep.subr.bf16.mxu0 %v3117_v27  ;;  %v2589_v16 = vld [vmem:[%s3235_s16 + $0x40] sm:$0xf]  ;;  %v1793_v49 = vsel %vm3278_vm2, %v1788_v42, %v1792_v24  ;;  %v2633_v19 = vrot.slane %v2625_v2, 9  ;;  %v3135_v24 = vld [vmem:[%s3770_s1 + $0x208] sm:$0xff]  }
  0x7c   : > { %2972 = vmatprep.subr.bf16.mxu1 %v3118_v29  ;;  %v1800_v26 = vrot.slane %v1798_v14, 5  ;;  %v1809_v31 = vshrl.u32 %v2589_v16, 16  ;;  %v1812_v32 = vshll.u32 %v2589_v16, 16  ;;  %v2017_v14 = vsel %vm3361_vm5, %v2629_v62, %v2016_v56 }
  0x7d   : > { %v2021_v16 = vsel %vm3361_vm5, %v2630_v63, %v2020_v60 }
  0x7e   : > { %2949 = vmatpush3.bf16.msra.mxu0 %v3117_v27  ;;  %v2591_v27 = vld [vmem:[%s3235_s16 + $0x48] sm:$0xf]  ;;  %v1801_v36 = vor.u32 %v1800_v26, %v1797_v25  ;;  %v1811_v10 = vrot.slane %v1809_v31, 4  ;;  %v1814_v43 = vrot.slane %v1812_v32, 5  ;;  %v2653_v18 = vcombine.low %v2017_v14, %v2021_v16  ;;  %v2623_v25 = vld [vmem:[%s3235_s16 + $0x20] sm:$0xe] }
  0x7f   : > { %2973 = vmatpush3.bf16.msra.mxu1 %v3118_v29  ;;  %2950 = vmatprep.subr.bf16.mxu0 %v3119_v35  ;;  %v1806_v29 = vrot.slane %v1804_v21, 5  ;;  %v1826_v40 = vshll.u32 %v2591_v27, 16  ;;  %v3134_v21 = vld [vmem:[%s3770_s1 + $0x210] sm:$0xff]   ;;  %v2624_v26 = vld [vmem:[%s3235_s16 + $0x28] sm:$0xe]  ;;  %v2631_v34 = vrot.slane %v2623_v25, 9 }
  0x80   : > { %2974 = vmatprep.subr.bf16.mxu1 %v3120_v39  ;;  %v1802_v23 = vrot.slane %v1801_v36, 4  ;;  %v1815_v50 = vor.u32 %v1814_v43, %v1811_v10  ;;  %v2628_v31 = vld [vmem:[%s3235_s16 + $0x48] sm:$0xe]  ;;  %v2632_v32 = vrot.slane %v2624_v26, 9  ;;  %v3136_v36 = vld [vmem:[%s3770_s1 + $0x200] sm:$0xff]  }
  0x81   : > { %v1828_v48 = vrot.slane %v1826_v40, 5 }
  0x82   : > { %2951 = vmatpush3.bf16.msra.mxu0 %v3119_v35  ;;  %v3127_v35 = vld [vmem:[%s3770_s1 + $0x238] sm:$0xff]   ;;  %v1807_v53 = vsel %vm3278_vm2, %v1802_v23, %v1806_v29  ;;  %v1816_v55 = vrot.slane %v1815_v50, 4  ;;  %v2024_v29 = vrot.slane %v3600_v37, 5  ;;  %v2029_v38 = vsel %vm3361_vm5, %v2632_v32, %v2028_v33 }
  0x83   : > { %2975 = vmatpush3.bf16.msra.mxu1 %v3120_v39  ;;  %2952 = vmatprep.subr.bf16.mxu0 %v3121_v54  ;;  %v1823_v39 = vshrl.u32 %v2591_v27, 16  ;;  %v2627_v27 = vld [vmem:[%s3235_s16 + $0x40] sm:$0xe]  ;;  %s2667_s16 = sshll.u32 %s3796_s12, 5  ;;  %s3748_s12 = scalar_lea.vmem %s3772_s3, %s2668_s7 }
  0x84   : > { %2976 = vmatprep.subr.bf16.mxu1 %v3122_v57  ;;  %v1821_v61 = vsel %vm3278_vm2, %v1816_v55, %v1820_v51  ;;  %v2635_v10 = vrot.slane %v2627_v27, 9  ;;  %v2025_v37 = vsel %vm3361_vm5, %v2631_v34, %v2024_v29  ;;  %s218_s6 = scalar_lea.vmem %s3771_s2, %s2667_s16 }
  0x85   : > { %v1825_v47 = vrot.slane %v1823_v39, 4  ;;  %v2636_v39 = vrot.slane %v2628_v31, 9  ;;  %v2654_v40 = vcombine.low %v2025_v37, %v2029_v38 }
  0x86   : > { %2953 = vmatpush3.bf16.msra.mxu0 %v3121_v54 }
  0x87   : > { %2977 = vmatpush3.bf16.msra.mxu1 %v3122_v57  ;;  %2954 = vmatprep.subr.bf16.mxu0 %v3123_v7  ;;  %v1829_v54 = vor.u32 %v1828_v48, %v1825_v47  ;;  %v2611_v57 = vcombine.low %v1793_v49, %v1807_v53 }
  0x88   : > { %2978 = vmatprep.subr.bf16.mxu1 %v3124_v17 }
  0x89   : > { %v1830_v58 = vrot.slane %v1829_v54, 4 }
  0x8a   : > { %2955 = vmatpush3.bf16.msra.mxu0 %v3123_v7  ;;  %v2032_v7 = vrot.slane %v3623_v0, 5  ;;  %v2037_v0 = vsel %vm3361_vm5, %v2634_v8, %v2036_v11 }
  0x8b   : > { %2979 = vmatpush3.bf16.msra.mxu1 %v3124_v17  ;;  %2988 = vmatprep.subr.bf16.mxu0 %v3127_v35  ;;  %v1835_v6 = vsel %vm3278_vm2, %v1830_v58, %v1834_v52 }
  0x8c   : > { %3012 = vmatprep.subr.bf16.mxu1 %v3127_v35  ;;  %v2612_v17 = vcombine.low %v1821_v61, %v1835_v6  ;;  %v2033_v41 = vsel %vm3361_vm5, %v2633_v19, %v2032_v7 }
  0x8d   : > { %2957 = vmatmul.mubr.bf16.vlgmr.msra.gmra.mxu0 %v3126_v9  ;;  %v2655_v4 = vcombine.low %v2033_v41, %v2037_v0  ;;  %v2040_v9 = vrot.slane %v3643_v22, 5 }
  0x8e   : > { %2981 = vmatmul.mubr.bf16.vlgmr.msra.gmra.mxu1 %v2610_v45  ;;  %2989 = vmatpush3.bf16.msra.mxu0 %v3127_v35 }
  0x8f   : > { %3020 = vmatpush3.bf16.msra.mxu1 %v3127_v35  ;;  %2990 = vmatprep.subr.bf16.mxu0 %v3128_v46  ;;  %v2044_v35 = vrot.slane %v3647_v30, 5  ;;  %v2041_v22 = vsel %vm3361_vm5, %v2635_v10, %v2040_v9 }
  0x90   : > { %3013 = vmatprep.subr.bf16.mxu1 %v3128_v46  ;;  %2960 = vmatprep.mubr.bf16.mxu0 %v3129_v28 }
  0x91   : > { %2984 = vmatprep.mubr.bf16.mxu1 %v2611_v57  ;;  %v2045_v30 = vsel %vm3361_vm5, %v2636_v39, %v2044_v35 }
  0x92   : > { %2991 = vmatpush3.bf16.msra.mxu0 %v3128_v46  ;;  %v2656_v42 = vcombine.low %v2041_v22, %v2045_v30 }
  0x93   : > { %3021 = vmatpush3.bf16.msra.mxu1 %v3128_v46  ;;  %2992 = vmatprep.subr.bf16.mxu0 %v3131_v13 }
  0x94   : > { %3014 = vmatprep.subr.bf16.mxu1 %v3131_v13 }
  0x95   : > { %2961 = vmatmul.mubr.bf16.gmra.mxu0 %v3130_v12 }
  0x96   : > { %2993 = vmatpush3.bf16.msra.mxu0 %v3131_v13  ;;  %2985 = vmatmul.mubr.bf16.gmra.mxu1 %v2612_v17 }
  0x97   : > { %3022 = vmatpush3.bf16.msra.mxu1 %v3131_v13  ;;  %2994 = vmatprep.subr.bf16.mxu0 %v3132_v3 }
  0x98   : > { %3015 = vmatprep.subr.bf16.mxu1 %v3132_v3  ;;  %3004 = vmatprep.mubr.bf16.mxu0 %v2653_v18 }
  0x99   : > { %3008 = vmatprep.mubr.bf16.mxu1 %v2655_v4 }
  0x9a   : > { %2995 = vmatpush3.bf16.msra.mxu0 %v3132_v3 }
  0x9b   : > { %3023 = vmatpush3.bf16.msra.mxu1 %v3132_v3  ;;  %2996 = vmatprep.subr.bf16.mxu0 %v3133_v20 }
  0x9c   : > { %3016 = vmatprep.subr.bf16.mxu1 %v3133_v20 }
  0x9e   : > { %2997 = vmatpush3.bf16.msra.mxu0 %v3133_v20 }
  0x9f   : > { %3024 = vmatpush3.bf16.msra.mxu1 %v3133_v20  ;;  %2998 = vmatprep.subr.bf16.mxu0 %v3134_v21 }
  0xa0   : > { %3017 = vmatprep.subr.bf16.mxu1 %v3134_v21 }
  0xa2   : > { %2999 = vmatpush3.bf16.msra.mxu0 %v3134_v21 }
  0xa3   : > { %3025 = vmatpush3.bf16.msra.mxu1 %v3134_v21  ;;  %3000 = vmatprep.subr.bf16.mxu0 %v3135_v24 }
  0xa4   : > { %3018 = vmatprep.subr.bf16.mxu1 %v3135_v24 }
  0xa6   : > { %3001 = vmatpush3.bf16.msra.mxu0 %v3135_v24 }
  0xa7   : > { %3026 = vmatpush3.bf16.msra.mxu1 %v3135_v24  ;;  %3002 = vmatprep.subr.bf16.mxu0 %v3136_v36 }
  0xa8   : > { %3019 = vmatprep.subr.bf16.mxu1 %v3136_v36 }
  0xaa   : > { %3003 = vmatpush3.bf16.msra.mxu0 %v3136_v36 }
  0xab   : > { %3027 = vmatpush3.bf16.msra.mxu1 %v3136_v36 }
  0xad   : > { %3005 = vmatmul.mubr.bf16.vlgmr.msra.gmra.mxu0 %v2654_v40 }
  0xae   : > { %3009 = vmatmul.mubr.bf16.vlgmr.msra.gmra.mxu1 %v2656_v42 }
  0xed   : > { %v2814_v43 = vpop.f32.mrf.mxu0 }
  0xee   : > { %v2838_v45 = vpop.f32.mrf.mxu1 }
  0xef   : > { %v493_v44 = vpop.f32.mrf.mxu0  ;;  %v639_v9 = vadd.f32 %v2838_v45, %v2814_v43 }
  0xf0   : > { %v630_v23 = vpop.f32.mrf.mxu1 }
  0xf1   : > { %v2815_v46 = vpop.f32.mrf.mxu0  ;;  %v631_v39 = vadd.f32 %v630_v23, %v493_v44 }
  0xf2   : > { %v2839_v28 = vpop.f32.mrf.mxu1 }
  0xf3   : > { %v496_v47 = vpop.f32.mrf.mxu0  ;;  %v642_v30 = vadd.f32 %v2839_v28, %v2815_v46 }
  0xf4   : > { %v633_v50 = vpop.f32.mrf.mxu1 }
  0xf5   : > { %v2818_v48 = vpop.f32.mrf.mxu0 }
  0xf6   : > { %v2842_v51 = vpop.f32.mrf.mxu1 }
  0xf7   : > { %v509_v49 = vpop.f32.mrf.mxu0  ;;  %v655_v36 = vadd.f32 %v2842_v51, %v2818_v48 }
  0xf8   : > { %v646_v52 = vpop.f32.mrf.mxu1 }
  0xf9   : > { %v2819_v1 = vpop.f32.mrf.mxu0  ;;  %v647_v38 = vadd.f32 %v646_v52, %v509_v49 }
  0xfa   : > { %v2843_v55 = vpop.f32.mrf.mxu1 }
  0xfb   : > { %v512_v53 = vpop.f32.mrf.mxu0 }
  0xfc   : > { %v649_v57 = vpop.f32.mrf.mxu1 }
 0x10d   : > { %v2862_v54 = vpop.f32.mrf.mxu0 }
 0x10e   : > { %v2886_v58 = vpop.f32.mrf.mxu1  ;;  %v868_v37 = vadd.f32 %v2862_v54, %v639_v9 }
 0x10f   : > { %v835_v56 = vpop.f32.mrf.mxu0 }
 0x110   : > { %v1006_v15 = vpop.f32.mrf.mxu1  ;;  %v866_v40 = vadd.f32 %v835_v56, %v631_v39 }
 0x111   : > { %v2863_v59 = vpop.f32.mrf.mxu0 }
 0x112   : > { %v2887_v61 = vpop.f32.mrf.mxu1  ;;  %v869_v43 = vadd.f32 %v2863_v59, %v642_v30 }
 0x113   : > { %v838_v60 = vpop.f32.mrf.mxu0 }
 0x114   : > { %v3718_v63 = vpop.f32.mrf.mxu1  ;;  %v1040_v54 = vadd.f32 %v2887_v61, %v869_v43 }
 0x115   : > { %v2866_v62 = vpop.f32.mrf.mxu0  ;;  %3777 = vst [vmem:[#allocation2_spill] sm:$0xff] %v3718_v63  ;;  %v1039_v63 = vadd.f32 %v2886_v58, %v868_v37 }
 0x116   : > { %v2890_v5 = vpop.f32.mrf.mxu1  ;;  %v872_v22 = vadd.f32 %v2866_v62, %v655_v36 }
 0x117   : > { %v851_v2 = vpop.f32.mrf.mxu0 }
 0x118   : > { %v1022_v6 = vpop.f32.mrf.mxu1  ;;  %v1043_v48 = vadd.f32 %v2890_v5, %v872_v22 }
 0x119   : > { %v2867_v13 = vpop.f32.mrf.mxu0 }
 0x11a   : > { %v2891_v7 = vpop.f32.mrf.mxu1 }
 0x11b   : > { %v854_v19 = vpop.f32.mrf.mxu0 }
 0x11c   : > { %v1025_v11 = vpop.f32.mrf.mxu1 }
 0x12d   : > { %v2910_v8 = vpop.f32.mrf.mxu0 }
 0x12e   : > { %v2934_v14 = vpop.f32.mrf.mxu1  ;;  %v1321_v23 = vadd.f32 %v2910_v8, %v1039_v63 }
 0x12f   : > { %v1288_v12 = vpop.f32.mrf.mxu0 }
 0x130   : > { %v1498_v17 = vpop.f32.mrf.mxu1  ;;  %v1531_v58 = vadd.f32 %v2934_v14, %v1321_v23 }
 0x131   : > { %v2911_v16 = vpop.f32.mrf.mxu0 }
 0x132   : > { %v3720_v0 = vpop.f32.mrf.mxu1  ;;  %v1322_v59 = vadd.f32 %v2911_v16, %v1040_v54  ;;  %v2687_v16 = vld [vmem:[%s218_s6 + $0x18] sm:$0xff]  }
 0x133   : > { %v1291_v41 = vpop.f32.mrf.mxu0  ;;  %3778 = vst [vmem:[#allocation3_spill] sm:$0xff] %v3720_v0  ;;  %v2683_v36 = vunpack.c.l.bf16 %v2687_v16 }
 0x134   : > { %v3722_v18 = vpop.f32.mrf.mxu1 }
 0x135   : > { %v2914_v3 = vpop.f32.mrf.mxu0  ;;  %3779 = vst [vmem:[#allocation4_spill] sm:$0xff] %v3722_v18  ;;  %v870_v18 = vadd.f32 %v851_v2, %v647_v38 }
 0x136   : > { %v2938_v4 = vpop.f32.mrf.mxu1  ;;  %v1325_v46 = vadd.f32 %v2914_v3, %v1043_v48 }
 0x137   : > { %v1304_v20 = vpop.f32.mrf.mxu0  ;;  %v1041_v49 = vadd.f32 %v1022_v6, %v870_v18 }
 0x138   : > { %v1514_v21 = vpop.f32.mrf.mxu1 }
 0x139   : > { %v2915_v24 = vpop.f32.mrf.mxu0  ;;  %v1323_v62 = vadd.f32 %v1304_v20, %v1041_v49 }
 0x13a   : > { %v2939_v25 = vpop.f32.mrf.mxu1  ;;  %v3785_v8 = vld [vmem:[#allocation3_spill] sm:$0xff] }
 0x13b   : > { %v1307_v26 = vpop.f32.mrf.mxu0 }
 0x13c   : > { %v3724_v31 = vpop.f32.mrf.mxu1 }
 0x13d   : > { %3780 = vst [vmem:[#allocation5_spill] sm:$0xff] %v3724_v31  ;;  %v658_v31 = vadd.f32 %v2843_v55, %v2819_v1 }
 0x13f   : > { %v873_v51 = vadd.f32 %v2867_v13, %v658_v31  ;;  %v1533_v13 = vadd.f32 %v1514_v21, %v1323_v62 }
 0x141   : > { %v1044_v56 = vadd.f32 %v2891_v7, %v873_v51  ;;  %v2685_v7 = vld [vmem:[%s218_s6 + $0x8] sm:$0xff]  }
 0x142   : > { %v2676_v49 = vunpack.c.h.bf16 %v2685_v7 }
 0x144   : > { %v3787_v21 = vld [vmem:[#allocation5_spill] sm:$0xff] }
 0x14d   : > { %v2958_v27 = vpop.f32.mrf.mxu0 }
 0x14e   : > { %v2982_v34 = vpop.f32.mrf.mxu1  ;;  %v1702_v5 = vadd.f32 %v2958_v27, %v1531_v58  ;;  %v2675_v27 = vunpack.c.l.bf16 %v2685_v7 }
 0x14f   : > { %v1669_v29 = vpop.f32.mrf.mxu0 }
 0x150   : > { %v3726_v32 = vpop.f32.mrf.mxu1  ;;  %v1984_v31 = vadd.f32 %v2982_v34, %v1702_v5 }
 0x151   : > { %3781 = vst [vmem:[#allocation6_spill] sm:$0xff] %v3726_v32  ;;  %v2959_v33 = vpop.f32.mrf.mxu0  ;;  %v634_v32 = vadd.f32 %v633_v50, %v496_v47  ;;  %v3784_v47 = vld [vmem:[#allocation2_spill] sm:$0xff] }
 0x152   : > { %v3728_v35 = vpop.f32.mrf.mxu1 }
 0x153   : > { %3782 = vst [vmem:[#allocation7_spill] sm:$0xff] %v3728_v35  ;;  %v3730_v10 = vpop.f32.mrf.mxu0  ;;  %v650_v35 = vadd.f32 %v649_v57, %v512_v53  ;;  %v867_v44 = vadd.f32 %v838_v60, %v634_v32  ;;  %v1535_v57 = vadd.f32 %v2938_v4, %v1325_v46  ;;  %v3786_v4 = vld [vmem:[#allocation4_spill] sm:$0xff] }
 0x154   : > { %3783 = vst [vmem:[#allocation8_spill] sm:$0xff] %v3730_v10  ;;  %v3732_v42 = vpop.f32.mrf.mxu1  ;;  %v1037_v10 = vadd.f32 %v1006_v15, %v866_v40  ;;  %v1326_v15 = vadd.f32 %v2915_v24, %v1044_v56  ;;  %v2686_v32 = vld [vmem:[%s218_s6 + $0x10] sm:$0xff]  }
 0x155   : > { %v2962_v0 = vpop.f32.mrf.mxu0  ;;  %v871_v52 = vadd.f32 %v854_v19, %v650_v35  ;;  %v1038_v50 = vadd.f32 %v3784_v47, %v867_v44  ;;  %v2679_v43 = vunpack.c.l.bf16 %v2686_v32 }
 0x156   : > { %v2986_v45 = vpop.f32.mrf.mxu1  ;;  %v1319_v1 = vadd.f32 %v1288_v12, %v1037_v10  ;;  %v1706_v19 = vadd.f32 %v2962_v0, %v1535_v57  ;;  %v1532_v12 = vadd.f32 %v3785_v8, %v1322_v59  ;;  %v1536_v3 = vadd.f32 %v2939_v25, %v1326_v15 }
 0x157   : > { %v1685_v28 = vpop.f32.mrf.mxu0  ;;  %v1042_v53 = vadd.f32 %v1025_v11, %v871_v52  ;;  %v1320_v2 = vadd.f32 %v1291_v41, %v1038_v50  ;;  %v2670_v11 = vld [vmem:[%s218_s6] sm:$0xff]   ;;  %v2680_v15 = vunpack.c.h.bf16 %v2686_v32 }
 0x158   : > { %v1967_v55 = vpop.f32.mrf.mxu1  ;;  %v1529_v63 = vadd.f32 %v1498_v17, %v1319_v1  ;;  %v1704_v18 = vadd.f32 %v1685_v28, %v1533_v13  ;;  %v1703_v17 = vadd.f32 %v2959_v33, %v1532_v12  ;;  %v1988_v0 = vadd.f32 %v2986_v45, %v1706_v19 }
 0x159   : > { %v2963_v60 = vpop.f32.mrf.mxu0  ;;  %v1324_v6 = vadd.f32 %v1307_v26, %v1042_v53  ;;  %v1530_v24 = vadd.f32 %v3786_v4, %v1320_v2  ;;  %v2671_v22 = vunpack.c.l.bf16 %v2670_v11  ;;  %v2684_v1 = vunpack.c.h.bf16 %v2687_v16 }
 0x15a   : > { %v2987_v61 = vpop.f32.mrf.mxu1  ;;  %v1700_v14 = vadd.f32 %v1669_v29, %v1529_v63  ;;  %v1707_v9 = vadd.f32 %v2963_v60, %v1536_v3  ;;  %v3788_v29 = vld [vmem:[#allocation6_spill] sm:$0xff]  ;;  %v1986_v30 = vadd.f32 %v1967_v55, %v1704_v18  ;;  %v3790_v45 = vld [vmem:[#allocation7_spill] sm:$0xff]  ;;  %v2672_v50 = vunpack.c.h.bf16 %v2670_v11 }
 0x15b   : > { %v1688_v20 = vpop.f32.mrf.mxu0  ;;  %v1534_v26 = vadd.f32 %v3787_v21, %v1324_v6  ;;  %v3789_v25 = vld [vmem:[#allocation8_spill] sm:$0xff]  ;;  %v1985_v48 = vadd.f32 %v3790_v45, %v1703_v17 }
 0x15c   : > { %v1970_v41 = vpop.f32.mrf.mxu1  ;;  %v1982_v10 = vadd.f32 %v3788_v29, %v1700_v14  ;;  %v1701_v39 = vadd.f32 %v3789_v25, %v1530_v24  ;;  %v1989_v52 = vadd.f32 %v2987_v61, %v1707_v9 }
 0x15d   : > { %v1705_v34 = vadd.f32 %v1688_v20, %v1534_v26 }
 0x15e   : > { %v1983_v55 = vadd.f32 %v3732_v42, %v1701_v39 }
 0x15f   : > { %v1987_v58 = vadd.f32 %v1970_v41, %v1705_v34 }
 0x16d   : > { %v3006_v35 = vpop.f32.mrf.mxu0 }
 0x16e   : > { %v2194_v37 = vadd.f32 %v3006_v35, %v1984_v31  ;;  %v3010_v38 = vpop.f32.mrf.mxu1 }
 0x16f   : > { %v2198_v33 = vadd.f32 %v3010_v38, %v1988_v0  ;;  %v2161_v40 = vpop.f32.mrf.mxu0 }
 0x170   : > { %v2218_v51 = vadd.f32 %v2675_v27, %v2194_v37  ;;  %v2192_v44 = vadd.f32 %v2161_v40, %v1982_v10  ;;  %v2177_v23 = vpop.f32.mrf.mxu1 }
 0x171   : > { %v2222_v46 = vadd.f32 %v2683_v36, %v2198_v33  ;;  %v2196_v28 = vadd.f32 %v2177_v23, %v1986_v30  ;;  %v3007_v54 = vpop.f32.mrf.mxu0 }
 0x172   : > { %2226 = vst [vmem:[%s3748_s12 + $0x10] sm:$0xff] %v2218_v51  ;;  %v2216_v56 = vadd.f32 %v2671_v22, %v2192_v44  ;;  %v2195_v62 = vadd.f32 %v3007_v54, %v1985_v48  ;;  %v3011_v47 = vpop.f32.mrf.mxu1 }
 0x173   : > { %2230 = vst [vmem:[%s3748_s12 + $0x30] sm:$0xff] %v2222_v46  ;;  %v2220_v59 = vadd.f32 %v2679_v43, %v2196_v28  ;;  %v2199_v53 = vadd.f32 %v3011_v47, %v1989_v52  ;;  %v2164_v57 = vpop.f32.mrf.mxu0 }
 0x174   : > { %2224 = vst [vmem:[%s3748_s12] sm:$0xff] %v2216_v56  ;;  %v2219_v60 = vadd.f32 %v2676_v49, %v2195_v62  ;;  %v2193_v63 = vadd.f32 %v2164_v57, %v1983_v55  ;;  %v2180_v42 = vpop.f32.mrf.mxu1 }
 0x175   : > { %2228 = vst [vmem:[%s3748_s12 + $0x20] sm:$0xff] %v2220_v59  ;;  %v2223_v2 = vadd.f32 %v2684_v1, %v2199_v53  ;;  %v2197_v5 = vadd.f32 %v2180_v42, %v1987_v58 }
 0x176   : > { %2227 = vst [vmem:[%s3748_s12 + $0x18] sm:$0xff] %v2219_v60  ;;  %v2217_v61 = vadd.f32 %v2672_v50, %v2193_v63 }
 0x177   : > { %2231 = vst [vmem:[%s3748_s12 + $0x38] sm:$0xff] %v2223_v2  ;;  %v2221_v13 = vadd.f32 %v2680_v15, %v2197_v5 }
 0x178   : > { %2225 = vst [vmem:[%s3748_s12 + $0x8] sm:$0xff] %v2217_v61 }
 0x179   : > { %2229 = vst [vmem:[%s3748_s12 + $0x28] sm:$0xff] %v2221_v13 }
 0x17a PF: > { %s13_s14 = sadd.s32 1, %s3159_s14   ;;  %s3791_s12 = smov %s3155_s13 }
 0x17b   : > { %p10_p5 = scmp.ge.s32.totalorder %s13_s14, 4   ;;  %s3792_s13 = smov %s3794_s15 }
 0x17d   :  { %12 = sbr.rel (!%p10_p5) target bundleno = 2 (0x2), region = 75 }

</bundles_post_ra>
